<compile_context>
chip_gen: v5e
topology: v5e:2x2
jax: 0.10.0
libtpu: 0.0.40
codegen_flags: <defaults>
</compile_context>

<pallas_src>
import functools

import jax
import jax.numpy as jnp
from jax import lax
from jax.experimental import pallas as pl
from jax.experimental.pallas import tpu as pltpu

START_TAG = "<START>"
STOP_TAG = "<STOP>"
tag_to_ix = {"PERSONB": 0, "PERSONI": 1, "LOCATIONB": 2, "LOCATIONI": 3,
             "ORGANIZATIONB": 4, "ORGANIZATIONI": 5, "O": 6,
             START_TAG: 7, STOP_TAG: 8}
TAGSET = len(tag_to_ix)
START_IDX = tag_to_ix[START_TAG]
STOP_IDX = tag_to_ix[STOP_TAG]
TPAD = 128                      # lane-dense padded "next tag" axis
PPREV = 16                      # sublane-padded "prev tag" axis (9 real tags)
NEG = -10000.0

assert TAGSET <= PPREV <= TPAD


def _round_up(x, m):
    return ((x + m - 1) // m) * m


def _unroll_for(s):
    return True if s <= 16 else 8


# ---------------------------------------------------------------------------
# Fused kernel: HBM row gather -> BiLSTM -> hidden2tag -> Viterbi -> backtrace
# ---------------------------------------------------------------------------
def bilstm_crf_kernel(sent_ref, emb_hbm, wihf_ref, wihb_ref, b_ref, whh_ref,
                      h0_ref, c0_ref, w2t_ref, b2t_ref, trans_ref, stop_ref,
                      score_ref, path_ref,
                      x_ref, xrev_ref, dma_sem, pre_ref, hf_ref, hb_ref,
                      feats_ref, bps_ref, *, hd):
    S = sent_ref.shape[0]
    HK = whh_ref.shape[0]           # recurrent K (2*Hd rounded up to 8)
    G4 = whh_ref.shape[1]           # 4 gate blocks, each HP lanes
    HP = G4 // 4
    unr = _unroll_for(S)

    # ---- 1. embedding gather: DMA only the S needed rows from HBM ----------
    # Each token row is copied twice: once in sentence order (forward input),
    # once reversed (backward input), so no flip is ever needed in VMEM.
    copies = []
    for t in range(S):
        idx = sent_ref[t]
        src = emb_hbm.at[pl.ds(idx, 1), :]
        c_f = pltpu.make_async_copy(src, x_ref.at[pl.ds(t, 1), :],
                                    dma_sem.at[0, t])
        c_b = pltpu.make_async_copy(src, xrev_ref.at[pl.ds(S - 1 - t, 1), :],
                                    dma_sem.at[1, t])
        c_f.start()
        c_b.start()
        copies.append(c_f)
        copies.append(c_b)
    for cp in copies:
        cp.wait()

    # ---- 2. input projection (both directions, all timesteps, bias folded) -
    # pre_ref[t] = [fwd gates of x_t | bwd gates of x_{S-1-t}], gate blocks
    # padded to 128 lanes each -> all later slices are vreg-aligned.
    pre_ref[...] = (
        jnp.dot(x_ref[...], wihf_ref[...], preferred_element_type=jnp.float32)
        + jnp.dot(xrev_ref[...], wihb_ref[...],
                  preferred_element_type=jnp.float32)
        + b_ref[...])

    # ---- 3. fused fwd/bwd recurrence (fori_loop, hidden -> VMEM scratch) ---
    whh = whh_ref[...]                                    # (HK, 4*HP)

    def lstm_body(t, hc):
        h, c = hc                                         # (1, HP) each
        g = (pre_ref[pl.ds(t, 1), :]
             + jnp.dot(h[:, 0:HK], whh, preferred_element_type=jnp.float32))
        i_g = jax.nn.sigmoid(g[:, 0 * HP:1 * HP])
        f_g = jax.nn.sigmoid(g[:, 1 * HP:2 * HP])
        g_g = jnp.tanh(g[:, 2 * HP:3 * HP])
        o_g = jax.nn.sigmoid(g[:, 3 * HP:4 * HP])
        c = f_g * c + i_g * g_g
        h = o_g * jnp.tanh(c)
        hf_ref[pl.ds(t, 1), :] = h                        # forward pos t
        hb_ref[pl.ds(S - 1 - t, 1), :] = h                # backward pos S-1-t
        return h, c

    lax.fori_loop(0, S, lstm_body, (h0_ref[...], c0_ref[...]), unroll=unr)

    # ---- 4. hidden2tag (tag axis padded to 128 lanes) -----------------------
    lane_hp = lax.broadcasted_iota(jnp.int32, (1, HP), 1)
    lstm_out = jnp.where(lane_hp < hd, hf_ref[...], hb_ref[...])   # (S, HP)
    feats_ref[...] = (
        jnp.dot(lstm_out[:, 0:HK], w2t_ref[...],
                preferred_element_type=jnp.float32) + b2t_ref[...])

    # ---- 5. Viterbi forward recursion (prev axis = 16 sublanes) -------------
    trans_pn = trans_ref[...]                              # (16, 128) [prev, next]
    prev_iota = lax.broadcasted_iota(jnp.int32, (PPREV, TPAD), 0)
    lane_iota = lax.broadcasted_iota(jnp.int32, (PPREV, TPAD), 1)
    eye_pl = prev_iota == lane_iota
    ones_nn = jnp.ones((TPAD, TPAD), jnp.float32)
    lane_row = lax.broadcasted_iota(jnp.int32, (1, TPAD), 1)

    fv0 = jnp.where(lane_row == START_IDX, 0.0, NEG).astype(jnp.float32)

    def vit_body(t, fv_row):
        # put forward_var (a lane row) back on the sublane (prev) axis with a
        # diag-select + small MXU dot instead of a 128x128 broadcast+transpose
        diag = jnp.where(eye_pl, jnp.broadcast_to(fv_row, (PPREV, TPAD)), 0.0)
        fv_bc = jnp.dot(diag, ones_nn, preferred_element_type=jnp.float32)
        scores = fv_bc + trans_pn                          # (16, 128)
        best = jnp.max(scores, axis=0, keepdims=True)      # (1, 128)
        bps_ref[pl.ds(t, 1), :] = jnp.min(
            jnp.where(scores == best, prev_iota, PPREV), axis=0, keepdims=True)
        return best + feats_ref[pl.ds(t, 1), :]

    fv_row = lax.fori_loop(0, S, vit_body, fv0, unroll=unr)

    # ---- 6. terminal + in-kernel backpointer walk ----------------------------
    term = fv_row + stop_ref[...]                          # (1, 128)
    best_score = jnp.max(term, axis=1, keepdims=True)      # (1, 1)
    cur = jnp.min(jnp.where(term == best_score, lane_row, TPAD),
                  axis=1, keepdims=True)                   # (1, 1) best tag
    path0 = jnp.where(lane_row == S - 1, cur, jnp.zeros((1, TPAD), jnp.int32))

    def walk_body(i, carry):
        cur, path = carry
        t = S - 1 - i
        bp = bps_ref[pl.ds(t, 1), :]
        cur = jnp.max(jnp.where(lane_row == cur, bp, -1),
                      axis=1, keepdims=True)               # cur = bps[t][cur]
        path = jnp.where(lane_row == t - 1, cur, path)
        return cur, path

    _, path = lax.fori_loop(0, S - 1, walk_body, (cur, path0), unroll=unr)
    # TODO(synk): the reference also asserts bps[0][path[0]] == START_IDX
    # (host-side assert); skipped in-kernel.

    score_ref[...] = best_score
    path_ref[...] = path


# ---------------------------------------------------------------------------
# Host-side parameter preparation (merge directions/gates, pad gate & tag axes)
# ---------------------------------------------------------------------------
def prepare_params(raw):
    Hd = raw["whh_f"].shape[1]
    E = raw["wih_f"].shape[1]
    H = 2 * Hd
    HP = _round_up(H, 128)          # per-gate block width (lane aligned)
    HK = _round_up(H, 8)            # recurrent contraction width
    G4 = 4 * HP

    def gate(w, gi):                # torch row-block order [i, f, g, o]
        return w[gi * Hd:(gi + 1) * Hd, :]

    wihf = jnp.zeros((E, G4), jnp.float32)
    wihb = jnp.zeros((E, G4), jnp.float32)
    whh = jnp.zeros((HK, G4), jnp.float32)     # block-diagonal per direction
    b = jnp.zeros((1, G4), jnp.float32)
    bf = raw["bih_f"] + raw["bhh_f"]
    bb = raw["bih_b"] + raw["bhh_b"]
    for gi in range(4):
        col0 = gi * HP
        wihf = wihf.at[:, col0:col0 + Hd].set(gate(raw["wih_f"], gi).T)
        wihb = wihb.at[:, col0 + Hd:col0 + H].set(gate(raw["wih_b"], gi).T)
        whh = whh.at[0:Hd, col0:col0 + Hd].set(gate(raw["whh_f"], gi).T)
        whh = whh.at[Hd:H, col0 + Hd:col0 + H].set(gate(raw["whh_b"], gi).T)
        b = b.at[0, col0:col0 + Hd].set(bf[gi * Hd:(gi + 1) * Hd])
        b = b.at[0, col0 + Hd:col0 + H].set(bb[gi * Hd:(gi + 1) * Hd])

    w2t = jnp.zeros((HK, TPAD), jnp.float32).at[0:H, 0:TAGSET].set(raw["w2t"].T)
    b2t = jnp.full((1, TPAD), NEG, jnp.float32).at[0, 0:TAGSET].set(raw["b2t"])

    trans_full = jnp.full((TPAD, TPAD), NEG, jnp.float32)
    trans_full = trans_full.at[:TAGSET, :TAGSET].set(raw["transitions"])  # [next, prev]
    trans_pn = trans_full.T[:PPREV, :]                    # (16, 128) [prev, next]
    stop_row = trans_full[STOP_IDX:STOP_IDX + 1, :]       # (1, 128) over prev

    h0 = (jnp.zeros((1, HP), jnp.float32)
          .at[0, 0:Hd].set(raw["h0"][0]).at[0, Hd:H].set(raw["h0"][1]))
    c0 = (jnp.zeros((1, HP), jnp.float32)
          .at[0, 0:Hd].set(raw["c0"][0]).at[0, Hd:H].set(raw["c0"][1]))
    return dict(wihf=wihf, wihb=wihb, b=b, whh=whh, h0=h0, c0=c0,
                w2t=w2t, b2t=b2t, trans_pn=trans_pn, stop_row=stop_row)


# ---------------------------------------------------------------------------
# Full forward: sentence -> (viterbi score, tag sequence)   (one kernel launch)
# ---------------------------------------------------------------------------
def bilstm_crf_forward(sentence, emb_table, kp, *, hd):
    S = int(sentence.shape[0])
    E = int(emb_table.shape[1])
    G4 = int(kp["whh"].shape[1])
    HP = G4 // 4

    kern = functools.partial(bilstm_crf_kernel, hd=hd)
    in_specs = ([pl.BlockSpec(memory_space=pltpu.MemorySpace.SMEM),   # ids
                 pl.BlockSpec(memory_space=pl.ANY)]                   # table (HBM)
                + [pl.BlockSpec(memory_space=pltpu.MemorySpace.VMEM)] * 10)
    out_specs = (pl.BlockSpec(memory_space=pltpu.MemorySpace.VMEM),
                 pl.BlockSpec(memory_space=pltpu.MemorySpace.VMEM))
    scratch = [
        pltpu.VMEM((S, E), jnp.float32),          # gathered embeddings (fwd order)
        pltpu.VMEM((S, E), jnp.float32),          # gathered embeddings (reversed)
        pltpu.SemaphoreType.DMA((2, S)),          # one sem per row DMA
        pltpu.VMEM((S, G4), jnp.float32),         # pre-projected gate inputs
        pltpu.VMEM((S, HP), jnp.float32),         # per-step hidden (fwd order)
        pltpu.VMEM((S, HP), jnp.float32),         # per-step hidden (rev order)
        pltpu.VMEM((S, TPAD), jnp.float32),       # emission feats
        pltpu.VMEM((S, TPAD), jnp.int32),         # Viterbi backpointers
    ]
    score, path = pl.pallas_call(
        kern,
        out_shape=(jax.ShapeDtypeStruct((1, 1), jnp.float32),
                   jax.ShapeDtypeStruct((1, TPAD), jnp.int32)),
        in_specs=in_specs,
        out_specs=out_specs,
        scratch_shapes=scratch,
    )(sentence.astype(jnp.int32), emb_table,
      kp["wihf"], kp["wihb"], kp["b"], kp["whh"], kp["h0"], kp["c0"],
      kp["w2t"], kp["b2t"], kp["trans_pn"], kp["stop_row"])
    return score[0, 0], path[0, :S]


if __name__ == "__main__":
    vocab_size, E, H, S = 20, 32, 32, 8
    Hd = H // 2
    T = TAGSET

    key = jax.random.PRNGKey(0)
    ks = jax.random.split(key, 16)

    def u(k, shape, fan):
        bnd = 1.0 / (fan ** 0.5)
        return jax.random.uniform(k, shape, jnp.float32, -bnd, bnd)

    emb_table = jax.random.normal(ks[0], (vocab_size, E), jnp.float32)

    transitions = jax.random.normal(ks[11], (T, T), jnp.float32)
    transitions = transitions.at[START_IDX, :].set(-10000.0)
    transitions = transitions.at[:, STOP_IDX].set(-10000.0)

    raw = dict(
        wih_f=u(ks[1], (4 * Hd, E), Hd), whh_f=u(ks[2], (4 * Hd, Hd), Hd),
        bih_f=u(ks[3], (4 * Hd,), Hd), bhh_f=u(ks[4], (4 * Hd,), Hd),
        wih_b=u(ks[5], (4 * Hd, E), Hd), whh_b=u(ks[6], (4 * Hd, Hd), Hd),
        bih_b=u(ks[7], (4 * Hd,), Hd), bhh_b=u(ks[8], (4 * Hd,), Hd),
        w2t=u(ks[9], (T, H), H), b2t=u(ks[10], (T,), H),
        transitions=transitions,
        h0=jax.random.normal(ks[12], (2, Hd), jnp.float32),   # init_hidden()
        c0=jax.random.normal(ks[13], (2, Hd), jnp.float32),
    )
    kp = prepare_params(raw)

    sentence = jax.random.randint(ks[14], (S,), 0, vocab_size, dtype=jnp.int32)

    fwd = jax.jit(functools.partial(bilstm_crf_forward, hd=Hd))
    score, tag_seq = fwd(sentence, emb_table, kp)
    score = jax.block_until_ready(score)
    tag_seq = jax.block_until_ready(tag_seq)

    assert bool(jnp.isfinite(score))
    assert tag_seq.shape == (S,)
    assert bool(jnp.all((tag_seq >= 0) & (tag_seq < T)))
    print("KERNEL_OK")
</pallas_src>

<mosaic_0001>
module attributes {stable_mosaic.version = 11 : i64} {
  func.func @bilstm_crf_kernel(%arg0: memref<8xi32, #tpu.memory_space<smem>>, %arg1: memref<20x32xf32, #tpu.memory_space<any>>, %arg2: memref<32x512xf32, #tpu.memory_space<vmem>>, %arg3: memref<32x512xf32, #tpu.memory_space<vmem>>, %arg4: memref<1x512xf32, #tpu.memory_space<vmem>>, %arg5: memref<32x512xf32, #tpu.memory_space<vmem>>, %arg6: memref<1x128xf32, #tpu.memory_space<vmem>>, %arg7: memref<1x128xf32, #tpu.memory_space<vmem>>, %arg8: memref<32x128xf32, #tpu.memory_space<vmem>>, %arg9: memref<1x128xf32, #tpu.memory_space<vmem>>, %arg10: memref<16x128xf32, #tpu.memory_space<vmem>>, %arg11: memref<1x128xf32, #tpu.memory_space<vmem>>, %arg12: memref<1x1xf32, #tpu.memory_space<vmem>>, %arg13: memref<1x128xi32, #tpu.memory_space<vmem>>, %arg14: memref<8x32xf32, #tpu.memory_space<vmem>>, %arg15: memref<8x32xf32, #tpu.memory_space<vmem>>, %arg16: memref<2x8x!tpu.dma_semaphore, #tpu.memory_space<semaphore_mem>>, %arg17: memref<8x512xf32, #tpu.memory_space<vmem>>, %arg18: memref<8x128xf32, #tpu.memory_space<vmem>>, %arg19: memref<8x128xf32, #tpu.memory_space<vmem>>, %arg20: memref<8x128xf32, #tpu.memory_space<vmem>>, %arg21: memref<8x128xi32, #tpu.memory_space<vmem>>) attributes {dimension_semantics = [], scalar_prefetch = 0 : i64, scratch_operands = 8 : i64, tpu.core_type = #tpu.core_type<tc>} {
    %c0 = arith.constant 0 : index
    %0 = memref.load %arg0[%c0] : memref<8xi32, #tpu.memory_space<smem>>
    %c0_i32 = arith.constant 0 : i32
    %c0_i32_0 = arith.constant 0 : i32
    %c0_i32_1 = arith.constant 0 : i32
    %1 = tpu.memref_slice %arg1[%0, %c0_i32_1] : memref<20x32xf32, #tpu.memory_space<any>> -> memref<1x32xf32, #tpu.memory_space<any>>
    %c0_i32_2 = arith.constant 0 : i32
    %c0_i32_3 = arith.constant 0 : i32
    %2 = tpu.memref_slice %arg14[%c0_i32_2, %c0_i32_3] : memref<8x32xf32, #tpu.memory_space<vmem>> -> memref<1x32xf32, #tpu.memory_space<vmem>>
    %3 = tpu.memref_slice %arg16[%c0_i32, %c0_i32_0] : memref<2x8x!tpu.dma_semaphore, #tpu.memory_space<semaphore_mem>> -> memref<1x1x!tpu.dma_semaphore, #tpu.memory_space<semaphore_mem>>
    %4 = tpu.memref_squeeze %3 : memref<1x1x!tpu.dma_semaphore, #tpu.memory_space<semaphore_mem>> -> memref<!tpu.dma_semaphore, #tpu.memory_space<semaphore_mem>>
    tpu.enqueue_dma source(%1 : memref<1x32xf32, #tpu.memory_space<any>>) target(%2 : memref<1x32xf32, #tpu.memory_space<vmem>>) target_semaphore(%4 : memref<!tpu.dma_semaphore, #tpu.memory_space<semaphore_mem>>)
    %c1_i32 = arith.constant 1 : i32
    %c0_i32_4 = arith.constant 0 : i32
    %c0_i32_5 = arith.constant 0 : i32
    %5 = tpu.memref_slice %arg1[%0, %c0_i32_5] : memref<20x32xf32, #tpu.memory_space<any>> -> memref<1x32xf32, #tpu.memory_space<any>>
    %c7_i32 = arith.constant 7 : i32
    %c0_i32_6 = arith.constant 0 : i32
    %6 = tpu.memref_slice %arg15[%c7_i32, %c0_i32_6] : memref<8x32xf32, #tpu.memory_space<vmem>> -> memref<1x32xf32, #tpu.memory_space<vmem>>
    %7 = tpu.memref_slice %arg16[%c1_i32, %c0_i32_4] : memref<2x8x!tpu.dma_semaphore, #tpu.memory_space<semaphore_mem>> -> memref<1x1x!tpu.dma_semaphore, #tpu.memory_space<semaphore_mem>>
    %8 = tpu.memref_squeeze %7 : memref<1x1x!tpu.dma_semaphore, #tpu.memory_space<semaphore_mem>> -> memref<!tpu.dma_semaphore, #tpu.memory_space<semaphore_mem>>
    tpu.enqueue_dma source(%5 : memref<1x32xf32, #tpu.memory_space<any>>) target(%6 : memref<1x32xf32, #tpu.memory_space<vmem>>) target_semaphore(%8 : memref<!tpu.dma_semaphore, #tpu.memory_space<semaphore_mem>>)
    %c1 = arith.constant 1 : index
    %9 = memref.load %arg0[%c1] : memref<8xi32, #tpu.memory_space<smem>>
    %c0_i32_7 = arith.constant 0 : i32
    %c1_i32_8 = arith.constant 1 : i32
    %c0_i32_9 = arith.constant 0 : i32
    %10 = tpu.memref_slice %arg1[%9, %c0_i32_9] : memref<20x32xf32, #tpu.memory_space<any>> -> memref<1x32xf32, #tpu.memory_space<any>>
    %c1_i32_10 = arith.constant 1 : i32
    %c0_i32_11 = arith.constant 0 : i32
    %11 = tpu.memref_slice %arg14[%c1_i32_10, %c0_i32_11] : memref<8x32xf32, #tpu.memory_space<vmem>> -> memref<1x32xf32, #tpu.memory_space<vmem>>
    %12 = tpu.memref_slice %arg16[%c0_i32_7, %c1_i32_8] : memref<2x8x!tpu.dma_semaphore, #tpu.memory_space<semaphore_mem>> -> memref<1x1x!tpu.dma_semaphore, #tpu.memory_space<semaphore_mem>>
    %13 = tpu.memref_squeeze %12 : memref<1x1x!tpu.dma_semaphore, #tpu.memory_space<semaphore_mem>> -> memref<!tpu.dma_semaphore, #tpu.memory_space<semaphore_mem>>
    tpu.enqueue_dma source(%10 : memref<1x32xf32, #tpu.memory_space<any>>) target(%11 : memref<1x32xf32, #tpu.memory_space<vmem>>) target_semaphore(%13 : memref<!tpu.dma_semaphore, #tpu.memory_space<semaphore_mem>>)
    %c1_i32_12 = arith.constant 1 : i32
    %c1_i32_13 = arith.constant 1 : i32
    %c0_i32_14 = arith.constant 0 : i32
    %14 = tpu.memref_slice %arg1[%9, %c0_i32_14] : memref<20x32xf32, #tpu.memory_space<any>> -> memref<1x32xf32, #tpu.memory_space<any>>
    %c6_i32 = arith.constant 6 : i32
    %c0_i32_15 = arith.constant 0 : i32
    %15 = tpu.memref_slice %arg15[%c6_i32, %c0_i32_15] : memref<8x32xf32, #tpu.memory_space<vmem>> -> memref<1x32xf32, #tpu.memory_space<vmem>>
    %16 = tpu.memref_slice %arg16[%c1_i32_12, %c1_i32_13] : memref<2x8x!tpu.dma_semaphore, #tpu.memory_space<semaphore_mem>> -> memref<1x1x!tpu.dma_semaphore, #tpu.memory_space<semaphore_mem>>
    %17 = tpu.memref_squeeze %16 : memref<1x1x!tpu.dma_semaphore, #tpu.memory_space<semaphore_mem>> -> memref<!tpu.dma_semaphore, #tpu.memory_space<semaphore_mem>>
    tpu.enqueue_dma source(%14 : memref<1x32xf32, #tpu.memory_space<any>>) target(%15 : memref<1x32xf32, #tpu.memory_space<vmem>>) target_semaphore(%17 : memref<!tpu.dma_semaphore, #tpu.memory_space<semaphore_mem>>)
    %c2 = arith.constant 2 : index
    %18 = memref.load %arg0[%c2] : memref<8xi32, #tpu.memory_space<smem>>
    %c0_i32_16 = arith.constant 0 : i32
    %c2_i32 = arith.constant 2 : i32
    %c0_i32_17 = arith.constant 0 : i32
    %19 = tpu.memref_slice %arg1[%18, %c0_i32_17] : memref<20x32xf32, #tpu.memory_space<any>> -> memref<1x32xf32, #tpu.memory_space<any>>
    %c2_i32_18 = arith.constant 2 : i32
    %c0_i32_19 = arith.constant 0 : i32
    %20 = tpu.memref_slice %arg14[%c2_i32_18, %c0_i32_19] : memref<8x32xf32, #tpu.memory_space<vmem>> -> memref<1x32xf32, #tpu.memory_space<vmem>>
    %21 = tpu.memref_slice %arg16[%c0_i32_16, %c2_i32] : memref<2x8x!tpu.dma_semaphore, #tpu.memory_space<semaphore_mem>> -> memref<1x1x!tpu.dma_semaphore, #tpu.memory_space<semaphore_mem>>
    %22 = tpu.memref_squeeze %21 : memref<1x1x!tpu.dma_semaphore, #tpu.memory_space<semaphore_mem>> -> memref<!tpu.dma_semaphore, #tpu.memory_space<semaphore_mem>>
    tpu.enqueue_dma source(%19 : memref<1x32xf32, #tpu.memory_space<any>>) target(%20 : memref<1x32xf32, #tpu.memory_space<vmem>>) target_semaphore(%22 : memref<!tpu.dma_semaphore, #tpu.memory_space<semaphore_mem>>)
    %c1_i32_20 = arith.constant 1 : i32
    %c2_i32_21 = arith.constant 2 : i32
    %c0_i32_22 = arith.constant 0 : i32
    %23 = tpu.memref_slice %arg1[%18, %c0_i32_22] : memref<20x32xf32, #tpu.memory_space<any>> -> memref<1x32xf32, #tpu.memory_space<any>>
    %c5_i32 = arith.constant 5 : i32
    %c0_i32_23 = arith.constant 0 : i32
    %24 = tpu.memref_slice %arg15[%c5_i32, %c0_i32_23] : memref<8x32xf32, #tpu.memory_space<vmem>> -> memref<1x32xf32, #tpu.memory_space<vmem>>
    %25 = tpu.memref_slice %arg16[%c1_i32_20, %c2_i32_21] : memref<2x8x!tpu.dma_semaphore, #tpu.memory_space<semaphore_mem>> -> memref<1x1x!tpu.dma_semaphore, #tpu.memory_space<semaphore_mem>>
    %26 = tpu.memref_squeeze %25 : memref<1x1x!tpu.dma_semaphore, #tpu.memory_space<semaphore_mem>> -> memref<!tpu.dma_semaphore, #tpu.memory_space<semaphore_mem>>
    tpu.enqueue_dma source(%23 : memref<1x32xf32, #tpu.memory_space<any>>) target(%24 : memref<1x32xf32, #tpu.memory_space<vmem>>) target_semaphore(%26 : memref<!tpu.dma_semaphore, #tpu.memory_space<semaphore_mem>>)
    %c3 = arith.constant 3 : index
    %27 = memref.load %arg0[%c3] : memref<8xi32, #tpu.memory_space<smem>>
    %c0_i32_24 = arith.constant 0 : i32
    %c3_i32 = arith.constant 3 : i32
    %c0_i32_25 = arith.constant 0 : i32
    %28 = tpu.memref_slice %arg1[%27, %c0_i32_25] : memref<20x32xf32, #tpu.memory_space<any>> -> memref<1x32xf32, #tpu.memory_space<any>>
    %c3_i32_26 = arith.constant 3 : i32
    %c0_i32_27 = arith.constant 0 : i32
    %29 = tpu.memref_slice %arg14[%c3_i32_26, %c0_i32_27] : memref<8x32xf32, #tpu.memory_space<vmem>> -> memref<1x32xf32, #tpu.memory_space<vmem>>
    %30 = tpu.memref_slice %arg16[%c0_i32_24, %c3_i32] : memref<2x8x!tpu.dma_semaphore, #tpu.memory_space<semaphore_mem>> -> memref<1x1x!tpu.dma_semaphore, #tpu.memory_space<semaphore_mem>>
    %31 = tpu.memref_squeeze %30 : memref<1x1x!tpu.dma_semaphore, #tpu.memory_space<semaphore_mem>> -> memref<!tpu.dma_semaphore, #tpu.memory_space<semaphore_mem>>
    tpu.enqueue_dma source(%28 : memref<1x32xf32, #tpu.memory_space<any>>) target(%29 : memref<1x32xf32, #tpu.memory_space<vmem>>) target_semaphore(%31 : memref<!tpu.dma_semaphore, #tpu.memory_space<semaphore_mem>>)
    %c1_i32_28 = arith.constant 1 : i32
    %c3_i32_29 = arith.constant 3 : i32
    %c0_i32_30 = arith.constant 0 : i32
    %32 = tpu.memref_slice %arg1[%27, %c0_i32_30] : memref<20x32xf32, #tpu.memory_space<any>> -> memref<1x32xf32, #tpu.memory_space<any>>
    %c4_i32 = arith.constant 4 : i32
    %c0_i32_31 = arith.constant 0 : i32
    %33 = tpu.memref_slice %arg15[%c4_i32, %c0_i32_31] : memref<8x32xf32, #tpu.memory_space<vmem>> -> memref<1x32xf32, #tpu.memory_space<vmem>>
    %34 = tpu.memref_slice %arg16[%c1_i32_28, %c3_i32_29] : memref<2x8x!tpu.dma_semaphore, #tpu.memory_space<semaphore_mem>> -> memref<1x1x!tpu.dma_semaphore, #tpu.memory_space<semaphore_mem>>
    %35 = tpu.memref_squeeze %34 : memref<1x1x!tpu.dma_semaphore, #tpu.memory_space<semaphore_mem>> -> memref<!tpu.dma_semaphore, #tpu.memory_space<semaphore_mem>>
    tpu.enqueue_dma source(%32 : memref<1x32xf32, #tpu.memory_space<any>>) target(%33 : memref<1x32xf32, #tpu.memory_space<vmem>>) target_semaphore(%35 : memref<!tpu.dma_semaphore, #tpu.memory_space<semaphore_mem>>)
    %c4 = arith.constant 4 : index
    %36 = memref.load %arg0[%c4] : memref<8xi32, #tpu.memory_space<smem>>
    %c0_i32_32 = arith.constant 0 : i32
    %c4_i32_33 = arith.constant 4 : i32
    %c0_i32_34 = arith.constant 0 : i32
    %37 = tpu.memref_slice %arg1[%36, %c0_i32_34] : memref<20x32xf32, #tpu.memory_space<any>> -> memref<1x32xf32, #tpu.memory_space<any>>
    %c4_i32_35 = arith.constant 4 : i32
    %c0_i32_36 = arith.constant 0 : i32
    %38 = tpu.memref_slice %arg14[%c4_i32_35, %c0_i32_36] : memref<8x32xf32, #tpu.memory_space<vmem>> -> memref<1x32xf32, #tpu.memory_space<vmem>>
    %39 = tpu.memref_slice %arg16[%c0_i32_32, %c4_i32_33] : memref<2x8x!tpu.dma_semaphore, #tpu.memory_space<semaphore_mem>> -> memref<1x1x!tpu.dma_semaphore, #tpu.memory_space<semaphore_mem>>
    %40 = tpu.memref_squeeze %39 : memref<1x1x!tpu.dma_semaphore, #tpu.memory_space<semaphore_mem>> -> memref<!tpu.dma_semaphore, #tpu.memory_space<semaphore_mem>>
    tpu.enqueue_dma source(%37 : memref<1x32xf32, #tpu.memory_space<any>>) target(%38 : memref<1x32xf32, #tpu.memory_space<vmem>>) target_semaphore(%40 : memref<!tpu.dma_semaphore, #tpu.memory_space<semaphore_mem>>)
    %c1_i32_37 = arith.constant 1 : i32
    %c4_i32_38 = arith.constant 4 : i32
    %c0_i32_39 = arith.constant 0 : i32
    %41 = tpu.memref_slice %arg1[%36, %c0_i32_39] : memref<20x32xf32, #tpu.memory_space<any>> -> memref<1x32xf32, #tpu.memory_space<any>>
    %c3_i32_40 = arith.constant 3 : i32
    %c0_i32_41 = arith.constant 0 : i32
    %42 = tpu.memref_slice %arg15[%c3_i32_40, %c0_i32_41] : memref<8x32xf32, #tpu.memory_space<vmem>> -> memref<1x32xf32, #tpu.memory_space<vmem>>
    %43 = tpu.memref_slice %arg16[%c1_i32_37, %c4_i32_38] : memref<2x8x!tpu.dma_semaphore, #tpu.memory_space<semaphore_mem>> -> memref<1x1x!tpu.dma_semaphore, #tpu.memory_space<semaphore_mem>>
    %44 = tpu.memref_squeeze %43 : memref<1x1x!tpu.dma_semaphore, #tpu.memory_space<semaphore_mem>> -> memref<!tpu.dma_semaphore, #tpu.memory_space<semaphore_mem>>
    tpu.enqueue_dma source(%41 : memref<1x32xf32, #tpu.memory_space<any>>) target(%42 : memref<1x32xf32, #tpu.memory_space<vmem>>) target_semaphore(%44 : memref<!tpu.dma_semaphore, #tpu.memory_space<semaphore_mem>>)
    %c5 = arith.constant 5 : index
    %45 = memref.load %arg0[%c5] : memref<8xi32, #tpu.memory_space<smem>>
    %c0_i32_42 = arith.constant 0 : i32
    %c5_i32_43 = arith.constant 5 : i32
    %c0_i32_44 = arith.constant 0 : i32
    %46 = tpu.memref_slice %arg1[%45, %c0_i32_44] : memref<20x32xf32, #tpu.memory_space<any>> -> memref<1x32xf32, #tpu.memory_space<any>>
    %c5_i32_45 = arith.constant 5 : i32
    %c0_i32_46 = arith.constant 0 : i32
    %47 = tpu.memref_slice %arg14[%c5_i32_45, %c0_i32_46] : memref<8x32xf32, #tpu.memory_space<vmem>> -> memref<1x32xf32, #tpu.memory_space<vmem>>
    %48 = tpu.memref_slice %arg16[%c0_i32_42, %c5_i32_43] : memref<2x8x!tpu.dma_semaphore, #tpu.memory_space<semaphore_mem>> -> memref<1x1x!tpu.dma_semaphore, #tpu.memory_space<semaphore_mem>>
    %49 = tpu.memref_squeeze %48 : memref<1x1x!tpu.dma_semaphore, #tpu.memory_space<semaphore_mem>> -> memref<!tpu.dma_semaphore, #tpu.memory_space<semaphore_mem>>
    tpu.enqueue_dma source(%46 : memref<1x32xf32, #tpu.memory_space<any>>) target(%47 : memref<1x32xf32, #tpu.memory_space<vmem>>) target_semaphore(%49 : memref<!tpu.dma_semaphore, #tpu.memory_space<semaphore_mem>>)
    %c1_i32_47 = arith.constant 1 : i32
    %c5_i32_48 = arith.constant 5 : i32
    %c0_i32_49 = arith.constant 0 : i32
    %50 = tpu.memref_slice %arg1[%45, %c0_i32_49] : memref<20x32xf32, #tpu.memory_space<any>> -> memref<1x32xf32, #tpu.memory_space<any>>
    %c2_i32_50 = arith.constant 2 : i32
    %c0_i32_51 = arith.constant 0 : i32
    %51 = tpu.memref_slice %arg15[%c2_i32_50, %c0_i32_51] : memref<8x32xf32, #tpu.memory_space<vmem>> -> memref<1x32xf32, #tpu.memory_space<vmem>>
    %52 = tpu.memref_slice %arg16[%c1_i32_47, %c5_i32_48] : memref<2x8x!tpu.dma_semaphore, #tpu.memory_space<semaphore_mem>> -> memref<1x1x!tpu.dma_semaphore, #tpu.memory_space<semaphore_mem>>
    %53 = tpu.memref_squeeze %52 : memref<1x1x!tpu.dma_semaphore, #tpu.memory_space<semaphore_mem>> -> memref<!tpu.dma_semaphore, #tpu.memory_space<semaphore_mem>>
    tpu.enqueue_dma source(%50 : memref<1x32xf32, #tpu.memory_space<any>>) target(%51 : memref<1x32xf32, #tpu.memory_space<vmem>>) target_semaphore(%53 : memref<!tpu.dma_semaphore, #tpu.memory_space<semaphore_mem>>)
    %c6 = arith.constant 6 : index
    %54 = memref.load %arg0[%c6] : memref<8xi32, #tpu.memory_space<smem>>
    %c0_i32_52 = arith.constant 0 : i32
    %c6_i32_53 = arith.constant 6 : i32
    %c0_i32_54 = arith.constant 0 : i32
    %55 = tpu.memref_slice %arg1[%54, %c0_i32_54] : memref<20x32xf32, #tpu.memory_space<any>> -> memref<1x32xf32, #tpu.memory_space<any>>
    %c6_i32_55 = arith.constant 6 : i32
    %c0_i32_56 = arith.constant 0 : i32
    %56 = tpu.memref_slice %arg14[%c6_i32_55, %c0_i32_56] : memref<8x32xf32, #tpu.memory_space<vmem>> -> memref<1x32xf32, #tpu.memory_space<vmem>>
    %57 = tpu.memref_slice %arg16[%c0_i32_52, %c6_i32_53] : memref<2x8x!tpu.dma_semaphore, #tpu.memory_space<semaphore_mem>> -> memref<1x1x!tpu.dma_semaphore, #tpu.memory_space<semaphore_mem>>
    %58 = tpu.memref_squeeze %57 : memref<1x1x!tpu.dma_semaphore, #tpu.memory_space<semaphore_mem>> -> memref<!tpu.dma_semaphore, #tpu.memory_space<semaphore_mem>>
    tpu.enqueue_dma source(%55 : memref<1x32xf32, #tpu.memory_space<any>>) target(%56 : memref<1x32xf32, #tpu.memory_space<vmem>>) target_semaphore(%58 : memref<!tpu.dma_semaphore, #tpu.memory_space<semaphore_mem>>)
    %c1_i32_57 = arith.constant 1 : i32
    %c6_i32_58 = arith.constant 6 : i32
    %c0_i32_59 = arith.constant 0 : i32
    %59 = tpu.memref_slice %arg1[%54, %c0_i32_59] : memref<20x32xf32, #tpu.memory_space<any>> -> memref<1x32xf32, #tpu.memory_space<any>>
    %c1_i32_60 = arith.constant 1 : i32
    %c0_i32_61 = arith.constant 0 : i32
    %60 = tpu.memref_slice %arg15[%c1_i32_60, %c0_i32_61] : memref<8x32xf32, #tpu.memory_space<vmem>> -> memref<1x32xf32, #tpu.memory_space<vmem>>
    %61 = tpu.memref_slice %arg16[%c1_i32_57, %c6_i32_58] : memref<2x8x!tpu.dma_semaphore, #tpu.memory_space<semaphore_mem>> -> memref<1x1x!tpu.dma_semaphore, #tpu.memory_space<semaphore_mem>>
    %62 = tpu.memref_squeeze %61 : memref<1x1x!tpu.dma_semaphore, #tpu.memory_space<semaphore_mem>> -> memref<!tpu.dma_semaphore, #tpu.memory_space<semaphore_mem>>
    tpu.enqueue_dma source(%59 : memref<1x32xf32, #tpu.memory_space<any>>) target(%60 : memref<1x32xf32, #tpu.memory_space<vmem>>) target_semaphore(%62 : memref<!tpu.dma_semaphore, #tpu.memory_space<semaphore_mem>>)
    %c7 = arith.constant 7 : index
    %63 = memref.load %arg0[%c7] : memref<8xi32, #tpu.memory_space<smem>>
    %c0_i32_62 = arith.constant 0 : i32
    %c7_i32_63 = arith.constant 7 : i32
    %c0_i32_64 = arith.constant 0 : i32
    %64 = tpu.memref_slice %arg1[%63, %c0_i32_64] : memref<20x32xf32, #tpu.memory_space<any>> -> memref<1x32xf32, #tpu.memory_space<any>>
    %c7_i32_65 = arith.constant 7 : i32
    %c0_i32_66 = arith.constant 0 : i32
    %65 = tpu.memref_slice %arg14[%c7_i32_65, %c0_i32_66] : memref<8x32xf32, #tpu.memory_space<vmem>> -> memref<1x32xf32, #tpu.memory_space<vmem>>
    %66 = tpu.memref_slice %arg16[%c0_i32_62, %c7_i32_63] : memref<2x8x!tpu.dma_semaphore, #tpu.memory_space<semaphore_mem>> -> memref<1x1x!tpu.dma_semaphore, #tpu.memory_space<semaphore_mem>>
    %67 = tpu.memref_squeeze %66 : memref<1x1x!tpu.dma_semaphore, #tpu.memory_space<semaphore_mem>> -> memref<!tpu.dma_semaphore, #tpu.memory_space<semaphore_mem>>
    tpu.enqueue_dma source(%64 : memref<1x32xf32, #tpu.memory_space<any>>) target(%65 : memref<1x32xf32, #tpu.memory_space<vmem>>) target_semaphore(%67 : memref<!tpu.dma_semaphore, #tpu.memory_space<semaphore_mem>>)
    %c1_i32_67 = arith.constant 1 : i32
    %c7_i32_68 = arith.constant 7 : i32
    %c0_i32_69 = arith.constant 0 : i32
    %68 = tpu.memref_slice %arg1[%63, %c0_i32_69] : memref<20x32xf32, #tpu.memory_space<any>> -> memref<1x32xf32, #tpu.memory_space<any>>
    %c0_i32_70 = arith.constant 0 : i32
    %c0_i32_71 = arith.constant 0 : i32
    %69 = tpu.memref_slice %arg15[%c0_i32_70, %c0_i32_71] : memref<8x32xf32, #tpu.memory_space<vmem>> -> memref<1x32xf32, #tpu.memory_space<vmem>>
    %70 = tpu.memref_slice %arg16[%c1_i32_67, %c7_i32_68] : memref<2x8x!tpu.dma_semaphore, #tpu.memory_space<semaphore_mem>> -> memref<1x1x!tpu.dma_semaphore, #tpu.memory_space<semaphore_mem>>
    %71 = tpu.memref_squeeze %70 : memref<1x1x!tpu.dma_semaphore, #tpu.memory_space<semaphore_mem>> -> memref<!tpu.dma_semaphore, #tpu.memory_space<semaphore_mem>>
    tpu.enqueue_dma source(%68 : memref<1x32xf32, #tpu.memory_space<any>>) target(%69 : memref<1x32xf32, #tpu.memory_space<vmem>>) target_semaphore(%71 : memref<!tpu.dma_semaphore, #tpu.memory_space<semaphore_mem>>)
    %c0_i32_72 = arith.constant 0 : i32
    %c0_i32_73 = arith.constant 0 : i32
    %c0_i32_74 = arith.constant 0 : i32
    %72 = tpu.memref_slice %arg1[%0, %c0_i32_74] : memref<20x32xf32, #tpu.memory_space<any>> -> memref<1x32xf32, #tpu.memory_space<any>>
    %c0_i32_75 = arith.constant 0 : i32
    %c0_i32_76 = arith.constant 0 : i32
    %73 = tpu.memref_slice %arg14[%c0_i32_75, %c0_i32_76] : memref<8x32xf32, #tpu.memory_space<vmem>> -> memref<1x32xf32, #tpu.memory_space<vmem>>
    %74 = tpu.memref_slice %arg16[%c0_i32_72, %c0_i32_73] : memref<2x8x!tpu.dma_semaphore, #tpu.memory_space<semaphore_mem>> -> memref<1x1x!tpu.dma_semaphore, #tpu.memory_space<semaphore_mem>>
    %75 = tpu.memref_squeeze %74 : memref<1x1x!tpu.dma_semaphore, #tpu.memory_space<semaphore_mem>> -> memref<!tpu.dma_semaphore, #tpu.memory_space<semaphore_mem>>
    tpu.wait_dma2 semaphore(%75 : memref<!tpu.dma_semaphore, #tpu.memory_space<semaphore_mem>>) src(%72 : memref<1x32xf32, #tpu.memory_space<any>>) dst(%73 : memref<1x32xf32, #tpu.memory_space<vmem>>)
    %c1_i32_77 = arith.constant 1 : i32
    %c0_i32_78 = arith.constant 0 : i32
    %c0_i32_79 = arith.constant 0 : i32
    %76 = tpu.memref_slice %arg1[%0, %c0_i32_79] : memref<20x32xf32, #tpu.memory_space<any>> -> memref<1x32xf32, #tpu.memory_space<any>>
    %c7_i32_80 = arith.constant 7 : i32
    %c0_i32_81 = arith.constant 0 : i32
    %77 = tpu.memref_slice %arg15[%c7_i32_80, %c0_i32_81] : memref<8x32xf32, #tpu.memory_space<vmem>> -> memref<1x32xf32, #tpu.memory_space<vmem>>
    %78 = tpu.memref_slice %arg16[%c1_i32_77, %c0_i32_78] : memref<2x8x!tpu.dma_semaphore, #tpu.memory_space<semaphore_mem>> -> memref<1x1x!tpu.dma_semaphore, #tpu.memory_space<semaphore_mem>>
    %79 = tpu.memref_squeeze %78 : memref<1x1x!tpu.dma_semaphore, #tpu.memory_space<semaphore_mem>> -> memref<!tpu.dma_semaphore, #tpu.memory_space<semaphore_mem>>
    tpu.wait_dma2 semaphore(%79 : memref<!tpu.dma_semaphore, #tpu.memory_space<semaphore_mem>>) src(%76 : memref<1x32xf32, #tpu.memory_space<any>>) dst(%77 : memref<1x32xf32, #tpu.memory_space<vmem>>)
    %c0_i32_82 = arith.constant 0 : i32
    %c1_i32_83 = arith.constant 1 : i32
    %c0_i32_84 = arith.constant 0 : i32
    %80 = tpu.memref_slice %arg1[%9, %c0_i32_84] : memref<20x32xf32, #tpu.memory_space<any>> -> memref<1x32xf32, #tpu.memory_space<any>>
    %c1_i32_85 = arith.constant 1 : i32
    %c0_i32_86 = arith.constant 0 : i32
    %81 = tpu.memref_slice %arg14[%c1_i32_85, %c0_i32_86] : memref<8x32xf32, #tpu.memory_space<vmem>> -> memref<1x32xf32, #tpu.memory_space<vmem>>
    %82 = tpu.memref_slice %arg16[%c0_i32_82, %c1_i32_83] : memref<2x8x!tpu.dma_semaphore, #tpu.memory_space<semaphore_mem>> -> memref<1x1x!tpu.dma_semaphore, #tpu.memory_space<semaphore_mem>>
    %83 = tpu.memref_squeeze %82 : memref<1x1x!tpu.dma_semaphore, #tpu.memory_space<semaphore_mem>> -> memref<!tpu.dma_semaphore, #tpu.memory_space<semaphore_mem>>
    tpu.wait_dma2 semaphore(%83 : memref<!tpu.dma_semaphore, #tpu.memory_space<semaphore_mem>>) src(%80 : memref<1x32xf32, #tpu.memory_space<any>>) dst(%81 : memref<1x32xf32, #tpu.memory_space<vmem>>)
    %c1_i32_87 = arith.constant 1 : i32
    %c1_i32_88 = arith.constant 1 : i32
    %c0_i32_89 = arith.constant 0 : i32
    %84 = tpu.memref_slice %arg1[%9, %c0_i32_89] : memref<20x32xf32, #tpu.memory_space<any>> -> memref<1x32xf32, #tpu.memory_space<any>>
    %c6_i32_90 = arith.constant 6 : i32
    %c0_i32_91 = arith.constant 0 : i32
    %85 = tpu.memref_slice %arg15[%c6_i32_90, %c0_i32_91] : memref<8x32xf32, #tpu.memory_space<vmem>> -> memref<1x32xf32, #tpu.memory_space<vmem>>
    %86 = tpu.memref_slice %arg16[%c1_i32_87, %c1_i32_88] : memref<2x8x!tpu.dma_semaphore, #tpu.memory_space<semaphore_mem>> -> memref<1x1x!tpu.dma_semaphore, #tpu.memory_space<semaphore_mem>>
    %87 = tpu.memref_squeeze %86 : memref<1x1x!tpu.dma_semaphore, #tpu.memory_space<semaphore_mem>> -> memref<!tpu.dma_semaphore, #tpu.memory_space<semaphore_mem>>
    tpu.wait_dma2 semaphore(%87 : memref<!tpu.dma_semaphore, #tpu.memory_space<semaphore_mem>>) src(%84 : memref<1x32xf32, #tpu.memory_space<any>>) dst(%85 : memref<1x32xf32, #tpu.memory_space<vmem>>)
    %c0_i32_92 = arith.constant 0 : i32
    %c2_i32_93 = arith.constant 2 : i32
    %c0_i32_94 = arith.constant 0 : i32
    %88 = tpu.memref_slice %arg1[%18, %c0_i32_94] : memref<20x32xf32, #tpu.memory_space<any>> -> memref<1x32xf32, #tpu.memory_space<any>>
    %c2_i32_95 = arith.constant 2 : i32
    %c0_i32_96 = arith.constant 0 : i32
    %89 = tpu.memref_slice %arg14[%c2_i32_95, %c0_i32_96] : memref<8x32xf32, #tpu.memory_space<vmem>> -> memref<1x32xf32, #tpu.memory_space<vmem>>
    %90 = tpu.memref_slice %arg16[%c0_i32_92, %c2_i32_93] : memref<2x8x!tpu.dma_semaphore, #tpu.memory_space<semaphore_mem>> -> memref<1x1x!tpu.dma_semaphore, #tpu.memory_space<semaphore_mem>>
    %91 = tpu.memref_squeeze %90 : memref<1x1x!tpu.dma_semaphore, #tpu.memory_space<semaphore_mem>> -> memref<!tpu.dma_semaphore, #tpu.memory_space<semaphore_mem>>
    tpu.wait_dma2 semaphore(%91 : memref<!tpu.dma_semaphore, #tpu.memory_space<semaphore_mem>>) src(%88 : memref<1x32xf32, #tpu.memory_space<any>>) dst(%89 : memref<1x32xf32, #tpu.memory_space<vmem>>)
    %c1_i32_97 = arith.constant 1 : i32
    %c2_i32_98 = arith.constant 2 : i32
    %c0_i32_99 = arith.constant 0 : i32
    %92 = tpu.memref_slice %arg1[%18, %c0_i32_99] : memref<20x32xf32, #tpu.memory_space<any>> -> memref<1x32xf32, #tpu.memory_space<any>>
    %c5_i32_100 = arith.constant 5 : i32
    %c0_i32_101 = arith.constant 0 : i32
    %93 = tpu.memref_slice %arg15[%c5_i32_100, %c0_i32_101] : memref<8x32xf32, #tpu.memory_space<vmem>> -> memref<1x32xf32, #tpu.memory_space<vmem>>
    %94 = tpu.memref_slice %arg16[%c1_i32_97, %c2_i32_98] : memref<2x8x!tpu.dma_semaphore, #tpu.memory_space<semaphore_mem>> -> memref<1x1x!tpu.dma_semaphore, #tpu.memory_space<semaphore_mem>>
    %95 = tpu.memref_squeeze %94 : memref<1x1x!tpu.dma_semaphore, #tpu.memory_space<semaphore_mem>> -> memref<!tpu.dma_semaphore, #tpu.memory_space<semaphore_mem>>
    tpu.wait_dma2 semaphore(%95 : memref<!tpu.dma_semaphore, #tpu.memory_space<semaphore_mem>>) src(%92 : memref<1x32xf32, #tpu.memory_space<any>>) dst(%93 : memref<1x32xf32, #tpu.memory_space<vmem>>)
    %c0_i32_102 = arith.constant 0 : i32
    %c3_i32_103 = arith.constant 3 : i32
    %c0_i32_104 = arith.constant 0 : i32
    %96 = tpu.memref_slice %arg1[%27, %c0_i32_104] : memref<20x32xf32, #tpu.memory_space<any>> -> memref<1x32xf32, #tpu.memory_space<any>>
    %c3_i32_105 = arith.constant 3 : i32
    %c0_i32_106 = arith.constant 0 : i32
    %97 = tpu.memref_slice %arg14[%c3_i32_105, %c0_i32_106] : memref<8x32xf32, #tpu.memory_space<vmem>> -> memref<1x32xf32, #tpu.memory_space<vmem>>
    %98 = tpu.memref_slice %arg16[%c0_i32_102, %c3_i32_103] : memref<2x8x!tpu.dma_semaphore, #tpu.memory_space<semaphore_mem>> -> memref<1x1x!tpu.dma_semaphore, #tpu.memory_space<semaphore_mem>>
    %99 = tpu.memref_squeeze %98 : memref<1x1x!tpu.dma_semaphore, #tpu.memory_space<semaphore_mem>> -> memref<!tpu.dma_semaphore, #tpu.memory_space<semaphore_mem>>
    tpu.wait_dma2 semaphore(%99 : memref<!tpu.dma_semaphore, #tpu.memory_space<semaphore_mem>>) src(%96 : memref<1x32xf32, #tpu.memory_space<any>>) dst(%97 : memref<1x32xf32, #tpu.memory_space<vmem>>)
    %c1_i32_107 = arith.constant 1 : i32
    %c3_i32_108 = arith.constant 3 : i32
    %c0_i32_109 = arith.constant 0 : i32
    %100 = tpu.memref_slice %arg1[%27, %c0_i32_109] : memref<20x32xf32, #tpu.memory_space<any>> -> memref<1x32xf32, #tpu.memory_space<any>>
    %c4_i32_110 = arith.constant 4 : i32
    %c0_i32_111 = arith.constant 0 : i32
    %101 = tpu.memref_slice %arg15[%c4_i32_110, %c0_i32_111] : memref<8x32xf32, #tpu.memory_space<vmem>> -> memref<1x32xf32, #tpu.memory_space<vmem>>
    %102 = tpu.memref_slice %arg16[%c1_i32_107, %c3_i32_108] : memref<2x8x!tpu.dma_semaphore, #tpu.memory_space<semaphore_mem>> -> memref<1x1x!tpu.dma_semaphore, #tpu.memory_space<semaphore_mem>>
    %103 = tpu.memref_squeeze %102 : memref<1x1x!tpu.dma_semaphore, #tpu.memory_space<semaphore_mem>> -> memref<!tpu.dma_semaphore, #tpu.memory_space<semaphore_mem>>
    tpu.wait_dma2 semaphore(%103 : memref<!tpu.dma_semaphore, #tpu.memory_space<semaphore_mem>>) src(%100 : memref<1x32xf32, #tpu.memory_space<any>>) dst(%101 : memref<1x32xf32, #tpu.memory_space<vmem>>)
    %c0_i32_112 = arith.constant 0 : i32
    %c4_i32_113 = arith.constant 4 : i32
    %c0_i32_114 = arith.constant 0 : i32
    %104 = tpu.memref_slice %arg1[%36, %c0_i32_114] : memref<20x32xf32, #tpu.memory_space<any>> -> memref<1x32xf32, #tpu.memory_space<any>>
    %c4_i32_115 = arith.constant 4 : i32
    %c0_i32_116 = arith.constant 0 : i32
    %105 = tpu.memref_slice %arg14[%c4_i32_115, %c0_i32_116] : memref<8x32xf32, #tpu.memory_space<vmem>> -> memref<1x32xf32, #tpu.memory_space<vmem>>
    %106 = tpu.memref_slice %arg16[%c0_i32_112, %c4_i32_113] : memref<2x8x!tpu.dma_semaphore, #tpu.memory_space<semaphore_mem>> -> memref<1x1x!tpu.dma_semaphore, #tpu.memory_space<semaphore_mem>>
    %107 = tpu.memref_squeeze %106 : memref<1x1x!tpu.dma_semaphore, #tpu.memory_space<semaphore_mem>> -> memref<!tpu.dma_semaphore, #tpu.memory_space<semaphore_mem>>
    tpu.wait_dma2 semaphore(%107 : memref<!tpu.dma_semaphore, #tpu.memory_space<semaphore_mem>>) src(%104 : memref<1x32xf32, #tpu.memory_space<any>>) dst(%105 : memref<1x32xf32, #tpu.memory_space<vmem>>)
    %c1_i32_117 = arith.constant 1 : i32
    %c4_i32_118 = arith.constant 4 : i32
    %c0_i32_119 = arith.constant 0 : i32
    %108 = tpu.memref_slice %arg1[%36, %c0_i32_119] : memref<20x32xf32, #tpu.memory_space<any>> -> memref<1x32xf32, #tpu.memory_space<any>>
    %c3_i32_120 = arith.constant 3 : i32
    %c0_i32_121 = arith.constant 0 : i32
    %109 = tpu.memref_slice %arg15[%c3_i32_120, %c0_i32_121] : memref<8x32xf32, #tpu.memory_space<vmem>> -> memref<1x32xf32, #tpu.memory_space<vmem>>
    %110 = tpu.memref_slice %arg16[%c1_i32_117, %c4_i32_118] : memref<2x8x!tpu.dma_semaphore, #tpu.memory_space<semaphore_mem>> -> memref<1x1x!tpu.dma_semaphore, #tpu.memory_space<semaphore_mem>>
    %111 = tpu.memref_squeeze %110 : memref<1x1x!tpu.dma_semaphore, #tpu.memory_space<semaphore_mem>> -> memref<!tpu.dma_semaphore, #tpu.memory_space<semaphore_mem>>
    tpu.wait_dma2 semaphore(%111 : memref<!tpu.dma_semaphore, #tpu.memory_space<semaphore_mem>>) src(%108 : memref<1x32xf32, #tpu.memory_space<any>>) dst(%109 : memref<1x32xf32, #tpu.memory_space<vmem>>)
    %c0_i32_122 = arith.constant 0 : i32
    %c5_i32_123 = arith.constant 5 : i32
    %c0_i32_124 = arith.constant 0 : i32
    %112 = tpu.memref_slice %arg1[%45, %c0_i32_124] : memref<20x32xf32, #tpu.memory_space<any>> -> memref<1x32xf32, #tpu.memory_space<any>>
    %c5_i32_125 = arith.constant 5 : i32
    %c0_i32_126 = arith.constant 0 : i32
    %113 = tpu.memref_slice %arg14[%c5_i32_125, %c0_i32_126] : memref<8x32xf32, #tpu.memory_space<vmem>> -> memref<1x32xf32, #tpu.memory_space<vmem>>
    %114 = tpu.memref_slice %arg16[%c0_i32_122, %c5_i32_123] : memref<2x8x!tpu.dma_semaphore, #tpu.memory_space<semaphore_mem>> -> memref<1x1x!tpu.dma_semaphore, #tpu.memory_space<semaphore_mem>>
    %115 = tpu.memref_squeeze %114 : memref<1x1x!tpu.dma_semaphore, #tpu.memory_space<semaphore_mem>> -> memref<!tpu.dma_semaphore, #tpu.memory_space<semaphore_mem>>
    tpu.wait_dma2 semaphore(%115 : memref<!tpu.dma_semaphore, #tpu.memory_space<semaphore_mem>>) src(%112 : memref<1x32xf32, #tpu.memory_space<any>>) dst(%113 : memref<1x32xf32, #tpu.memory_space<vmem>>)
    %c1_i32_127 = arith.constant 1 : i32
    %c5_i32_128 = arith.constant 5 : i32
    %c0_i32_129 = arith.constant 0 : i32
    %116 = tpu.memref_slice %arg1[%45, %c0_i32_129] : memref<20x32xf32, #tpu.memory_space<any>> -> memref<1x32xf32, #tpu.memory_space<any>>
    %c2_i32_130 = arith.constant 2 : i32
    %c0_i32_131 = arith.constant 0 : i32
    %117 = tpu.memref_slice %arg15[%c2_i32_130, %c0_i32_131] : memref<8x32xf32, #tpu.memory_space<vmem>> -> memref<1x32xf32, #tpu.memory_space<vmem>>
    %118 = tpu.memref_slice %arg16[%c1_i32_127, %c5_i32_128] : memref<2x8x!tpu.dma_semaphore, #tpu.memory_space<semaphore_mem>> -> memref<1x1x!tpu.dma_semaphore, #tpu.memory_space<semaphore_mem>>
    %119 = tpu.memref_squeeze %118 : memref<1x1x!tpu.dma_semaphore, #tpu.memory_space<semaphore_mem>> -> memref<!tpu.dma_semaphore, #tpu.memory_space<semaphore_mem>>
    tpu.wait_dma2 semaphore(%119 : memref<!tpu.dma_semaphore, #tpu.memory_space<semaphore_mem>>) src(%116 : memref<1x32xf32, #tpu.memory_space<any>>) dst(%117 : memref<1x32xf32, #tpu.memory_space<vmem>>)
    %c0_i32_132 = arith.constant 0 : i32
    %c6_i32_133 = arith.constant 6 : i32
    %c0_i32_134 = arith.constant 0 : i32
    %120 = tpu.memref_slice %arg1[%54, %c0_i32_134] : memref<20x32xf32, #tpu.memory_space<any>> -> memref<1x32xf32, #tpu.memory_space<any>>
    %c6_i32_135 = arith.constant 6 : i32
    %c0_i32_136 = arith.constant 0 : i32
    %121 = tpu.memref_slice %arg14[%c6_i32_135, %c0_i32_136] : memref<8x32xf32, #tpu.memory_space<vmem>> -> memref<1x32xf32, #tpu.memory_space<vmem>>
    %122 = tpu.memref_slice %arg16[%c0_i32_132, %c6_i32_133] : memref<2x8x!tpu.dma_semaphore, #tpu.memory_space<semaphore_mem>> -> memref<1x1x!tpu.dma_semaphore, #tpu.memory_space<semaphore_mem>>
    %123 = tpu.memref_squeeze %122 : memref<1x1x!tpu.dma_semaphore, #tpu.memory_space<semaphore_mem>> -> memref<!tpu.dma_semaphore, #tpu.memory_space<semaphore_mem>>
    tpu.wait_dma2 semaphore(%123 : memref<!tpu.dma_semaphore, #tpu.memory_space<semaphore_mem>>) src(%120 : memref<1x32xf32, #tpu.memory_space<any>>) dst(%121 : memref<1x32xf32, #tpu.memory_space<vmem>>)
    %c1_i32_137 = arith.constant 1 : i32
    %c6_i32_138 = arith.constant 6 : i32
    %c0_i32_139 = arith.constant 0 : i32
    %124 = tpu.memref_slice %arg1[%54, %c0_i32_139] : memref<20x32xf32, #tpu.memory_space<any>> -> memref<1x32xf32, #tpu.memory_space<any>>
    %c1_i32_140 = arith.constant 1 : i32
    %c0_i32_141 = arith.constant 0 : i32
    %125 = tpu.memref_slice %arg15[%c1_i32_140, %c0_i32_141] : memref<8x32xf32, #tpu.memory_space<vmem>> -> memref<1x32xf32, #tpu.memory_space<vmem>>
    %126 = tpu.memref_slice %arg16[%c1_i32_137, %c6_i32_138] : memref<2x8x!tpu.dma_semaphore, #tpu.memory_space<semaphore_mem>> -> memref<1x1x!tpu.dma_semaphore, #tpu.memory_space<semaphore_mem>>
    %127 = tpu.memref_squeeze %126 : memref<1x1x!tpu.dma_semaphore, #tpu.memory_space<semaphore_mem>> -> memref<!tpu.dma_semaphore, #tpu.memory_space<semaphore_mem>>
    tpu.wait_dma2 semaphore(%127 : memref<!tpu.dma_semaphore, #tpu.memory_space<semaphore_mem>>) src(%124 : memref<1x32xf32, #tpu.memory_space<any>>) dst(%125 : memref<1x32xf32, #tpu.memory_space<vmem>>)
    %c0_i32_142 = arith.constant 0 : i32
    %c7_i32_143 = arith.constant 7 : i32
    %c0_i32_144 = arith.constant 0 : i32
    %128 = tpu.memref_slice %arg1[%63, %c0_i32_144] : memref<20x32xf32, #tpu.memory_space<any>> -> memref<1x32xf32, #tpu.memory_space<any>>
    %c7_i32_145 = arith.constant 7 : i32
    %c0_i32_146 = arith.constant 0 : i32
    %129 = tpu.memref_slice %arg14[%c7_i32_145, %c0_i32_146] : memref<8x32xf32, #tpu.memory_space<vmem>> -> memref<1x32xf32, #tpu.memory_space<vmem>>
    %130 = tpu.memref_slice %arg16[%c0_i32_142, %c7_i32_143] : memref<2x8x!tpu.dma_semaphore, #tpu.memory_space<semaphore_mem>> -> memref<1x1x!tpu.dma_semaphore, #tpu.memory_space<semaphore_mem>>
    %131 = tpu.memref_squeeze %130 : memref<1x1x!tpu.dma_semaphore, #tpu.memory_space<semaphore_mem>> -> memref<!tpu.dma_semaphore, #tpu.memory_space<semaphore_mem>>
    tpu.wait_dma2 semaphore(%131 : memref<!tpu.dma_semaphore, #tpu.memory_space<semaphore_mem>>) src(%128 : memref<1x32xf32, #tpu.memory_space<any>>) dst(%129 : memref<1x32xf32, #tpu.memory_space<vmem>>)
    %c1_i32_147 = arith.constant 1 : i32
    %c7_i32_148 = arith.constant 7 : i32
    %c0_i32_149 = arith.constant 0 : i32
    %132 = tpu.memref_slice %arg1[%63, %c0_i32_149] : memref<20x32xf32, #tpu.memory_space<any>> -> memref<1x32xf32, #tpu.memory_space<any>>
    %c0_i32_150 = arith.constant 0 : i32
    %c0_i32_151 = arith.constant 0 : i32
    %133 = tpu.memref_slice %arg15[%c0_i32_150, %c0_i32_151] : memref<8x32xf32, #tpu.memory_space<vmem>> -> memref<1x32xf32, #tpu.memory_space<vmem>>
    %134 = tpu.memref_slice %arg16[%c1_i32_147, %c7_i32_148] : memref<2x8x!tpu.dma_semaphore, #tpu.memory_space<semaphore_mem>> -> memref<1x1x!tpu.dma_semaphore, #tpu.memory_space<semaphore_mem>>
    %135 = tpu.memref_squeeze %134 : memref<1x1x!tpu.dma_semaphore, #tpu.memory_space<semaphore_mem>> -> memref<!tpu.dma_semaphore, #tpu.memory_space<semaphore_mem>>
    tpu.wait_dma2 semaphore(%135 : memref<!tpu.dma_semaphore, #tpu.memory_space<semaphore_mem>>) src(%132 : memref<1x32xf32, #tpu.memory_space<any>>) dst(%133 : memref<1x32xf32, #tpu.memory_space<vmem>>)
    %c0_152 = arith.constant 0 : index
    %c0_153 = arith.constant 0 : index
    %136 = vector.load %arg14[%c0_152, %c0_153] : memref<8x32xf32, #tpu.memory_space<vmem>>, vector<8x32xf32>
    %c0_154 = arith.constant 0 : index
    %c0_155 = arith.constant 0 : index
    %137 = vector.load %arg2[%c0_154, %c0_155] : memref<32x512xf32, #tpu.memory_space<vmem>>, vector<32x512xf32>
    %cst = arith.constant dense<0.000000e+00> : vector<8x512xf32>
    %138 = tpu.matmul %136, %137, %cst {dimension_numbers = #tpu.dot_dimension_numbers<[1], [0], [0], [1], [0, 0, 1, 1], [], []>} : vector<8x32xf32>, vector<32x512xf32>, vector<8x512xf32> -> vector<8x512xf32>
    %c0_156 = arith.constant 0 : index
    %c0_157 = arith.constant 0 : index
    %139 = vector.load %arg15[%c0_156, %c0_157] : memref<8x32xf32, #tpu.memory_space<vmem>>, vector<8x32xf32>
    %c0_158 = arith.constant 0 : index
    %c0_159 = arith.constant 0 : index
    %140 = vector.load %arg3[%c0_158, %c0_159] : memref<32x512xf32, #tpu.memory_space<vmem>>, vector<32x512xf32>
    %cst_160 = arith.constant dense<0.000000e+00> : vector<8x512xf32>
    %141 = tpu.matmul %139, %140, %cst_160 {dimension_numbers = #tpu.dot_dimension_numbers<[1], [0], [0], [1], [0, 0, 1, 1], [], []>} : vector<8x32xf32>, vector<32x512xf32>, vector<8x512xf32> -> vector<8x512xf32>
    %142 = arith.addf %138, %141 : vector<8x512xf32>
    %c0_161 = arith.constant 0 : index
    %c0_162 = arith.constant 0 : index
    %143 = vector.load %arg4[%c0_161, %c0_162] : memref<1x512xf32, #tpu.memory_space<vmem>>, vector<1x512xf32>
    %144 = vector.broadcast %143 : vector<1x512xf32> to vector<8x512xf32>
    %145 = arith.addf %142, %144 : vector<8x512xf32>
    %c0_163 = arith.constant 0 : index
    %c0_164 = arith.constant 0 : index
    %146 = vector.load %arg17[%c0_163, %c0_164] : memref<8x512xf32, #tpu.memory_space<vmem>>, vector<8x512xf32>
    tpu.vector_store %arg17[%c0_163, %c0_164], %145 {strides = array<i32>} : memref<8x512xf32, #tpu.memory_space<vmem>>, vector<8x512xf32>,
    %c0_165 = arith.constant 0 : index
    %c0_166 = arith.constant 0 : index
    %147 = vector.load %arg5[%c0_165, %c0_166] : memref<32x512xf32, #tpu.memory_space<vmem>>, vector<32x512xf32>
    %c0_167 = arith.constant 0 : index
    %c0_168 = arith.constant 0 : index
    %148 = vector.load %arg6[%c0_167, %c0_168] : memref<1x128xf32, #tpu.memory_space<vmem>>, vector<1x128xf32>
    %c0_169 = arith.constant 0 : index
    %c0_170 = arith.constant 0 : index
    %149 = vector.load %arg7[%c0_169, %c0_170] : memref<1x128xf32, #tpu.memory_space<vmem>>, vector<1x128xf32>
    %c0_i32_171 = arith.constant 0 : i32
    %150 = arith.index_cast %c0_i32_171 : i32 to index
    %c0_172 = arith.constant 0 : index
    %151 = vector.load %arg17[%150, %c0_172] : memref<8x512xf32, #tpu.memory_space<vmem>>, vector<1x512xf32>
    %152 = vector.extract_strided_slice %148 {offsets = [0, 0], sizes = [1, 32], strides = [1, 1]} : vector<1x128xf32> to vector<1x32xf32>
    %cst_173 = arith.constant dense<0.000000e+00> : vector<1x512xf32>
    %153 = tpu.matmul %152, %147, %cst_173 {dimension_numbers = #tpu.dot_dimension_numbers<[1], [0], [0], [1], [0, 0, 1, 1], [], []>} : vector<1x32xf32>, vector<32x512xf32>, vector<1x512xf32> -> vector<1x512xf32>
    %154 = arith.addf %151, %153 : vector<1x512xf32>
    %155 = vector.extract_strided_slice %154 {offsets = [0, 0], sizes = [1, 128], strides = [1, 1]} : vector<1x512xf32> to vector<1x128xf32>
    %156 = arith.negf %155 : vector<1x128xf32>
    %157 = math.exp %156 : vector<1x128xf32>
    %cst_174 = arith.constant 1.000000e+00 : f32
    %158 = vector.broadcast %cst_174 : f32 to vector<1x128xf32>
    %159 = arith.addf %158, %157 : vector<1x128xf32>
    %160 = arith.divf %158, %159 : vector<1x128xf32>
    %161 = vector.extract_strided_slice %154 {offsets = [0, 128], sizes = [1, 128], strides = [1, 1]} : vector<1x512xf32> to vector<1x128xf32>
    %162 = arith.negf %161 : vector<1x128xf32>
    %163 = math.exp %162 : vector<1x128xf32>
    %cst_175 = arith.constant 1.000000e+00 : f32
    %164 = vector.broadcast %cst_175 : f32 to vector<1x128xf32>
    %165 = arith.addf %164, %163 : vector<1x128xf32>
    %166 = arith.divf %164, %165 : vector<1x128xf32>
    %167 = vector.extract_strided_slice %154 {offsets = [0, 256], sizes = [1, 128], strides = [1, 1]} : vector<1x512xf32> to vector<1x128xf32>
    %168 = math.tanh %167 : vector<1x128xf32>
    %169 = vector.extract_strided_slice %154 {offsets = [0, 384], sizes = [1, 128], strides = [1, 1]} : vector<1x512xf32> to vector<1x128xf32>
    %170 = arith.negf %169 : vector<1x128xf32>
    %171 = math.exp %170 : vector<1x128xf32>
    %cst_176 = arith.constant 1.000000e+00 : f32
    %172 = vector.broadcast %cst_176 : f32 to vector<1x128xf32>
    %173 = arith.addf %172, %171 : vector<1x128xf32>
    %174 = arith.divf %172, %173 : vector<1x128xf32>
    %175 = arith.mulf %166, %149 : vector<1x128xf32>
    %176 = arith.mulf %160, %168 : vector<1x128xf32>
    %177 = arith.addf %175, %176 : vector<1x128xf32>
    %178 = math.tanh %177 : vector<1x128xf32>
    %179 = arith.mulf %174, %178 : vector<1x128xf32>
    %180 = arith.index_cast %c0_i32_171 : i32 to index
    %c0_177 = arith.constant 0 : index
    %181 = vector.load %arg18[%180, %c0_177] : memref<8x128xf32, #tpu.memory_space<vmem>>, vector<1x128xf32>
    tpu.vector_store %arg18[%180, %c0_177], %179 {strides = array<i32>} : memref<8x128xf32, #tpu.memory_space<vmem>>, vector<1x128xf32>,
    %c7_i32_178 = arith.constant 7 : i32
    %182 = arith.subi %c7_i32_178, %c0_i32_171 : i32
    %183 = arith.index_cast %182 : i32 to index
    %c0_179 = arith.constant 0 : index
    %184 = vector.load %arg19[%183, %c0_179] : memref<8x128xf32, #tpu.memory_space<vmem>>, vector<1x128xf32>
    tpu.vector_store %arg19[%183, %c0_179], %179 {strides = array<i32>} : memref<8x128xf32, #tpu.memory_space<vmem>>, vector<1x128xf32>,
    %c1_i32_180 = arith.constant 1 : i32
    %185 = arith.index_cast %c1_i32_180 : i32 to index
    %c0_181 = arith.constant 0 : index
    %186 = vector.load %arg17[%185, %c0_181] : memref<8x512xf32, #tpu.memory_space<vmem>>, vector<1x512xf32>
    %187 = vector.extract_strided_slice %179 {offsets = [0, 0], sizes = [1, 32], strides = [1, 1]} : vector<1x128xf32> to vector<1x32xf32>
    %cst_182 = arith.constant dense<0.000000e+00> : vector<1x512xf32>
    %188 = tpu.matmul %187, %147, %cst_182 {dimension_numbers = #tpu.dot_dimension_numbers<[1], [0], [0], [1], [0, 0, 1, 1], [], []>} : vector<1x32xf32>, vector<32x512xf32>, vector<1x512xf32> -> vector<1x512xf32>
    %189 = arith.addf %186, %188 : vector<1x512xf32>
    %190 = vector.extract_strided_slice %189 {offsets = [0, 0], sizes = [1, 128], strides = [1, 1]} : vector<1x512xf32> to vector<1x128xf32>
    %191 = arith.negf %190 : vector<1x128xf32>
    %192 = math.exp %191 : vector<1x128xf32>
    %cst_183 = arith.constant 1.000000e+00 : f32
    %193 = vector.broadcast %cst_183 : f32 to vector<1x128xf32>
    %194 = arith.addf %193, %192 : vector<1x128xf32>
    %195 = arith.divf %193, %194 : vector<1x128xf32>
    %196 = vector.extract_strided_slice %189 {offsets = [0, 128], sizes = [1, 128], strides = [1, 1]} : vector<1x512xf32> to vector<1x128xf32>
    %197 = arith.negf %196 : vector<1x128xf32>
    %198 = math.exp %197 : vector<1x128xf32>
    %cst_184 = arith.constant 1.000000e+00 : f32
    %199 = vector.broadcast %cst_184 : f32 to vector<1x128xf32>
    %200 = arith.addf %199, %198 : vector<1x128xf32>
    %201 = arith.divf %199, %200 : vector<1x128xf32>
    %202 = vector.extract_strided_slice %189 {offsets = [0, 256], sizes = [1, 128], strides = [1, 1]} : vector<1x512xf32> to vector<1x128xf32>
    %203 = math.tanh %202 : vector<1x128xf32>
    %204 = vector.extract_strided_slice %189 {offsets = [0, 384], sizes = [1, 128], strides = [1, 1]} : vector<1x512xf32> to vector<1x128xf32>
    %205 = arith.negf %204 : vector<1x128xf32>
    %206 = math.exp %205 : vector<1x128xf32>
    %cst_185 = arith.constant 1.000000e+00 : f32
    %207 = vector.broadcast %cst_185 : f32 to vector<1x128xf32>
    %208 = arith.addf %207, %206 : vector<1x128xf32>
    %209 = arith.divf %207, %208 : vector<1x128xf32>
    %210 = arith.mulf %201, %177 : vector<1x128xf32>
    %211 = arith.mulf %195, %203 : vector<1x128xf32>
    %212 = arith.addf %210, %211 : vector<1x128xf32>
    %213 = math.tanh %212 : vector<1x128xf32>
    %214 = arith.mulf %209, %213 : vector<1x128xf32>
    %215 = arith.index_cast %c1_i32_180 : i32 to index
    %c0_186 = arith.constant 0 : index
    %216 = vector.load %arg18[%215, %c0_186] : memref<8x128xf32, #tpu.memory_space<vmem>>, vector<1x128xf32>
    tpu.vector_store %arg18[%215, %c0_186], %214 {strides = array<i32>} : memref<8x128xf32, #tpu.memory_space<vmem>>, vector<1x128xf32>,
    %c7_i32_187 = arith.constant 7 : i32
    %217 = arith.subi %c7_i32_187, %c1_i32_180 : i32
    %218 = arith.index_cast %217 : i32 to index
    %c0_188 = arith.constant 0 : index
    %219 = vector.load %arg19[%218, %c0_188] : memref<8x128xf32, #tpu.memory_space<vmem>>, vector<1x128xf32>
    tpu.vector_store %arg19[%218, %c0_188], %214 {strides = array<i32>} : memref<8x128xf32, #tpu.memory_space<vmem>>, vector<1x128xf32>,
    %c2_i32_189 = arith.constant 2 : i32
    %220 = arith.index_cast %c2_i32_189 : i32 to index
    %c0_190 = arith.constant 0 : index
    %221 = vector.load %arg17[%220, %c0_190] : memref<8x512xf32, #tpu.memory_space<vmem>>, vector<1x512xf32>
    %222 = vector.extract_strided_slice %214 {offsets = [0, 0], sizes = [1, 32], strides = [1, 1]} : vector<1x128xf32> to vector<1x32xf32>
    %cst_191 = arith.constant dense<0.000000e+00> : vector<1x512xf32>
    %223 = tpu.matmul %222, %147, %cst_191 {dimension_numbers = #tpu.dot_dimension_numbers<[1], [0], [0], [1], [0, 0, 1, 1], [], []>} : vector<1x32xf32>, vector<32x512xf32>, vector<1x512xf32> -> vector<1x512xf32>
    %224 = arith.addf %221, %223 : vector<1x512xf32>
    %225 = vector.extract_strided_slice %224 {offsets = [0, 0], sizes = [1, 128], strides = [1, 1]} : vector<1x512xf32> to vector<1x128xf32>
    %226 = arith.negf %225 : vector<1x128xf32>
    %227 = math.exp %226 : vector<1x128xf32>
    %cst_192 = arith.constant 1.000000e+00 : f32
    %228 = vector.broadcast %cst_192 : f32 to vector<1x128xf32>
    %229 = arith.addf %228, %227 : vector<1x128xf32>
    %230 = arith.divf %228, %229 : vector<1x128xf32>
    %231 = vector.extract_strided_slice %224 {offsets = [0, 128], sizes = [1, 128], strides = [1, 1]} : vector<1x512xf32> to vector<1x128xf32>
    %232 = arith.negf %231 : vector<1x128xf32>
    %233 = math.exp %232 : vector<1x128xf32>
    %cst_193 = arith.constant 1.000000e+00 : f32
    %234 = vector.broadcast %cst_193 : f32 to vector<1x128xf32>
    %235 = arith.addf %234, %233 : vector<1x128xf32>
    %236 = arith.divf %234, %235 : vector<1x128xf32>
    %237 = vector.extract_strided_slice %224 {offsets = [0, 256], sizes = [1, 128], strides = [1, 1]} : vector<1x512xf32> to vector<1x128xf32>
    %238 = math.tanh %237 : vector<1x128xf32>
    %239 = vector.extract_strided_slice %224 {offsets = [0, 384], sizes = [1, 128], strides = [1, 1]} : vector<1x512xf32> to vector<1x128xf32>
    %240 = arith.negf %239 : vector<1x128xf32>
    %241 = math.exp %240 : vector<1x128xf32>
    %cst_194 = arith.constant 1.000000e+00 : f32
    %242 = vector.broadcast %cst_194 : f32 to vector<1x128xf32>
    %243 = arith.addf %242, %241 : vector<1x128xf32>
    %244 = arith.divf %242, %243 : vector<1x128xf32>
    %245 = arith.mulf %236, %212 : vector<1x128xf32>
    %246 = arith.mulf %230, %238 : vector<1x128xf32>
    %247 = arith.addf %245, %246 : vector<1x128xf32>
    %248 = math.tanh %247 : vector<1x128xf32>
    %249 = arith.mulf %244, %248 : vector<1x128xf32>
    %250 = arith.index_cast %c2_i32_189 : i32 to index
    %c0_195 = arith.constant 0 : index
    %251 = vector.load %arg18[%250, %c0_195] : memref<8x128xf32, #tpu.memory_space<vmem>>, vector<1x128xf32>
    tpu.vector_store %arg18[%250, %c0_195], %249 {strides = array<i32>} : memref<8x128xf32, #tpu.memory_space<vmem>>, vector<1x128xf32>,
    %c7_i32_196 = arith.constant 7 : i32
    %252 = arith.subi %c7_i32_196, %c2_i32_189 : i32
    %253 = arith.index_cast %252 : i32 to index
    %c0_197 = arith.constant 0 : index
    %254 = vector.load %arg19[%253, %c0_197] : memref<8x128xf32, #tpu.memory_space<vmem>>, vector<1x128xf32>
    tpu.vector_store %arg19[%253, %c0_197], %249 {strides = array<i32>} : memref<8x128xf32, #tpu.memory_space<vmem>>, vector<1x128xf32>,
    %c3_i32_198 = arith.constant 3 : i32
    %255 = arith.index_cast %c3_i32_198 : i32 to index
    %c0_199 = arith.constant 0 : index
    %256 = vector.load %arg17[%255, %c0_199] : memref<8x512xf32, #tpu.memory_space<vmem>>, vector<1x512xf32>
    %257 = vector.extract_strided_slice %249 {offsets = [0, 0], sizes = [1, 32], strides = [1, 1]} : vector<1x128xf32> to vector<1x32xf32>
    %cst_200 = arith.constant dense<0.000000e+00> : vector<1x512xf32>
    %258 = tpu.matmul %257, %147, %cst_200 {dimension_numbers = #tpu.dot_dimension_numbers<[1], [0], [0], [1], [0, 0, 1, 1], [], []>} : vector<1x32xf32>, vector<32x512xf32>, vector<1x512xf32> -> vector<1x512xf32>
    %259 = arith.addf %256, %258 : vector<1x512xf32>
    %260 = vector.extract_strided_slice %259 {offsets = [0, 0], sizes = [1, 128], strides = [1, 1]} : vector<1x512xf32> to vector<1x128xf32>
    %261 = arith.negf %260 : vector<1x128xf32>
    %262 = math.exp %261 : vector<1x128xf32>
    %cst_201 = arith.constant 1.000000e+00 : f32
    %263 = vector.broadcast %cst_201 : f32 to vector<1x128xf32>
    %264 = arith.addf %263, %262 : vector<1x128xf32>
    %265 = arith.divf %263, %264 : vector<1x128xf32>
    %266 = vector.extract_strided_slice %259 {offsets = [0, 128], sizes = [1, 128], strides = [1, 1]} : vector<1x512xf32> to vector<1x128xf32>
    %267 = arith.negf %266 : vector<1x128xf32>
    %268 = math.exp %267 : vector<1x128xf32>
    %cst_202 = arith.constant 1.000000e+00 : f32
    %269 = vector.broadcast %cst_202 : f32 to vector<1x128xf32>
    %270 = arith.addf %269, %268 : vector<1x128xf32>
    %271 = arith.divf %269, %270 : vector<1x128xf32>
    %272 = vector.extract_strided_slice %259 {offsets = [0, 256], sizes = [1, 128], strides = [1, 1]} : vector<1x512xf32> to vector<1x128xf32>
    %273 = math.tanh %272 : vector<1x128xf32>
    %274 = vector.extract_strided_slice %259 {offsets = [0, 384], sizes = [1, 128], strides = [1, 1]} : vector<1x512xf32> to vector<1x128xf32>
    %275 = arith.negf %274 : vector<1x128xf32>
    %276 = math.exp %275 : vector<1x128xf32>
    %cst_203 = arith.constant 1.000000e+00 : f32
    %277 = vector.broadcast %cst_203 : f32 to vector<1x128xf32>
    %278 = arith.addf %277, %276 : vector<1x128xf32>
    %279 = arith.divf %277, %278 : vector<1x128xf32>
    %280 = arith.mulf %271, %247 : vector<1x128xf32>
    %281 = arith.mulf %265, %273 : vector<1x128xf32>
    %282 = arith.addf %280, %281 : vector<1x128xf32>
    %283 = math.tanh %282 : vector<1x128xf32>
    %284 = arith.mulf %279, %283 : vector<1x128xf32>
    %285 = arith.index_cast %c3_i32_198 : i32 to index
    %c0_204 = arith.constant 0 : index
    %286 = vector.load %arg18[%285, %c0_204] : memref<8x128xf32, #tpu.memory_space<vmem>>, vector<1x128xf32>
    tpu.vector_store %arg18[%285, %c0_204], %284 {strides = array<i32>} : memref<8x128xf32, #tpu.memory_space<vmem>>, vector<1x128xf32>,
    %c7_i32_205 = arith.constant 7 : i32
    %287 = arith.subi %c7_i32_205, %c3_i32_198 : i32
    %288 = arith.index_cast %287 : i32 to index
    %c0_206 = arith.constant 0 : index
    %289 = vector.load %arg19[%288, %c0_206] : memref<8x128xf32, #tpu.memory_space<vmem>>, vector<1x128xf32>
    tpu.vector_store %arg19[%288, %c0_206], %284 {strides = array<i32>} : memref<8x128xf32, #tpu.memory_space<vmem>>, vector<1x128xf32>,
    %c4_i32_207 = arith.constant 4 : i32
    %290 = arith.index_cast %c4_i32_207 : i32 to index
    %c0_208 = arith.constant 0 : index
    %291 = vector.load %arg17[%290, %c0_208] : memref<8x512xf32, #tpu.memory_space<vmem>>, vector<1x512xf32>
    %292 = vector.extract_strided_slice %284 {offsets = [0, 0], sizes = [1, 32], strides = [1, 1]} : vector<1x128xf32> to vector<1x32xf32>
    %cst_209 = arith.constant dense<0.000000e+00> : vector<1x512xf32>
    %293 = tpu.matmul %292, %147, %cst_209 {dimension_numbers = #tpu.dot_dimension_numbers<[1], [0], [0], [1], [0, 0, 1, 1], [], []>} : vector<1x32xf32>, vector<32x512xf32>, vector<1x512xf32> -> vector<1x512xf32>
    %294 = arith.addf %291, %293 : vector<1x512xf32>
    %295 = vector.extract_strided_slice %294 {offsets = [0, 0], sizes = [1, 128], strides = [1, 1]} : vector<1x512xf32> to vector<1x128xf32>
    %296 = arith.negf %295 : vector<1x128xf32>
    %297 = math.exp %296 : vector<1x128xf32>
    %cst_210 = arith.constant 1.000000e+00 : f32
    %298 = vector.broadcast %cst_210 : f32 to vector<1x128xf32>
    %299 = arith.addf %298, %297 : vector<1x128xf32>
    %300 = arith.divf %298, %299 : vector<1x128xf32>
    %301 = vector.extract_strided_slice %294 {offsets = [0, 128], sizes = [1, 128], strides = [1, 1]} : vector<1x512xf32> to vector<1x128xf32>
    %302 = arith.negf %301 : vector<1x128xf32>
    %303 = math.exp %302 : vector<1x128xf32>
    %cst_211 = arith.constant 1.000000e+00 : f32
    %304 = vector.broadcast %cst_211 : f32 to vector<1x128xf32>
    %305 = arith.addf %304, %303 : vector<1x128xf32>
    %306 = arith.divf %304, %305 : vector<1x128xf32>
    %307 = vector.extract_strided_slice %294 {offsets = [0, 256], sizes = [1, 128], strides = [1, 1]} : vector<1x512xf32> to vector<1x128xf32>
    %308 = math.tanh %307 : vector<1x128xf32>
    %309 = vector.extract_strided_slice %294 {offsets = [0, 384], sizes = [1, 128], strides = [1, 1]} : vector<1x512xf32> to vector<1x128xf32>
    %310 = arith.negf %309 : vector<1x128xf32>
    %311 = math.exp %310 : vector<1x128xf32>
    %cst_212 = arith.constant 1.000000e+00 : f32
    %312 = vector.broadcast %cst_212 : f32 to vector<1x128xf32>
    %313 = arith.addf %312, %311 : vector<1x128xf32>
    %314 = arith.divf %312, %313 : vector<1x128xf32>
    %315 = arith.mulf %306, %282 : vector<1x128xf32>
    %316 = arith.mulf %300, %308 : vector<1x128xf32>
    %317 = arith.addf %315, %316 : vector<1x128xf32>
    %318 = math.tanh %317 : vector<1x128xf32>
    %319 = arith.mulf %314, %318 : vector<1x128xf32>
    %320 = arith.index_cast %c4_i32_207 : i32 to index
    %c0_213 = arith.constant 0 : index
    %321 = vector.load %arg18[%320, %c0_213] : memref<8x128xf32, #tpu.memory_space<vmem>>, vector<1x128xf32>
    tpu.vector_store %arg18[%320, %c0_213], %319 {strides = array<i32>} : memref<8x128xf32, #tpu.memory_space<vmem>>, vector<1x128xf32>,
    %c7_i32_214 = arith.constant 7 : i32
    %322 = arith.subi %c7_i32_214, %c4_i32_207 : i32
    %323 = arith.index_cast %322 : i32 to index
    %c0_215 = arith.constant 0 : index
    %324 = vector.load %arg19[%323, %c0_215] : memref<8x128xf32, #tpu.memory_space<vmem>>, vector<1x128xf32>
    tpu.vector_store %arg19[%323, %c0_215], %319 {strides = array<i32>} : memref<8x128xf32, #tpu.memory_space<vmem>>, vector<1x128xf32>,
    %c5_i32_216 = arith.constant 5 : i32
    %325 = arith.index_cast %c5_i32_216 : i32 to index
    %c0_217 = arith.constant 0 : index
    %326 = vector.load %arg17[%325, %c0_217] : memref<8x512xf32, #tpu.memory_space<vmem>>, vector<1x512xf32>
    %327 = vector.extract_strided_slice %319 {offsets = [0, 0], sizes = [1, 32], strides = [1, 1]} : vector<1x128xf32> to vector<1x32xf32>
    %cst_218 = arith.constant dense<0.000000e+00> : vector<1x512xf32>
    %328 = tpu.matmul %327, %147, %cst_218 {dimension_numbers = #tpu.dot_dimension_numbers<[1], [0], [0], [1], [0, 0, 1, 1], [], []>} : vector<1x32xf32>, vector<32x512xf32>, vector<1x512xf32> -> vector<1x512xf32>
    %329 = arith.addf %326, %328 : vector<1x512xf32>
    %330 = vector.extract_strided_slice %329 {offsets = [0, 0], sizes = [1, 128], strides = [1, 1]} : vector<1x512xf32> to vector<1x128xf32>
    %331 = arith.negf %330 : vector<1x128xf32>
    %332 = math.exp %331 : vector<1x128xf32>
    %cst_219 = arith.constant 1.000000e+00 : f32
    %333 = vector.broadcast %cst_219 : f32 to vector<1x128xf32>
    %334 = arith.addf %333, %332 : vector<1x128xf32>
    %335 = arith.divf %333, %334 : vector<1x128xf32>
    %336 = vector.extract_strided_slice %329 {offsets = [0, 128], sizes = [1, 128], strides = [1, 1]} : vector<1x512xf32> to vector<1x128xf32>
    %337 = arith.negf %336 : vector<1x128xf32>
    %338 = math.exp %337 : vector<1x128xf32>
    %cst_220 = arith.constant 1.000000e+00 : f32
    %339 = vector.broadcast %cst_220 : f32 to vector<1x128xf32>
    %340 = arith.addf %339, %338 : vector<1x128xf32>
    %341 = arith.divf %339, %340 : vector<1x128xf32>
    %342 = vector.extract_strided_slice %329 {offsets = [0, 256], sizes = [1, 128], strides = [1, 1]} : vector<1x512xf32> to vector<1x128xf32>
    %343 = math.tanh %342 : vector<1x128xf32>
    %344 = vector.extract_strided_slice %329 {offsets = [0, 384], sizes = [1, 128], strides = [1, 1]} : vector<1x512xf32> to vector<1x128xf32>
    %345 = arith.negf %344 : vector<1x128xf32>
    %346 = math.exp %345 : vector<1x128xf32>
    %cst_221 = arith.constant 1.000000e+00 : f32
    %347 = vector.broadcast %cst_221 : f32 to vector<1x128xf32>
    %348 = arith.addf %347, %346 : vector<1x128xf32>
    %349 = arith.divf %347, %348 : vector<1x128xf32>
    %350 = arith.mulf %341, %317 : vector<1x128xf32>
    %351 = arith.mulf %335, %343 : vector<1x128xf32>
    %352 = arith.addf %350, %351 : vector<1x128xf32>
    %353 = math.tanh %352 : vector<1x128xf32>
    %354 = arith.mulf %349, %353 : vector<1x128xf32>
    %355 = arith.index_cast %c5_i32_216 : i32 to index
    %c0_222 = arith.constant 0 : index
    %356 = vector.load %arg18[%355, %c0_222] : memref<8x128xf32, #tpu.memory_space<vmem>>, vector<1x128xf32>
    tpu.vector_store %arg18[%355, %c0_222], %354 {strides = array<i32>} : memref<8x128xf32, #tpu.memory_space<vmem>>, vector<1x128xf32>,
    %c7_i32_223 = arith.constant 7 : i32
    %357 = arith.subi %c7_i32_223, %c5_i32_216 : i32
    %358 = arith.index_cast %357 : i32 to index
    %c0_224 = arith.constant 0 : index
    %359 = vector.load %arg19[%358, %c0_224] : memref<8x128xf32, #tpu.memory_space<vmem>>, vector<1x128xf32>
    tpu.vector_store %arg19[%358, %c0_224], %354 {strides = array<i32>} : memref<8x128xf32, #tpu.memory_space<vmem>>, vector<1x128xf32>,
    %c6_i32_225 = arith.constant 6 : i32
    %360 = arith.index_cast %c6_i32_225 : i32 to index
    %c0_226 = arith.constant 0 : index
    %361 = vector.load %arg17[%360, %c0_226] : memref<8x512xf32, #tpu.memory_space<vmem>>, vector<1x512xf32>
    %362 = vector.extract_strided_slice %354 {offsets = [0, 0], sizes = [1, 32], strides = [1, 1]} : vector<1x128xf32> to vector<1x32xf32>
    %cst_227 = arith.constant dense<0.000000e+00> : vector<1x512xf32>
    %363 = tpu.matmul %362, %147, %cst_227 {dimension_numbers = #tpu.dot_dimension_numbers<[1], [0], [0], [1], [0, 0, 1, 1], [], []>} : vector<1x32xf32>, vector<32x512xf32>, vector<1x512xf32> -> vector<1x512xf32>
    %364 = arith.addf %361, %363 : vector<1x512xf32>
    %365 = vector.extract_strided_slice %364 {offsets = [0, 0], sizes = [1, 128], strides = [1, 1]} : vector<1x512xf32> to vector<1x128xf32>
    %366 = arith.negf %365 : vector<1x128xf32>
    %367 = math.exp %366 : vector<1x128xf32>
    %cst_228 = arith.constant 1.000000e+00 : f32
    %368 = vector.broadcast %cst_228 : f32 to vector<1x128xf32>
    %369 = arith.addf %368, %367 : vector<1x128xf32>
    %370 = arith.divf %368, %369 : vector<1x128xf32>
    %371 = vector.extract_strided_slice %364 {offsets = [0, 128], sizes = [1, 128], strides = [1, 1]} : vector<1x512xf32> to vector<1x128xf32>
    %372 = arith.negf %371 : vector<1x128xf32>
    %373 = math.exp %372 : vector<1x128xf32>
    %cst_229 = arith.constant 1.000000e+00 : f32
    %374 = vector.broadcast %cst_229 : f32 to vector<1x128xf32>
    %375 = arith.addf %374, %373 : vector<1x128xf32>
    %376 = arith.divf %374, %375 : vector<1x128xf32>
    %377 = vector.extract_strided_slice %364 {offsets = [0, 256], sizes = [1, 128], strides = [1, 1]} : vector<1x512xf32> to vector<1x128xf32>
    %378 = math.tanh %377 : vector<1x128xf32>
    %379 = vector.extract_strided_slice %364 {offsets = [0, 384], sizes = [1, 128], strides = [1, 1]} : vector<1x512xf32> to vector<1x128xf32>
    %380 = arith.negf %379 : vector<1x128xf32>
    %381 = math.exp %380 : vector<1x128xf32>
    %cst_230 = arith.constant 1.000000e+00 : f32
    %382 = vector.broadcast %cst_230 : f32 to vector<1x128xf32>
    %383 = arith.addf %382, %381 : vector<1x128xf32>
    %384 = arith.divf %382, %383 : vector<1x128xf32>
    %385 = arith.mulf %376, %352 : vector<1x128xf32>
    %386 = arith.mulf %370, %378 : vector<1x128xf32>
    %387 = arith.addf %385, %386 : vector<1x128xf32>
    %388 = math.tanh %387 : vector<1x128xf32>
    %389 = arith.mulf %384, %388 : vector<1x128xf32>
    %390 = arith.index_cast %c6_i32_225 : i32 to index
    %c0_231 = arith.constant 0 : index
    %391 = vector.load %arg18[%390, %c0_231] : memref<8x128xf32, #tpu.memory_space<vmem>>, vector<1x128xf32>
    tpu.vector_store %arg18[%390, %c0_231], %389 {strides = array<i32>} : memref<8x128xf32, #tpu.memory_space<vmem>>, vector<1x128xf32>,
    %c7_i32_232 = arith.constant 7 : i32
    %392 = arith.subi %c7_i32_232, %c6_i32_225 : i32
    %393 = arith.index_cast %392 : i32 to index
    %c0_233 = arith.constant 0 : index
    %394 = vector.load %arg19[%393, %c0_233] : memref<8x128xf32, #tpu.memory_space<vmem>>, vector<1x128xf32>
    tpu.vector_store %arg19[%393, %c0_233], %389 {strides = array<i32>} : memref<8x128xf32, #tpu.memory_space<vmem>>, vector<1x128xf32>,
    %c7_i32_234 = arith.constant 7 : i32
    %395 = arith.index_cast %c7_i32_234 : i32 to index
    %c0_235 = arith.constant 0 : index
    %396 = vector.load %arg17[%395, %c0_235] : memref<8x512xf32, #tpu.memory_space<vmem>>, vector<1x512xf32>
    %397 = vector.extract_strided_slice %389 {offsets = [0, 0], sizes = [1, 32], strides = [1, 1]} : vector<1x128xf32> to vector<1x32xf32>
    %cst_236 = arith.constant dense<0.000000e+00> : vector<1x512xf32>
    %398 = tpu.matmul %397, %147, %cst_236 {dimension_numbers = #tpu.dot_dimension_numbers<[1], [0], [0], [1], [0, 0, 1, 1], [], []>} : vector<1x32xf32>, vector<32x512xf32>, vector<1x512xf32> -> vector<1x512xf32>
    %399 = arith.addf %396, %398 : vector<1x512xf32>
    %400 = vector.extract_strided_slice %399 {offsets = [0, 0], sizes = [1, 128], strides = [1, 1]} : vector<1x512xf32> to vector<1x128xf32>
    %401 = arith.negf %400 : vector<1x128xf32>
    %402 = math.exp %401 : vector<1x128xf32>
    %cst_237 = arith.constant 1.000000e+00 : f32
    %403 = vector.broadcast %cst_237 : f32 to vector<1x128xf32>
    %404 = arith.addf %403, %402 : vector<1x128xf32>
    %405 = arith.divf %403, %404 : vector<1x128xf32>
    %406 = vector.extract_strided_slice %399 {offsets = [0, 128], sizes = [1, 128], strides = [1, 1]} : vector<1x512xf32> to vector<1x128xf32>
    %407 = arith.negf %406 : vector<1x128xf32>
    %408 = math.exp %407 : vector<1x128xf32>
    %cst_238 = arith.constant 1.000000e+00 : f32
    %409 = vector.broadcast %cst_238 : f32 to vector<1x128xf32>
    %410 = arith.addf %409, %408 : vector<1x128xf32>
    %411 = arith.divf %409, %410 : vector<1x128xf32>
    %412 = vector.extract_strided_slice %399 {offsets = [0, 256], sizes = [1, 128], strides = [1, 1]} : vector<1x512xf32> to vector<1x128xf32>
    %413 = math.tanh %412 : vector<1x128xf32>
    %414 = vector.extract_strided_slice %399 {offsets = [0, 384], sizes = [1, 128], strides = [1, 1]} : vector<1x512xf32> to vector<1x128xf32>
    %415 = arith.negf %414 : vector<1x128xf32>
    %416 = math.exp %415 : vector<1x128xf32>
    %cst_239 = arith.constant 1.000000e+00 : f32
    %417 = vector.broadcast %cst_239 : f32 to vector<1x128xf32>
    %418 = arith.addf %417, %416 : vector<1x128xf32>
    %419 = arith.divf %417, %418 : vector<1x128xf32>
    %420 = arith.mulf %411, %387 : vector<1x128xf32>
    %421 = arith.mulf %405, %413 : vector<1x128xf32>
    %422 = arith.addf %420, %421 : vector<1x128xf32>
    %423 = math.tanh %422 : vector<1x128xf32>
    %424 = arith.mulf %419, %423 : vector<1x128xf32>
    %425 = arith.index_cast %c7_i32_234 : i32 to index
    %c0_240 = arith.constant 0 : index
    %426 = vector.load %arg18[%425, %c0_240] : memref<8x128xf32, #tpu.memory_space<vmem>>, vector<1x128xf32>
    tpu.vector_store %arg18[%425, %c0_240], %424 {strides = array<i32>} : memref<8x128xf32, #tpu.memory_space<vmem>>, vector<1x128xf32>,
    %c7_i32_241 = arith.constant 7 : i32
    %427 = arith.subi %c7_i32_241, %c7_i32_234 : i32
    %428 = arith.index_cast %427 : i32 to index
    %c0_242 = arith.constant 0 : index
    %429 = vector.load %arg19[%428, %c0_242] : memref<8x128xf32, #tpu.memory_space<vmem>>, vector<1x128xf32>
    tpu.vector_store %arg19[%428, %c0_242], %424 {strides = array<i32>} : memref<8x128xf32, #tpu.memory_space<vmem>>, vector<1x128xf32>,
    %c8_i32 = arith.constant 8 : i32
    %430 = tpu.iota {dimensions = array<i32: 1>} : vector<1x128xi32>
    %c16_i32 = arith.constant 16 : i32
    %431 = vector.broadcast %c16_i32 : i32 to vector<1x128xi32>
    %432 = arith.cmpi slt, %430, %431 : vector<1x128xi32>
    %c0_243 = arith.constant 0 : index
    %c0_244 = arith.constant 0 : index
    %433 = vector.load %arg18[%c0_243, %c0_244] : memref<8x128xf32, #tpu.memory_space<vmem>>, vector<8x128xf32>
    %c0_245 = arith.constant 0 : index
    %c0_246 = arith.constant 0 : index
    %434 = vector.load %arg19[%c0_245, %c0_246] : memref<8x128xf32, #tpu.memory_space<vmem>>, vector<8x128xf32>
    %435 = vector.shape_cast %432 : vector<1x128xi1> to vector<1x128xi1>
    %436 = vector.broadcast %435 : vector<1x128xi1> to vector<8x128xi1>
    %437 = arith.select %436, %433, %434 : vector<8x128xi1>, vector<8x128xf32>
    %438 = vector.extract_strided_slice %437 {offsets = [0, 0], sizes = [8, 32], strides = [1, 1]} : vector<8x128xf32> to vector<8x32xf32>
    %c0_247 = arith.constant 0 : index
    %c0_248 = arith.constant 0 : index
    %439 = vector.load %arg8[%c0_247, %c0_248] : memref<32x128xf32, #tpu.memory_space<vmem>>, vector<32x128xf32>
    %cst_249 = arith.constant dense<0.000000e+00> : vector<8x128xf32>
    %440 = tpu.matmul %438, %439, %cst_249 {dimension_numbers = #tpu.dot_dimension_numbers<[1], [0], [0], [1], [0, 0, 1, 1], [], []>} : vector<8x32xf32>, vector<32x128xf32>, vector<8x128xf32> -> vector<8x128xf32>
    %c0_250 = arith.constant 0 : index
    %c0_251 = arith.constant 0 : index
    %441 = vector.load %arg9[%c0_250, %c0_251] : memref<1x128xf32, #tpu.memory_space<vmem>>, vector<1x128xf32>
    %442 = vector.broadcast %441 : vector<1x128xf32> to vector<8x128xf32>
    %443 = arith.addf %440, %442 : vector<8x128xf32>
    %c0_252 = arith.constant 0 : index
    %c0_253 = arith.constant 0 : index
    %444 = vector.load %arg20[%c0_252, %c0_253] : memref<8x128xf32, #tpu.memory_space<vmem>>, vector<8x128xf32>
    tpu.vector_store %arg20[%c0_252, %c0_253], %443 {strides = array<i32>} : memref<8x128xf32, #tpu.memory_space<vmem>>, vector<8x128xf32>,
    %c0_254 = arith.constant 0 : index
    %c0_255 = arith.constant 0 : index
    %445 = vector.load %arg10[%c0_254, %c0_255] : memref<16x128xf32, #tpu.memory_space<vmem>>, vector<16x128xf32>
    %446 = tpu.iota {dimensions = array<i32: 0>} : vector<16x128xi32>
    %447 = tpu.iota {dimensions = array<i32: 1>} : vector<16x128xi32>
    %448 = arith.cmpi eq, %446, %447 : vector<16x128xi32>
    %cst_256 = arith.constant 1.000000e+00 : f32
    %449 = vector.broadcast %cst_256 : f32 to vector<128x128xf32>
    %450 = tpu.iota {dimensions = array<i32: 1>} : vector<1x128xi32>
    %c7_i32_257 = arith.constant 7 : i32
    %451 = vector.broadcast %c7_i32_257 : i32 to vector<1x128xi32>
    %452 = arith.cmpi eq, %450, %451 : vector<1x128xi32>
    %cst_258 = arith.constant 0.000000e+00 : f32
    %cst_259 = arith.constant -1.000000e+04 : f32
    %453 = vector.broadcast %cst_258 : f32 to vector<1x128xf32>
    %454 = vector.broadcast %cst_259 : f32 to vector<1x128xf32>
    %455 = arith.select %452, %453, %454 : vector<1x128xi1>, vector<1x128xf32>
    %c0_i32_260 = arith.constant 0 : i32
    %456 = vector.shape_cast %455 : vector<1x128xf32> to vector<1x128xf32>
    %457 = vector.broadcast %456 : vector<1x128xf32> to vector<16x128xf32>
    %cst_261 = arith.constant 0.000000e+00 : f32
    %458 = vector.broadcast %cst_261 : f32 to vector<16x128xf32>
    %459 = arith.select %448, %457, %458 : vector<16x128xi1>, vector<16x128xf32>
    %cst_262 = arith.constant dense<0.000000e+00> : vector<16x128xf32>
    %460 = tpu.matmul %459, %449, %cst_262 {dimension_numbers = #tpu.dot_dimension_numbers<[1], [0], [0], [1], [0, 0, 1, 1], [], []>} : vector<16x128xf32>, vector<128x128xf32>, vector<16x128xf32> -> vector<16x128xf32>
    %461 = arith.addf %460, %445 : vector<16x128xf32>
    %cst_263 = arith.constant dense<0xFF800000> : vector<128xf32>
    %462 = vector.multi_reduction <maximumf>, %461, %cst_263 [0] : vector<16x128xf32> to vector<128xf32>
    %463 = vector.shape_cast %462 : vector<128xf32> to vector<1x128xf32>
    %464 = vector.broadcast %463 : vector<1x128xf32> to vector<16x128xf32>
    %465 = arith.cmpf oeq, %461, %464 : vector<16x128xf32>
    %c16_i32_264 = arith.constant 16 : i32
    %466 = vector.broadcast %c16_i32_264 : i32 to vector<16x128xi32>
    %467 = arith.select %465, %446, %466 : vector<16x128xi1>, vector<16x128xi32>
    %cst_265 = arith.constant dense<2147483647> : vector<128xi32>
    %468 = vector.multi_reduction <minsi>, %467, %cst_265 [0] : vector<16x128xi32> to vector<128xi32>
    %469 = vector.shape_cast %468 : vector<128xi32> to vector<1x128xi32>
    %470 = arith.index_cast %c0_i32_260 : i32 to index
    %c0_266 = arith.constant 0 : index
    %471 = vector.load %arg21[%470, %c0_266] : memref<8x128xi32, #tpu.memory_space<vmem>>, vector<1x128xi32>
    tpu.vector_store %arg21[%470, %c0_266], %469 {strides = array<i32>} : memref<8x128xi32, #tpu.memory_space<vmem>>, vector<1x128xi32>,
    %472 = arith.index_cast %c0_i32_260 : i32 to index
    %c0_267 = arith.constant 0 : index
    %473 = vector.load %arg20[%472, %c0_267] : memref<8x128xf32, #tpu.memory_space<vmem>>, vector<1x128xf32>
    %474 = arith.addf %463, %473 : vector<1x128xf32>
    %c1_i32_268 = arith.constant 1 : i32
    %475 = vector.shape_cast %474 : vector<1x128xf32> to vector<1x128xf32>
    %476 = vector.broadcast %475 : vector<1x128xf32> to vector<16x128xf32>
    %cst_269 = arith.constant 0.000000e+00 : f32
    %477 = vector.broadcast %cst_269 : f32 to vector<16x128xf32>
    %478 = arith.select %448, %476, %477 : vector<16x128xi1>, vector<16x128xf32>
    %cst_270 = arith.constant dense<0.000000e+00> : vector<16x128xf32>
    %479 = tpu.matmul %478, %449, %cst_270 {dimension_numbers = #tpu.dot_dimension_numbers<[1], [0], [0], [1], [0, 0, 1, 1], [], []>} : vector<16x128xf32>, vector<128x128xf32>, vector<16x128xf32> -> vector<16x128xf32>
    %480 = arith.addf %479, %445 : vector<16x128xf32>
    %cst_271 = arith.constant dense<0xFF800000> : vector<128xf32>
    %481 = vector.multi_reduction <maximumf>, %480, %cst_271 [0] : vector<16x128xf32> to vector<128xf32>
    %482 = vector.shape_cast %481 : vector<128xf32> to vector<1x128xf32>
    %483 = vector.broadcast %482 : vector<1x128xf32> to vector<16x128xf32>
    %484 = arith.cmpf oeq, %480, %483 : vector<16x128xf32>
    %c16_i32_272 = arith.constant 16 : i32
    %485 = vector.broadcast %c16_i32_272 : i32 to vector<16x128xi32>
    %486 = arith.select %484, %446, %485 : vector<16x128xi1>, vector<16x128xi32>
    %cst_273 = arith.constant dense<2147483647> : vector<128xi32>
    %487 = vector.multi_reduction <minsi>, %486, %cst_273 [0] : vector<16x128xi32> to vector<128xi32>
    %488 = vector.shape_cast %487 : vector<128xi32> to vector<1x128xi32>
    %489 = arith.index_cast %c1_i32_268 : i32 to index
    %c0_274 = arith.constant 0 : index
    %490 = vector.load %arg21[%489, %c0_274] : memref<8x128xi32, #tpu.memory_space<vmem>>, vector<1x128xi32>
    tpu.vector_store %arg21[%489, %c0_274], %488 {strides = array<i32>} : memref<8x128xi32, #tpu.memory_space<vmem>>, vector<1x128xi32>,
    %491 = arith.index_cast %c1_i32_268 : i32 to index
    %c0_275 = arith.constant 0 : index
    %492 = vector.load %arg20[%491, %c0_275] : memref<8x128xf32, #tpu.memory_space<vmem>>, vector<1x128xf32>
    %493 = arith.addf %482, %492 : vector<1x128xf32>
    %c2_i32_276 = arith.constant 2 : i32
    %494 = vector.shape_cast %493 : vector<1x128xf32> to vector<1x128xf32>
    %495 = vector.broadcast %494 : vector<1x128xf32> to vector<16x128xf32>
    %cst_277 = arith.constant 0.000000e+00 : f32
    %496 = vector.broadcast %cst_277 : f32 to vector<16x128xf32>
    %497 = arith.select %448, %495, %496 : vector<16x128xi1>, vector<16x128xf32>
    %cst_278 = arith.constant dense<0.000000e+00> : vector<16x128xf32>
    %498 = tpu.matmul %497, %449, %cst_278 {dimension_numbers = #tpu.dot_dimension_numbers<[1], [0], [0], [1], [0, 0, 1, 1], [], []>} : vector<16x128xf32>, vector<128x128xf32>, vector<16x128xf32> -> vector<16x128xf32>
    %499 = arith.addf %498, %445 : vector<16x128xf32>
    %cst_279 = arith.constant dense<0xFF800000> : vector<128xf32>
    %500 = vector.multi_reduction <maximumf>, %499, %cst_279 [0] : vector<16x128xf32> to vector<128xf32>
    %501 = vector.shape_cast %500 : vector<128xf32> to vector<1x128xf32>
    %502 = vector.broadcast %501 : vector<1x128xf32> to vector<16x128xf32>
    %503 = arith.cmpf oeq, %499, %502 : vector<16x128xf32>
    %c16_i32_280 = arith.constant 16 : i32
    %504 = vector.broadcast %c16_i32_280 : i32 to vector<16x128xi32>
    %505 = arith.select %503, %446, %504 : vector<16x128xi1>, vector<16x128xi32>
    %cst_281 = arith.constant dense<2147483647> : vector<128xi32>
    %506 = vector.multi_reduction <minsi>, %505, %cst_281 [0] : vector<16x128xi32> to vector<128xi32>
    %507 = vector.shape_cast %506 : vector<128xi32> to vector<1x128xi32>
    %508 = arith.index_cast %c2_i32_276 : i32 to index
    %c0_282 = arith.constant 0 : index
    %509 = vector.load %arg21[%508, %c0_282] : memref<8x128xi32, #tpu.memory_space<vmem>>, vector<1x128xi32>
    tpu.vector_store %arg21[%508, %c0_282], %507 {strides = array<i32>} : memref<8x128xi32, #tpu.memory_space<vmem>>, vector<1x128xi32>,
    %510 = arith.index_cast %c2_i32_276 : i32 to index
    %c0_283 = arith.constant 0 : index
    %511 = vector.load %arg20[%510, %c0_283] : memref<8x128xf32, #tpu.memory_space<vmem>>, vector<1x128xf32>
    %512 = arith.addf %501, %511 : vector<1x128xf32>
    %c3_i32_284 = arith.constant 3 : i32
    %513 = vector.shape_cast %512 : vector<1x128xf32> to vector<1x128xf32>
    %514 = vector.broadcast %513 : vector<1x128xf32> to vector<16x128xf32>
    %cst_285 = arith.constant 0.000000e+00 : f32
    %515 = vector.broadcast %cst_285 : f32 to vector<16x128xf32>
    %516 = arith.select %448, %514, %515 : vector<16x128xi1>, vector<16x128xf32>
    %cst_286 = arith.constant dense<0.000000e+00> : vector<16x128xf32>
    %517 = tpu.matmul %516, %449, %cst_286 {dimension_numbers = #tpu.dot_dimension_numbers<[1], [0], [0], [1], [0, 0, 1, 1], [], []>} : vector<16x128xf32>, vector<128x128xf32>, vector<16x128xf32> -> vector<16x128xf32>
    %518 = arith.addf %517, %445 : vector<16x128xf32>
    %cst_287 = arith.constant dense<0xFF800000> : vector<128xf32>
    %519 = vector.multi_reduction <maximumf>, %518, %cst_287 [0] : vector<16x128xf32> to vector<128xf32>
    %520 = vector.shape_cast %519 : vector<128xf32> to vector<1x128xf32>
    %521 = vector.broadcast %520 : vector<1x128xf32> to vector<16x128xf32>
    %522 = arith.cmpf oeq, %518, %521 : vector<16x128xf32>
    %c16_i32_288 = arith.constant 16 : i32
    %523 = vector.broadcast %c16_i32_288 : i32 to vector<16x128xi32>
    %524 = arith.select %522, %446, %523 : vector<16x128xi1>, vector<16x128xi32>
    %cst_289 = arith.constant dense<2147483647> : vector<128xi32>
    %525 = vector.multi_reduction <minsi>, %524, %cst_289 [0] : vector<16x128xi32> to vector<128xi32>
    %526 = vector.shape_cast %525 : vector<128xi32> to vector<1x128xi32>
    %527 = arith.index_cast %c3_i32_284 : i32 to index
    %c0_290 = arith.constant 0 : index
    %528 = vector.load %arg21[%527, %c0_290] : memref<8x128xi32, #tpu.memory_space<vmem>>, vector<1x128xi32>
    tpu.vector_store %arg21[%527, %c0_290], %526 {strides = array<i32>} : memref<8x128xi32, #tpu.memory_space<vmem>>, vector<1x128xi32>,
    %529 = arith.index_cast %c3_i32_284 : i32 to index
    %c0_291 = arith.constant 0 : index
    %530 = vector.load %arg20[%529, %c0_291] : memref<8x128xf32, #tpu.memory_space<vmem>>, vector<1x128xf32>
    %531 = arith.addf %520, %530 : vector<1x128xf32>
    %c4_i32_292 = arith.constant 4 : i32
    %532 = vector.shape_cast %531 : vector<1x128xf32> to vector<1x128xf32>
    %533 = vector.broadcast %532 : vector<1x128xf32> to vector<16x128xf32>
    %cst_293 = arith.constant 0.000000e+00 : f32
    %534 = vector.broadcast %cst_293 : f32 to vector<16x128xf32>
    %535 = arith.select %448, %533, %534 : vector<16x128xi1>, vector<16x128xf32>
    %cst_294 = arith.constant dense<0.000000e+00> : vector<16x128xf32>
    %536 = tpu.matmul %535, %449, %cst_294 {dimension_numbers = #tpu.dot_dimension_numbers<[1], [0], [0], [1], [0, 0, 1, 1], [], []>} : vector<16x128xf32>, vector<128x128xf32>, vector<16x128xf32> -> vector<16x128xf32>
    %537 = arith.addf %536, %445 : vector<16x128xf32>
    %cst_295 = arith.constant dense<0xFF800000> : vector<128xf32>
    %538 = vector.multi_reduction <maximumf>, %537, %cst_295 [0] : vector<16x128xf32> to vector<128xf32>
    %539 = vector.shape_cast %538 : vector<128xf32> to vector<1x128xf32>
    %540 = vector.broadcast %539 : vector<1x128xf32> to vector<16x128xf32>
    %541 = arith.cmpf oeq, %537, %540 : vector<16x128xf32>
    %c16_i32_296 = arith.constant 16 : i32
    %542 = vector.broadcast %c16_i32_296 : i32 to vector<16x128xi32>
    %543 = arith.select %541, %446, %542 : vector<16x128xi1>, vector<16x128xi32>
    %cst_297 = arith.constant dense<2147483647> : vector<128xi32>
    %544 = vector.multi_reduction <minsi>, %543, %cst_297 [0] : vector<16x128xi32> to vector<128xi32>
    %545 = vector.shape_cast %544 : vector<128xi32> to vector<1x128xi32>
    %546 = arith.index_cast %c4_i32_292 : i32 to index
    %c0_298 = arith.constant 0 : index
    %547 = vector.load %arg21[%546, %c0_298] : memref<8x128xi32, #tpu.memory_space<vmem>>, vector<1x128xi32>
    tpu.vector_store %arg21[%546, %c0_298], %545 {strides = array<i32>} : memref<8x128xi32, #tpu.memory_space<vmem>>, vector<1x128xi32>,
    %548 = arith.index_cast %c4_i32_292 : i32 to index
    %c0_299 = arith.constant 0 : index
    %549 = vector.load %arg20[%548, %c0_299] : memref<8x128xf32, #tpu.memory_space<vmem>>, vector<1x128xf32>
    %550 = arith.addf %539, %549 : vector<1x128xf32>
    %c5_i32_300 = arith.constant 5 : i32
    %551 = vector.shape_cast %550 : vector<1x128xf32> to vector<1x128xf32>
    %552 = vector.broadcast %551 : vector<1x128xf32> to vector<16x128xf32>
    %cst_301 = arith.constant 0.000000e+00 : f32
    %553 = vector.broadcast %cst_301 : f32 to vector<16x128xf32>
    %554 = arith.select %448, %552, %553 : vector<16x128xi1>, vector<16x128xf32>
    %cst_302 = arith.constant dense<0.000000e+00> : vector<16x128xf32>
    %555 = tpu.matmul %554, %449, %cst_302 {dimension_numbers = #tpu.dot_dimension_numbers<[1], [0], [0], [1], [0, 0, 1, 1], [], []>} : vector<16x128xf32>, vector<128x128xf32>, vector<16x128xf32> -> vector<16x128xf32>
    %556 = arith.addf %555, %445 : vector<16x128xf32>
    %cst_303 = arith.constant dense<0xFF800000> : vector<128xf32>
    %557 = vector.multi_reduction <maximumf>, %556, %cst_303 [0] : vector<16x128xf32> to vector<128xf32>
    %558 = vector.shape_cast %557 : vector<128xf32> to vector<1x128xf32>
    %559 = vector.broadcast %558 : vector<1x128xf32> to vector<16x128xf32>
    %560 = arith.cmpf oeq, %556, %559 : vector<16x128xf32>
    %c16_i32_304 = arith.constant 16 : i32
    %561 = vector.broadcast %c16_i32_304 : i32 to vector<16x128xi32>
    %562 = arith.select %560, %446, %561 : vector<16x128xi1>, vector<16x128xi32>
    %cst_305 = arith.constant dense<2147483647> : vector<128xi32>
    %563 = vector.multi_reduction <minsi>, %562, %cst_305 [0] : vector<16x128xi32> to vector<128xi32>
    %564 = vector.shape_cast %563 : vector<128xi32> to vector<1x128xi32>
    %565 = arith.index_cast %c5_i32_300 : i32 to index
    %c0_306 = arith.constant 0 : index
    %566 = vector.load %arg21[%565, %c0_306] : memref<8x128xi32, #tpu.memory_space<vmem>>, vector<1x128xi32>
    tpu.vector_store %arg21[%565, %c0_306], %564 {strides = array<i32>} : memref<8x128xi32, #tpu.memory_space<vmem>>, vector<1x128xi32>,
    %567 = arith.index_cast %c5_i32_300 : i32 to index
    %c0_307 = arith.constant 0 : index
    %568 = vector.load %arg20[%567, %c0_307] : memref<8x128xf32, #tpu.memory_space<vmem>>, vector<1x128xf32>
    %569 = arith.addf %558, %568 : vector<1x128xf32>
    %c6_i32_308 = arith.constant 6 : i32
    %570 = vector.shape_cast %569 : vector<1x128xf32> to vector<1x128xf32>
    %571 = vector.broadcast %570 : vector<1x128xf32> to vector<16x128xf32>
    %cst_309 = arith.constant 0.000000e+00 : f32
    %572 = vector.broadcast %cst_309 : f32 to vector<16x128xf32>
    %573 = arith.select %448, %571, %572 : vector<16x128xi1>, vector<16x128xf32>
    %cst_310 = arith.constant dense<0.000000e+00> : vector<16x128xf32>
    %574 = tpu.matmul %573, %449, %cst_310 {dimension_numbers = #tpu.dot_dimension_numbers<[1], [0], [0], [1], [0, 0, 1, 1], [], []>} : vector<16x128xf32>, vector<128x128xf32>, vector<16x128xf32> -> vector<16x128xf32>
    %575 = arith.addf %574, %445 : vector<16x128xf32>
    %cst_311 = arith.constant dense<0xFF800000> : vector<128xf32>
    %576 = vector.multi_reduction <maximumf>, %575, %cst_311 [0] : vector<16x128xf32> to vector<128xf32>
    %577 = vector.shape_cast %576 : vector<128xf32> to vector<1x128xf32>
    %578 = vector.broadcast %577 : vector<1x128xf32> to vector<16x128xf32>
    %579 = arith.cmpf oeq, %575, %578 : vector<16x128xf32>
    %c16_i32_312 = arith.constant 16 : i32
    %580 = vector.broadcast %c16_i32_312 : i32 to vector<16x128xi32>
    %581 = arith.select %579, %446, %580 : vector<16x128xi1>, vector<16x128xi32>
    %cst_313 = arith.constant dense<2147483647> : vector<128xi32>
    %582 = vector.multi_reduction <minsi>, %581, %cst_313 [0] : vector<16x128xi32> to vector<128xi32>
    %583 = vector.shape_cast %582 : vector<128xi32> to vector<1x128xi32>
    %584 = arith.index_cast %c6_i32_308 : i32 to index
    %c0_314 = arith.constant 0 : index
    %585 = vector.load %arg21[%584, %c0_314] : memref<8x128xi32, #tpu.memory_space<vmem>>, vector<1x128xi32>
    tpu.vector_store %arg21[%584, %c0_314], %583 {strides = array<i32>} : memref<8x128xi32, #tpu.memory_space<vmem>>, vector<1x128xi32>,
    %586 = arith.index_cast %c6_i32_308 : i32 to index
    %c0_315 = arith.constant 0 : index
    %587 = vector.load %arg20[%586, %c0_315] : memref<8x128xf32, #tpu.memory_space<vmem>>, vector<1x128xf32>
    %588 = arith.addf %577, %587 : vector<1x128xf32>
    %c7_i32_316 = arith.constant 7 : i32
    %589 = vector.shape_cast %588 : vector<1x128xf32> to vector<1x128xf32>
    %590 = vector.broadcast %589 : vector<1x128xf32> to vector<16x128xf32>
    %cst_317 = arith.constant 0.000000e+00 : f32
    %591 = vector.broadcast %cst_317 : f32 to vector<16x128xf32>
    %592 = arith.select %448, %590, %591 : vector<16x128xi1>, vector<16x128xf32>
    %cst_318 = arith.constant dense<0.000000e+00> : vector<16x128xf32>
    %593 = tpu.matmul %592, %449, %cst_318 {dimension_numbers = #tpu.dot_dimension_numbers<[1], [0], [0], [1], [0, 0, 1, 1], [], []>} : vector<16x128xf32>, vector<128x128xf32>, vector<16x128xf32> -> vector<16x128xf32>
    %594 = arith.addf %593, %445 : vector<16x128xf32>
    %cst_319 = arith.constant dense<0xFF800000> : vector<128xf32>
    %595 = vector.multi_reduction <maximumf>, %594, %cst_319 [0] : vector<16x128xf32> to vector<128xf32>
    %596 = vector.shape_cast %595 : vector<128xf32> to vector<1x128xf32>
    %597 = vector.broadcast %596 : vector<1x128xf32> to vector<16x128xf32>
    %598 = arith.cmpf oeq, %594, %597 : vector<16x128xf32>
    %c16_i32_320 = arith.constant 16 : i32
    %599 = vector.broadcast %c16_i32_320 : i32 to vector<16x128xi32>
    %600 = arith.select %598, %446, %599 : vector<16x128xi1>, vector<16x128xi32>
    %cst_321 = arith.constant dense<2147483647> : vector<128xi32>
    %601 = vector.multi_reduction <minsi>, %600, %cst_321 [0] : vector<16x128xi32> to vector<128xi32>
    %602 = vector.shape_cast %601 : vector<128xi32> to vector<1x128xi32>
    %603 = arith.index_cast %c7_i32_316 : i32 to index
    %c0_322 = arith.constant 0 : index
    %604 = vector.load %arg21[%603, %c0_322] : memref<8x128xi32, #tpu.memory_space<vmem>>, vector<1x128xi32>
    tpu.vector_store %arg21[%603, %c0_322], %602 {strides = array<i32>} : memref<8x128xi32, #tpu.memory_space<vmem>>, vector<1x128xi32>,
    %605 = arith.index_cast %c7_i32_316 : i32 to index
    %c0_323 = arith.constant 0 : index
    %606 = vector.load %arg20[%605, %c0_323] : memref<8x128xf32, #tpu.memory_space<vmem>>, vector<1x128xf32>
    %607 = arith.addf %596, %606 : vector<1x128xf32>
    %c8_i32_324 = arith.constant 8 : i32
    %c0_325 = arith.constant 0 : index
    %c0_326 = arith.constant 0 : index
    %608 = vector.load %arg11[%c0_325, %c0_326] : memref<1x128xf32, #tpu.memory_space<vmem>>, vector<1x128xf32>
    %609 = arith.addf %607, %608 : vector<1x128xf32>
    %cst_327 = arith.constant dense<0xFF800000> : vector<1xf32>
    %610 = vector.multi_reduction <maximumf>, %609, %cst_327 [1] : vector<1x128xf32> to vector<1xf32>
    %611 = vector.shape_cast %610 : vector<1xf32> to vector<1x1xf32>
    %612 = vector.broadcast %611 : vector<1x1xf32> to vector<1x128xf32>
    %613 = arith.cmpf oeq, %609, %612 : vector<1x128xf32>
    %c128_i32 = arith.constant 128 : i32
    %614 = vector.broadcast %c128_i32 : i32 to vector<1x128xi32>
    %615 = arith.select %613, %450, %614 : vector<1x128xi1>, vector<1x128xi32>
    %cst_328 = arith.constant dense<2147483647> : vector<1xi32>
    %616 = vector.multi_reduction <minsi>, %615, %cst_328 [1] : vector<1x128xi32> to vector<1xi32>
    %617 = vector.shape_cast %616 : vector<1xi32> to vector<1x1xi32>
    %c7_i32_329 = arith.constant 7 : i32
    %618 = vector.broadcast %c7_i32_329 : i32 to vector<1x128xi32>
    %619 = arith.cmpi eq, %450, %618 : vector<1x128xi32>
    %c0_i32_330 = arith.constant 0 : i32
    %620 = vector.broadcast %c0_i32_330 : i32 to vector<1x128xi32>
    %621 = vector.shape_cast %617 : vector<1x1xi32> to vector<1x1xi32>
    %622 = vector.broadcast %621 : vector<1x1xi32> to vector<1x128xi32>
    %623 = arith.select %619, %622, %620 : vector<1x128xi1>, vector<1x128xi32>
    %c0_i32_331 = arith.constant 0 : i32
    %c7_i32_332 = arith.constant 7 : i32
    %624 = arith.subi %c7_i32_332, %c0_i32_331 : i32
    %625 = arith.index_cast %624 : i32 to index
    %c0_333 = arith.constant 0 : index
    %626 = vector.load %arg21[%625, %c0_333] : memref<8x128xi32, #tpu.memory_space<vmem>>, vector<1x128xi32>
    %627 = vector.broadcast %617 : vector<1x1xi32> to vector<1x128xi32>
    %628 = arith.cmpi eq, %450, %627 : vector<1x128xi32>
    %c-1_i32 = arith.constant -1 : i32
    %629 = vector.broadcast %c-1_i32 : i32 to vector<1x128xi32>
    %630 = arith.select %628, %626, %629 : vector<1x128xi1>, vector<1x128xi32>
    %cst_334 = arith.constant dense<-2147483648> : vector<1xi32>
    %631 = vector.multi_reduction <maxsi>, %630, %cst_334 [1] : vector<1x128xi32> to vector<1xi32>
    %632 = vector.shape_cast %631 : vector<1xi32> to vector<1x1xi32>
    %c1_i32_335 = arith.constant 1 : i32
    %633 = arith.subi %624, %c1_i32_335 : i32
    %634 = vector.broadcast %633 : i32 to vector<1x128xi32>
    %635 = arith.cmpi eq, %450, %634 : vector<1x128xi32>
    %636 = vector.shape_cast %632 : vector<1x1xi32> to vector<1x1xi32>
    %637 = vector.broadcast %636 : vector<1x1xi32> to vector<1x128xi32>
    %638 = arith.select %635, %637, %623 : vector<1x128xi1>, vector<1x128xi32>
    %c1_i32_336 = arith.constant 1 : i32
    %c7_i32_337 = arith.constant 7 : i32
    %639 = arith.subi %c7_i32_337, %c1_i32_336 : i32
    %640 = arith.index_cast %639 : i32 to index
    %c0_338 = arith.constant 0 : index
    %641 = vector.load %arg21[%640, %c0_338] : memref<8x128xi32, #tpu.memory_space<vmem>>, vector<1x128xi32>
    %642 = vector.broadcast %632 : vector<1x1xi32> to vector<1x128xi32>
    %643 = arith.cmpi eq, %450, %642 : vector<1x128xi32>
    %c-1_i32_339 = arith.constant -1 : i32
    %644 = vector.broadcast %c-1_i32_339 : i32 to vector<1x128xi32>
    %645 = arith.select %643, %641, %644 : vector<1x128xi1>, vector<1x128xi32>
    %cst_340 = arith.constant dense<-2147483648> : vector<1xi32>
    %646 = vector.multi_reduction <maxsi>, %645, %cst_340 [1] : vector<1x128xi32> to vector<1xi32>
    %647 = vector.shape_cast %646 : vector<1xi32> to vector<1x1xi32>
    %c1_i32_341 = arith.constant 1 : i32
    %648 = arith.subi %639, %c1_i32_341 : i32
    %649 = vector.broadcast %648 : i32 to vector<1x128xi32>
    %650 = arith.cmpi eq, %450, %649 : vector<1x128xi32>
    %651 = vector.shape_cast %647 : vector<1x1xi32> to vector<1x1xi32>
    %652 = vector.broadcast %651 : vector<1x1xi32> to vector<1x128xi32>
    %653 = arith.select %650, %652, %638 : vector<1x128xi1>, vector<1x128xi32>
    %c2_i32_342 = arith.constant 2 : i32
    %c7_i32_343 = arith.constant 7 : i32
    %654 = arith.subi %c7_i32_343, %c2_i32_342 : i32
    %655 = arith.index_cast %654 : i32 to index
    %c0_344 = arith.constant 0 : index
    %656 = vector.load %arg21[%655, %c0_344] : memref<8x128xi32, #tpu.memory_space<vmem>>, vector<1x128xi32>
    %657 = vector.broadcast %647 : vector<1x1xi32> to vector<1x128xi32>
    %658 = arith.cmpi eq, %450, %657 : vector<1x128xi32>
    %c-1_i32_345 = arith.constant -1 : i32
    %659 = vector.broadcast %c-1_i32_345 : i32 to vector<1x128xi32>
    %660 = arith.select %658, %656, %659 : vector<1x128xi1>, vector<1x128xi32>
    %cst_346 = arith.constant dense<-2147483648> : vector<1xi32>
    %661 = vector.multi_reduction <maxsi>, %660, %cst_346 [1] : vector<1x128xi32> to vector<1xi32>
    %662 = vector.shape_cast %661 : vector<1xi32> to vector<1x1xi32>
    %c1_i32_347 = arith.constant 1 : i32
    %663 = arith.subi %654, %c1_i32_347 : i32
    %664 = vector.broadcast %663 : i32 to vector<1x128xi32>
    %665 = arith.cmpi eq, %450, %664 : vector<1x128xi32>
    %666 = vector.shape_cast %662 : vector<1x1xi32> to vector<1x1xi32>
    %667 = vector.broadcast %666 : vector<1x1xi32> to vector<1x128xi32>
    %668 = arith.select %665, %667, %653 : vector<1x128xi1>, vector<1x128xi32>
    %c3_i32_348 = arith.constant 3 : i32
    %c7_i32_349 = arith.constant 7 : i32
    %669 = arith.subi %c7_i32_349, %c3_i32_348 : i32
    %670 = arith.index_cast %669 : i32 to index
    %c0_350 = arith.constant 0 : index
    %671 = vector.load %arg21[%670, %c0_350] : memref<8x128xi32, #tpu.memory_space<vmem>>, vector<1x128xi32>
    %672 = vector.broadcast %662 : vector<1x1xi32> to vector<1x128xi32>
    %673 = arith.cmpi eq, %450, %672 : vector<1x128xi32>
    %c-1_i32_351 = arith.constant -1 : i32
    %674 = vector.broadcast %c-1_i32_351 : i32 to vector<1x128xi32>
    %675 = arith.select %673, %671, %674 : vector<1x128xi1>, vector<1x128xi32>
    %cst_352 = arith.constant dense<-2147483648> : vector<1xi32>
    %676 = vector.multi_reduction <maxsi>, %675, %cst_352 [1] : vector<1x128xi32> to vector<1xi32>
    %677 = vector.shape_cast %676 : vector<1xi32> to vector<1x1xi32>
    %c1_i32_353 = arith.constant 1 : i32
    %678 = arith.subi %669, %c1_i32_353 : i32
    %679 = vector.broadcast %678 : i32 to vector<1x128xi32>
    %680 = arith.cmpi eq, %450, %679 : vector<1x128xi32>
    %681 = vector.shape_cast %677 : vector<1x1xi32> to vector<1x1xi32>
    %682 = vector.broadcast %681 : vector<1x1xi32> to vector<1x128xi32>
    %683 = arith.select %680, %682, %668 : vector<1x128xi1>, vector<1x128xi32>
    %c4_i32_354 = arith.constant 4 : i32
    %c7_i32_355 = arith.constant 7 : i32
    %684 = arith.subi %c7_i32_355, %c4_i32_354 : i32
    %685 = arith.index_cast %684 : i32 to index
    %c0_356 = arith.constant 0 : index
    %686 = vector.load %arg21[%685, %c0_356] : memref<8x128xi32, #tpu.memory_space<vmem>>, vector<1x128xi32>
    %687 = vector.broadcast %677 : vector<1x1xi32> to vector<1x128xi32>
    %688 = arith.cmpi eq, %450, %687 : vector<1x128xi32>
    %c-1_i32_357 = arith.constant -1 : i32
    %689 = vector.broadcast %c-1_i32_357 : i32 to vector<1x128xi32>
    %690 = arith.select %688, %686, %689 : vector<1x128xi1>, vector<1x128xi32>
    %cst_358 = arith.constant dense<-2147483648> : vector<1xi32>
    %691 = vector.multi_reduction <maxsi>, %690, %cst_358 [1] : vector<1x128xi32> to vector<1xi32>
    %692 = vector.shape_cast %691 : vector<1xi32> to vector<1x1xi32>
    %c1_i32_359 = arith.constant 1 : i32
    %693 = arith.subi %684, %c1_i32_359 : i32
    %694 = vector.broadcast %693 : i32 to vector<1x128xi32>
    %695 = arith.cmpi eq, %450, %694 : vector<1x128xi32>
    %696 = vector.shape_cast %692 : vector<1x1xi32> to vector<1x1xi32>
    %697 = vector.broadcast %696 : vector<1x1xi32> to vector<1x128xi32>
    %698 = arith.select %695, %697, %683 : vector<1x128xi1>, vector<1x128xi32>
    %c5_i32_360 = arith.constant 5 : i32
    %c7_i32_361 = arith.constant 7 : i32
    %699 = arith.subi %c7_i32_361, %c5_i32_360 : i32
    %700 = arith.index_cast %699 : i32 to index
    %c0_362 = arith.constant 0 : index
    %701 = vector.load %arg21[%700, %c0_362] : memref<8x128xi32, #tpu.memory_space<vmem>>, vector<1x128xi32>
    %702 = vector.broadcast %692 : vector<1x1xi32> to vector<1x128xi32>
    %703 = arith.cmpi eq, %450, %702 : vector<1x128xi32>
    %c-1_i32_363 = arith.constant -1 : i32
    %704 = vector.broadcast %c-1_i32_363 : i32 to vector<1x128xi32>
    %705 = arith.select %703, %701, %704 : vector<1x128xi1>, vector<1x128xi32>
    %cst_364 = arith.constant dense<-2147483648> : vector<1xi32>
    %706 = vector.multi_reduction <maxsi>, %705, %cst_364 [1] : vector<1x128xi32> to vector<1xi32>
    %707 = vector.shape_cast %706 : vector<1xi32> to vector<1x1xi32>
    %c1_i32_365 = arith.constant 1 : i32
    %708 = arith.subi %699, %c1_i32_365 : i32
    %709 = vector.broadcast %708 : i32 to vector<1x128xi32>
    %710 = arith.cmpi eq, %450, %709 : vector<1x128xi32>
    %711 = vector.shape_cast %707 : vector<1x1xi32> to vector<1x1xi32>
    %712 = vector.broadcast %711 : vector<1x1xi32> to vector<1x128xi32>
    %713 = arith.select %710, %712, %698 : vector<1x128xi1>, vector<1x128xi32>
    %c6_i32_366 = arith.constant 6 : i32
    %c7_i32_367 = arith.constant 7 : i32
    %714 = arith.subi %c7_i32_367, %c6_i32_366 : i32
    %715 = arith.index_cast %714 : i32 to index
    %c0_368 = arith.constant 0 : index
    %716 = vector.load %arg21[%715, %c0_368] : memref<8x128xi32, #tpu.memory_space<vmem>>, vector<1x128xi32>
    %717 = vector.broadcast %707 : vector<1x1xi32> to vector<1x128xi32>
    %718 = arith.cmpi eq, %450, %717 : vector<1x128xi32>
    %c-1_i32_369 = arith.constant -1 : i32
    %719 = vector.broadcast %c-1_i32_369 : i32 to vector<1x128xi32>
    %720 = arith.select %718, %716, %719 : vector<1x128xi1>, vector<1x128xi32>
    %cst_370 = arith.constant dense<-2147483648> : vector<1xi32>
    %721 = vector.multi_reduction <maxsi>, %720, %cst_370 [1] : vector<1x128xi32> to vector<1xi32>
    %722 = vector.shape_cast %721 : vector<1xi32> to vector<1x1xi32>
    %c1_i32_371 = arith.constant 1 : i32
    %723 = arith.subi %714, %c1_i32_371 : i32
    %724 = vector.broadcast %723 : i32 to vector<1x128xi32>
    %725 = arith.cmpi eq, %450, %724 : vector<1x128xi32>
    %726 = vector.shape_cast %722 : vector<1x1xi32> to vector<1x1xi32>
    %727 = vector.broadcast %726 : vector<1x1xi32> to vector<1x128xi32>
    %728 = arith.select %725, %727, %713 : vector<1x128xi1>, vector<1x128xi32>
    %c7_i32_372 = arith.constant 7 : i32
    %c0_373 = arith.constant 0 : index
    %c0_374 = arith.constant 0 : index
    %729 = vector.load %arg12[%c0_373, %c0_374] : memref<1x1xf32, #tpu.memory_space<vmem>>, vector<1x1xf32>
    tpu.vector_store %arg12[%c0_373, %c0_374], %611 {strides = array<i32>} : memref<1x1xf32, #tpu.memory_space<vmem>>, vector<1x1xf32>,
    %c0_375 = arith.constant 0 : index
    %c0_376 = arith.constant 0 : index
    %730 = vector.load %arg13[%c0_375, %c0_376] : memref<1x128xi32, #tpu.memory_space<vmem>>, vector<1x128xi32>
    tpu.vector_store %arg13[%c0_375, %c0_376], %728 {strides = array<i32>} : memref<1x128xi32, #tpu.memory_space<vmem>>, vector<1x128xi32>,
    return
  }
}

</mosaic_0001>

<bundles_post_ra>
// kernel: bilstm_crf_forward.1
= control target key start
LH: loop header
LB: loop body
LE: loop exit
PB: predicated region body
PF: predicated region fallthrough
CT: control target
= control target key end

     0   :  { %19 = vsyncpa [#allocation13], 0  ;;  %s4455_s0 = inlined_call_operand.hbm [shape: s32[8], index: 0, kind: input, shape index: {}]   ;;  %s4456_s1 = inlined_call_operand.hbm [shape: f32[20,32], index: 1, kind: input, shape index: {}]   ;;  %s4457_s2 = inlined_call_operand.hbm [shape: f32[32,512], index: 2, kind: input, shape index: {}]   ;;  %s4458_s3 = inlined_call_operand.hbm [shape: f32[32,512], index: 3, kind: input, shape index: {}]   ;;  %s4459_s4 = inlined_call_operand.hbm [shape: f32[1,512], index: 4, kind: input, shape index: {}]   ;;  %s4460_s5 = inlined_call_operand.hbm [shape: f32[32,512], index: 5, kind: input, shape index: {}]   ;;  %s4461_s6 = inlined_call_operand.vmem [shape: f32[1,128], index: 6, kind: input, shape index: {}]   ;;  %s4462_s7 = inlined_call_operand.vmem [shape: f32[1,128], index: 7, kind: input, shape index: {}]   ;;  %s4463_s8 = inlined_call_operand.hbm [shape: f32[32,128], index: 8, kind: input, shape index: {}]   ;;  %s4464_s9 = inlined_call_operand.hbm [shape: f32[1,128], index: 9, kind: input, shape index: {}]   ;;  %s4465_s10 = inlined_call_operand.hbm [shape: f32[16,128], index: 10, kind: input, shape index: {}]   ;;  %s4466_s11 = inlined_call_operand.vmem [shape: f32[1,128], index: 11, kind: input, shape index: {}]   ;;  %s4467_s12 = inlined_call_operand.hbm [shape: f32[1,1], index: 12, kind: output, shape index: {0}]   ;;  %s4468_s13 = inlined_call_operand.vmem [shape: s32[1,128], index: 13, kind: output, shape index: {1}]  }
   0x1   :  { %20 = vsyncpa [#allocation11], 0 }
   0x2   :  { %21 = vsyncpa [#allocation16], 0 }
   0x3   :  { %22 = vsyncpa [#allocation19], 0 }
   0x4   :  { %23 = vsyncpa [#allocation22], 0 }
   0x5   :  { %24 = vsyncpa [#allocation12], 0  ;;  %s51_s27 = sshll.u32 %s4458_s3, 4  ;;  %s3715_s28 = smov [#allocation15]   ;;  %s52_s27 = int_to_ptr.hbm [resolvable:$true] %s51_s27 }
   0x6   :  { %s53_s29 = sshll.u32 %s3715_s28, 4  ;;  %s75_s15 = sshll.u32 %s4460_s5, 4  ;;  %s54_s29 = int_to_ptr.vmem [resolvable:$true] %s53_s29  ;;  %s76_s15 = int_to_ptr.hbm [resolvable:$true] %s75_s15 }
   0x7   :  { %s3716_s16 = smov 512   ;;  %s3717_s17 = smov 32  }
   0x8   :  { %59 = dma.hbm_to_vmem [thread:$0]  %s52_s27, 2048, %s54_s29, [#allocation16], %s3716_s16, %s3716_s16, %s3717_s17  }
   0x9   :  { %s3718_s18 = smov [#allocation18]   ;;  %s106_s22 = sshll.u32 %s4464_s9, 4  ;;  %s107_s22 = int_to_ptr.hbm [resolvable:$true] %s106_s22 }
   0xa   :  { %s77_s19 = sshll.u32 %s3718_s18, 4  ;;  %s30_s24 = sshll.u32 %s4455_s0, 4  ;;  %s78_s19 = int_to_ptr.vmem [resolvable:$true] %s77_s19  ;;  %s31_s24 = int_to_ptr.hbm [resolvable:$true] %s30_s24 }
   0xb   :  { %83 = dma.hbm_to_vmem [thread:$0]  %s76_s15, 2048, %s78_s19, [#allocation19], %s3716_s16, %s3716_s16, %s3717_s17  }
   0xc   :  { %s3719_s25 = smov [#allocation21]   ;;  %s3720_s5 = smov [#allocation10]  }
   0xd   :  { %s108_s26 = sshll.u32 %s3719_s25, 4  ;;  %s38_s29 = sshll.u32 %s4457_s2, 4  ;;  %s109_s26 = int_to_ptr.vmem [resolvable:$true] %s108_s26  ;;  %s39_s29 = int_to_ptr.hbm [resolvable:$true] %s38_s29 }
   0xe   :  { %111 = dma.hbm_to_vmem [thread:$0]  %s107_s22, 16, %s109_s26, [#allocation22]  }
   0xf   :  { %33 = dma.hbm_to_smem %s31_s24, 16, %s3720_s5, [#allocation13]  }
  0x10   :  { %s3721_s9 = smov [#allocation14]   ;;  %s65_s18 = sshll.u32 %s4459_s4, 4  ;;  %s66_s18 = int_to_ptr.hbm [resolvable:$true] %s65_s18 }
  0x11   :  { %s40_s30 = sshll.u32 %s3721_s9, 4  ;;  %s3722_s0 = smov [#allocation17]   ;;  %s41_s30 = int_to_ptr.vmem [resolvable:$true] %s40_s30 }
  0x12   :  { %46 = dma.hbm_to_vmem [thread:$0]  %s39_s29, 2048, %s41_s30, [#allocation11], %s3716_s16, %s3716_s16, %s3717_s17  }
  0x13   :  { %s67_s19 = sshll.u32 %s3722_s0, 4  ;;  %s92_s22 = sshll.u32 %s4463_s8, 4  ;;  %s68_s19 = int_to_ptr.vmem [resolvable:$true] %s67_s19  ;;  %s93_s22 = int_to_ptr.hbm [resolvable:$true] %s92_s22 }
  0x14   :  { %70 = dma.hbm_to_vmem [thread:$0]  %s66_s18, 64, %s68_s19, [#allocation16]  }
  0x15   :  { %s3723_s2 = smov [#allocation20]   ;;  %s116_s25 = sshll.u32 %s4465_s10, 4  ;;  %s117_s25 = int_to_ptr.hbm [resolvable:$true] %s116_s25 }
  0x16   :  { %s94_s3 = sshll.u32 %s3723_s2, 4  ;;  %s3724_s26 = smov 128   ;;  %s95_s3 = int_to_ptr.vmem [resolvable:$true] %s94_s3 }
  0x17   :  { %s3725_s4 = smov 8   ;;  %s3726_s16 = smov [#allocation23]  }
  0x18   :  { %100 = dma.hbm_to_vmem [thread:$0]  %s93_s22, 512, %s95_s3, [#allocation19], %s3724_s26, %s3724_s26, %s3725_s4  }
  0x19   :  { %s118_s17 = sshll.u32 %s3726_s16, 4  ;;  %s119_s17 = int_to_ptr.vmem [resolvable:$true] %s118_s17 }
  0x1a   :  { %124 = dma.hbm_to_vmem [thread:$0]  %s117_s25, 256, %s119_s17, [#allocation22], %s3724_s26, %s3724_s26, %s3725_s4  }
  0x1b   :  { %3671 = dma.done.wait [#allocation13], 16  }
  0x1c   :  { %3672 = vsyncadd [#allocation13], 4294967280 }
  0x1d   :  { %3673 = dma.done.wait [#allocation11], 2048  }
  0x1e   :  { %3674 = vsyncadd [#allocation11], 4294965248 }
  0x1f   :  { %3675 = dma.done.wait [#allocation16], 2112  }
  0x20   :  { %3676 = vsyncadd [#allocation16], 4294965184 }
  0x21   :  { %3677 = dma.done.wait [#allocation19], 2560  }
  0x22   :  { %3678 = vsyncadd [#allocation19], 4294964736 }
  0x23   :  { %3679 = dma.done.wait [#allocation22], 272  }
  0x24   :  { %3680 = vsyncadd [#allocation22], 4294967024 }
  0x25   :  { %159 = sfence }
  0x26   :  { %s160_s8 = sld [smem:[#allocation10]]  ;;  %s3727_s10 = smov [#allocation2]  }
  0x27   :  { %s171_s5 = sshll.u32 %s3727_s10, 4  ;;  %s3728_s27 = smov [#allocation3 + $0x7]   ;;  %s172_s5 = int_to_ptr.vmem [resolvable:$true] %s171_s5 }
  0x28   :  { %s186_s28 = sshll.u32 %s3728_s27, 4  ;;  %s2803_s29 = sld [smem:[#allocation10 + $0x1]]  ;;  %s187_s28 = int_to_ptr.vmem [resolvable:$true] %s186_s28 }
  0x29   :  { %s3729_s9 = smov [#allocation2 + $0x1]   ;;  %s3730_s14 = smov [#allocation3 + $0x6]  }
  0x2a   :  { %s3840_s30 = sshll.u32 %s3729_s9, 4  ;;  %s3842_s15 = sshll.u32 %s3730_s14, 4  ;;  %s204_s30 = int_to_ptr.vmem [resolvable:$true] %s3840_s30  ;;  %s219_s15 = int_to_ptr.vmem [resolvable:$true] %s3842_s15 }
  0x2b   :  { %s3849_s21 = sld [smem:[#allocation10 + $0x2]]  ;;  %s3854_s24 = scalar_lea.hbm %s4456_s1, 24 }
  0x2c   :  { %s161_s19 = scalar_lea.hbm %s4456_s1, %s160_s8 }
  0x2d   :  { %s169_s20 = sshll.u32 %s161_s19, 4  ;;  %s170_s20 = int_to_ptr.hbm [resolvable:$true] %s169_s20 }
  0x2e   :  { %s3263_s22 = sshra.s32 %s170_s20, 4  ;;  %s3264_s22 = int_to_ptr.hbm [resolvable:$true] %s3263_s22 }
  0x2f   :  { %s3265_s2 = scalar_lea.hbm %s3264_s22, 1  ;;  %p3268_p1 = scmp.lt.s32.totalorder %s3264_s22, %s4456_s1 }
  0x30   :  { %p3266_p0 = scmp.ne.s32.totalorder %s3264_s22, %s3265_s2  ;;  %p3269_p2 = scmp.lt.s32.totalorder %s3854_s24, %s3265_s2 }
  0x32   :  { %p3270_p3 = por %p3269_p2, %p3268_p1 }
  0x34   :  { %p3271_p4 = pnand %p3270_p3, %p3266_p0 }
  0x36   :  { %3274 = shalt.err (!%p3271_p4)  }
  0x37   :  { %174 = dma.hbm_to_vmem [thread:$0]  %s170_s20, 16, %s172_s5, [#allocation4] }
  0x38   :  { %3298 = shalt.err (!%p3271_p4)  }
  0x39   :  { %189 = dma.hbm_to_vmem [thread:$0]  %s170_s20, 16, %s187_s28, [#allocation4 + $0x8] }
  0x3a   :  { %s191_s17 = scalar_lea.hbm %s4456_s1, %s2803_s29  ;;  %s3731_s10 = smov [#allocation2 + $0x2]  }
  0x3b   :  { %s201_s8 = sshll.u32 %s191_s17, 4  ;;  %s3863_s27 = sshll.u32 %s3731_s10, 4  ;;  %s202_s8 = int_to_ptr.hbm [resolvable:$true] %s201_s8  ;;  %s236_s27 = int_to_ptr.vmem [resolvable:$true] %s3863_s27 }
  0x3c   :  { %s3311_s9 = sshra.s32 %s202_s8, 4  ;;  %s3312_s9 = int_to_ptr.hbm [resolvable:$true] %s3311_s9 }
  0x3d   :  { %s3313_s14 = scalar_lea.hbm %s3312_s9, 1  ;;  %p3316_p6 = scmp.lt.s32.totalorder %s3312_s9, %s4456_s1 }
  0x3e   :  { %p3314_p5 = scmp.ne.s32.totalorder %s3312_s9, %s3313_s14  ;;  %p3317_p7 = scmp.lt.s32.totalorder %s3854_s24, %s3313_s14 }
  0x40   :  { %p3318_p8 = por %p3317_p7, %p3316_p6 }
  0x42   :  { %p3319_p9 = pnand %p3318_p8, %p3314_p5 }
  0x44   :  { %3322 = shalt.err (!%p3319_p9)  }
  0x45   :  { %206 = dma.hbm_to_vmem [thread:$0]  %s202_s8, 16, %s204_s30, [#allocation4 + $0x1] }
  0x46   :  { %3346 = shalt.err (!%p3319_p9)  }
  0x47   :  { %221 = dma.hbm_to_vmem [thread:$0]  %s202_s8, 16, %s219_s15, [#allocation4 + $0x9] }
  0x48   :  { %s223_s0 = scalar_lea.hbm %s4456_s1, %s3849_s21  ;;  %s3732_s20 = smov [#allocation3 + $0x5]  }
  0x49   :  { %s233_s19 = sshll.u32 %s223_s0, 4  ;;  %s250_s22 = sshll.u32 %s3732_s20, 4  ;;  %s234_s19 = int_to_ptr.hbm [resolvable:$true] %s233_s19  ;;  %s251_s22 = int_to_ptr.vmem [resolvable:$true] %s250_s22 }
  0x4a   :  { %s3359_s2 = sshra.s32 %s234_s19, 4  ;;  %s3360_s2 = int_to_ptr.hbm [resolvable:$true] %s3359_s2 }
  0x4b   :  { %s3361_s3 = scalar_lea.hbm %s3360_s2, 1  ;;  %p3364_p11 = scmp.lt.s32.totalorder %s3360_s2, %s4456_s1 }
  0x4c   :  { %p3362_p10 = scmp.ne.s32.totalorder %s3360_s2, %s3361_s3  ;;  %p3365_p12 = scmp.lt.s32.totalorder %s3854_s24, %s3361_s3 }
  0x4e   :  { %p3366_p13 = por %p3365_p12, %p3364_p11 }
  0x50   :  { %p3367_p0 = pnand %p3366_p13, %p3362_p10 }
  0x52   :  { %3370 = shalt.err (!%p3367_p0)  }
  0x53   :  { %238 = dma.hbm_to_vmem [thread:$0]  %s234_s19, 16, %s236_s27, [#allocation4 + $0x2] }
  0x54   :  { %3394 = shalt.err (!%p3367_p0)  }
  0x55   :  { %253 = dma.hbm_to_vmem [thread:$0]  %s234_s19, 16, %s251_s22, [#allocation4 + $0xa] }
  0x56   :  { %s2805_s15 = sld [smem:[#allocation10 + $0x3]]  ;;  %s3733_s21 = smov [#allocation2 + $0x3]  }
  0x57   :  { %s267_s25 = sshll.u32 %s3733_s21, 4  ;;  %s3734_s26 = smov [#allocation3 + $0x4]   ;;  %s268_s25 = int_to_ptr.vmem [resolvable:$true] %s267_s25 }
  0x58   :  { %s282_s4 = sshll.u32 %s3734_s26, 4  ;;  %s2806_s16 = sld [smem:[#allocation10 + $0x4]]  ;;  %s283_s4 = int_to_ptr.vmem [resolvable:$true] %s282_s4 }
  0x59   :  { %s3735_s17 = smov [#allocation2 + $0x4]   ;;  %s3736_s10 = smov [#allocation3 + $0x3]  }
  0x5a   :  { %s3882_s8 = sshll.u32 %s3735_s17, 4  ;;  %s3884_s9 = sshll.u32 %s3736_s10, 4  ;;  %s300_s8 = int_to_ptr.vmem [resolvable:$true] %s3882_s8  ;;  %s315_s9 = int_to_ptr.vmem [resolvable:$true] %s3884_s9 }
  0x5b   :  { %s3891_s28 = sld [smem:[#allocation10 + $0x5]] }
  0x5c   :  { %s255_s18 = scalar_lea.hbm %s4456_s1, %s2805_s15 }
  0x5d   :  { %s265_s5 = sshll.u32 %s255_s18, 4  ;;  %s266_s5 = int_to_ptr.hbm [resolvable:$true] %s265_s5 }
  0x5e   :  { %s3407_s29 = sshra.s32 %s266_s5, 4  ;;  %s3408_s29 = int_to_ptr.hbm [resolvable:$true] %s3407_s29 }
  0x5f   :  { %s3409_s0 = scalar_lea.hbm %s3408_s29, 1  ;;  %p3412_p2 = scmp.lt.s32.totalorder %s3408_s29, %s4456_s1 }
  0x60   :  { %p3410_p1 = scmp.ne.s32.totalorder %s3408_s29, %s3409_s0  ;;  %p3413_p3 = scmp.lt.s32.totalorder %s3854_s24, %s3409_s0 }
  0x62   :  { %p3414_p4 = por %p3413_p3, %p3412_p2 }
  0x64   :  { %p3415_p5 = pnand %p3414_p4, %p3410_p1 }
  0x66   :  { %3418 = shalt.err (!%p3415_p5)  }
  0x67   :  { %270 = dma.hbm_to_vmem [thread:$0]  %s266_s5, 16, %s268_s25, [#allocation4 + $0x3] }
  0x68   :  { %3442 = shalt.err (!%p3415_p5)  }
  0x69   :  { %285 = dma.hbm_to_vmem [thread:$0]  %s266_s5, 16, %s283_s4, [#allocation4 + $0xb] }
  0x6a   :  { %s287_s3 = scalar_lea.hbm %s4456_s1, %s2806_s16  ;;  %s3737_s23 = smov [#allocation2 + $0x5]  }
  0x6b   :  { %s297_s30 = sshll.u32 %s287_s3, 4  ;;  %s3900_s15 = sshll.u32 %s3737_s23, 4  ;;  %s298_s30 = int_to_ptr.hbm [resolvable:$true] %s297_s30  ;;  %s332_s15 = int_to_ptr.vmem [resolvable:$true] %s3900_s15 }
  0x6c   :  { %s3455_s21 = sshra.s32 %s298_s30, 4  ;;  %s3456_s21 = int_to_ptr.hbm [resolvable:$true] %s3455_s21 }
  0x6d   :  { %s3457_s26 = scalar_lea.hbm %s3456_s21, 1  ;;  %p3460_p7 = scmp.lt.s32.totalorder %s3456_s21, %s4456_s1 }
  0x6e   :  { %p3458_p6 = scmp.ne.s32.totalorder %s3456_s21, %s3457_s26  ;;  %p3461_p8 = scmp.lt.s32.totalorder %s3854_s24, %s3457_s26 }
  0x70   :  { %p3462_p9 = por %p3461_p8, %p3460_p7 }
  0x72   :  { %p3463_p10 = pnand %p3462_p9, %p3458_p6 }
  0x74   :  { %3466 = shalt.err (!%p3463_p10)  }
  0x75   :  { %302 = dma.hbm_to_vmem [thread:$0]  %s298_s30, 16, %s300_s8, [#allocation4 + $0x4] }
  0x76   :  { %3490 = shalt.err (!%p3463_p10)  }
  0x77   :  { %317 = dma.hbm_to_vmem [thread:$0]  %s298_s30, 16, %s315_s9, [#allocation4 + $0xc] }
  0x78   :  { %s319_s10 = scalar_lea.hbm %s4456_s1, %s3891_s28  ;;  %s3738_s27 = smov [#allocation3 + $0x2]  }
  0x79   :  { %s329_s14 = sshll.u32 %s319_s10, 4  ;;  %s346_s18 = sshll.u32 %s3738_s27, 4  ;;  %s330_s14 = int_to_ptr.hbm [resolvable:$true] %s329_s14  ;;  %s347_s18 = int_to_ptr.vmem [resolvable:$true] %s346_s18 }
  0x7a   :  { %s3503_s5 = sshra.s32 %s330_s14, 4  ;;  %s3504_s5 = int_to_ptr.hbm [resolvable:$true] %s3503_s5 }
  0x7b   :  { %s3505_s29 = scalar_lea.hbm %s3504_s5, 1  ;;  %p3508_p12 = scmp.lt.s32.totalorder %s3504_s5, %s4456_s1 }
  0x7c   :  { %p3506_p11 = scmp.ne.s32.totalorder %s3504_s5, %s3505_s29  ;;  %p3509_p13 = scmp.lt.s32.totalorder %s3854_s24, %s3505_s29 }
  0x7e   :  { %p3510_p0 = por %p3509_p13, %p3508_p12 }
  0x80   :  { %p3511_p1 = pnand %p3510_p0, %p3506_p11 }
  0x82   :  { %3514 = shalt.err (!%p3511_p1)  }
  0x83   :  { %334 = dma.hbm_to_vmem [thread:$0]  %s330_s14, 16, %s332_s15, [#allocation4 + $0x5] }
  0x84   :  { %3538 = shalt.err (!%p3511_p1)  }
  0x85   :  { %349 = dma.hbm_to_vmem [thread:$0]  %s330_s14, 16, %s347_s18, [#allocation4 + $0xd] }
  0x86   :  { %s2808_s9 = sld [smem:[#allocation10 + $0x6]]  ;;  %s3739_s28 = smov [#allocation2 + $0x6]  }
  0x87   :  { %s363_s19 = sshll.u32 %s3739_s28, 4  ;;  %s3740_s20 = smov [#allocation3 + $0x1]   ;;  %s364_s19 = int_to_ptr.vmem [resolvable:$true] %s363_s19 }
  0x88   :  { %s378_s22 = sshll.u32 %s3740_s20, 4  ;;  %s2809_s2 = sld [smem:[#allocation10 + $0x7]]  ;;  %s379_s22 = int_to_ptr.vmem [resolvable:$true] %s378_s22 }
  0x89   :  { %s3741_s26 = smov [#allocation2 + $0x7]   ;;  %s3742_s15 = smov [#allocation3]  }
  0x8a   :  { %s3922_s17 = sshll.u32 %s3741_s26, 4  ;;  %s3924_s25 = sshll.u32 %s3742_s15, 4  ;;  %s396_s17 = int_to_ptr.vmem [resolvable:$true] %s3922_s17  ;;  %s410_s25 = int_to_ptr.vmem [resolvable:$true] %s3924_s25 }
  0x8c   :  { %s351_s23 = scalar_lea.hbm %s4456_s1, %s2808_s9 }
  0x8d   :  { %s361_s21 = sshll.u32 %s351_s23, 4  ;;  %s362_s21 = int_to_ptr.hbm [resolvable:$true] %s361_s21 }
  0x8e   :  { %s3551_s4 = sshra.s32 %s362_s21, 4  ;;  %s3552_s4 = int_to_ptr.hbm [resolvable:$true] %s3551_s4 }
  0x8f   :  { %s3553_s16 = scalar_lea.hbm %s3552_s4, 1  ;;  %p3556_p3 = scmp.lt.s32.totalorder %s3552_s4, %s4456_s1 }
  0x90   :  { %p3554_p2 = scmp.ne.s32.totalorder %s3552_s4, %s3553_s16  ;;  %p3557_p4 = scmp.lt.s32.totalorder %s3854_s24, %s3553_s16 }
  0x92   :  { %p3558_p5 = por %p3557_p4, %p3556_p3 }
  0x94   :  { %p3559_p6 = pnand %p3558_p5, %p3554_p2 }
  0x96   :  { %3562 = shalt.err (!%p3559_p6)  }
  0x97   :  { %366 = dma.hbm_to_vmem [thread:$0]  %s362_s21, 16, %s364_s19, [#allocation4 + $0x6] }
  0x98   :  { %3586 = shalt.err (!%p3559_p6)  }
  0x99   :  { %381 = dma.hbm_to_vmem [thread:$0]  %s362_s21, 16, %s379_s22, [#allocation4 + $0xe] }
  0x9a   :  { %s383_s5 = scalar_lea.hbm %s4456_s1, %s2809_s2 }
  0x9b   :  { %s393_s29 = sshll.u32 %s383_s5, 4  ;;  %s394_s29 = int_to_ptr.hbm [resolvable:$true] %s393_s29 }
  0x9c   :  { %s3599_s8 = sshra.s32 %s394_s29, 4  ;;  %s3600_s8 = int_to_ptr.hbm [resolvable:$true] %s3599_s8 }
  0x9d   :  { %s3601_s0 = scalar_lea.hbm %s3600_s8, 1  ;;  %p3604_p8 = scmp.lt.s32.totalorder %s3600_s8, %s4456_s1 }
  0x9e   :  { %p3602_p7 = scmp.ne.s32.totalorder %s3600_s8, %s3601_s0  ;;  %p3605_p9 = scmp.lt.s32.totalorder %s3854_s24, %s3601_s0 }
  0xa0   :  { %p3606_p10 = por %p3605_p9, %p3604_p8 }
  0xa2   :  { %p3607_p11 = pnand %p3606_p10, %p3602_p7 }
  0xa4   :  { %3610 = shalt.err (!%p3607_p11)  }
  0xa5   :  { %398 = dma.hbm_to_vmem [thread:$0]  %s394_s29, 16, %s396_s17, [#allocation4 + $0x7] }
  0xa6   :  { %3634 = shalt.err (!%p3607_p11)  }
  0xa7   :  { %412 = dma.hbm_to_vmem [thread:$0]  %s394_s29, 16, %s410_s25, [#allocation4 + $0xf] }
  0xa8   :  { %3681 = dma.done.wait [#allocation4], 16 }
  0xa9   :  { %3682 = vsyncadd [#allocation4], 4294967280 }
  0xaa   :  { %3683 = dma.done.wait [#allocation4 + $0x8], 16 }
  0xab   :  { %3684 = vsyncadd [#allocation4 + $0x8], 4294967280 }
  0xac   :  { %3685 = dma.done.wait [#allocation4 + $0x1], 16 }
  0xad   :  { %3686 = vsyncadd [#allocation4 + $0x1], 4294967280 }
  0xae   :  { %3687 = dma.done.wait [#allocation4 + $0x9], 16 }
  0xaf   :  { %3688 = vsyncadd [#allocation4 + $0x9], 4294967280 }
  0xb0   :  { %3689 = dma.done.wait [#allocation4 + $0x2], 16 }
  0xb1   :  { %3690 = vsyncadd [#allocation4 + $0x2], 4294967280 }
  0xb2   :  { %3691 = dma.done.wait [#allocation4 + $0xa], 16 }
  0xb3   :  { %3692 = vsyncadd [#allocation4 + $0xa], 4294967280 }
  0xb4   :  { %3693 = dma.done.wait [#allocation4 + $0x3], 16 }
  0xb5   :  { %3694 = vsyncadd [#allocation4 + $0x3], 4294967280 }
  0xb6   :  { %3695 = dma.done.wait [#allocation4 + $0xb], 16 }
  0xb7   :  { %3696 = vsyncadd [#allocation4 + $0xb], 4294967280 }
  0xb8   :  { %3697 = dma.done.wait [#allocation4 + $0x4], 16 }
  0xb9   :  { %3698 = vsyncadd [#allocation4 + $0x4], 4294967280 }
  0xba   :  { %3699 = dma.done.wait [#allocation4 + $0xc], 16 }
  0xbb   :  { %3700 = vsyncadd [#allocation4 + $0xc], 4294967280 }
  0xbc   :  { %3701 = dma.done.wait [#allocation4 + $0x5], 16 }
  0xbd   :  { %3702 = vsyncadd [#allocation4 + $0x5], 4294967280 }
  0xbe   :  { %3703 = dma.done.wait [#allocation4 + $0xd], 16 }
  0xbf   :  { %3704 = vsyncadd [#allocation4 + $0xd], 4294967280 }
  0xc0   :  { %3705 = dma.done.wait [#allocation4 + $0x6], 16 }
  0xc1   :  { %3706 = vsyncadd [#allocation4 + $0x6], 4294967280 }
  0xc2   :  { %3707 = dma.done.wait [#allocation4 + $0xe], 16 }
  0xc3   :  { %3708 = vsyncadd [#allocation4 + $0xe], 4294967280 }
  0xc4   :  { %3709 = dma.done.wait [#allocation4 + $0x7], 16 }
  0xc5   :  { %3710 = vsyncadd [#allocation4 + $0x7], 4294967280 }
  0xc6   :  { %3711 = dma.done.wait [#allocation4 + $0xf], 16 }
  0xc7   :  { %3712 = vsyncadd [#allocation4 + $0xf], 4294967280  ;;  %v476_v0 = vld [vmem:[#allocation15 + $0x60] sm:$0xff]  ;;  %v477_v1 = vld [vmem:[#allocation15 + $0x68] sm:$0xff]  ;;  %vm480_vm0 = vcmask 261120   ;;  %vm774_vm1 = vcmask 1040384  }
  0xc8   :  { %v478_v2 = vld [vmem:[#allocation15 + $0x70] sm:$0xff]  ;;  %496 = vmatpush.msra.mxu0 %v476_v0  ;;  %516 = vmatpush.msra.mxu1 %v477_v1  ;;  %v479_v3 = vld [vmem:[#allocation15 + $0x78] sm:$0xff]  ;;  %v472_v4 = vld [vmem:[#allocation15 + $0x40] sm:$0xff]  ;;  %vm776_vm2 = vcmask 1042434   ;;  %vm778_vm3 = vcmask 1041408   ;;  %s2666_s30 = sshll.u32 %s4467_s12, 4  ;;  %s2667_s30 = int_to_ptr.hbm [resolvable:$true] %s2666_s30 }
  0xc9   :  { %v473_v5 = vld [vmem:[#allocation15 + $0x48] sm:$0xff]  ;;  %536 = vmatpush.msra.mxu2 %v478_v2  ;;  %556 = vmatpush.msra.mxu3 %v479_v3  ;;  %v474_v6 = vld [vmem:[#allocation15 + $0x50] sm:$0xff]  ;;  %v475_v7 = vld [vmem:[#allocation15 + $0x58] sm:$0xff] }
  0xca   :  { %v468_v8 = vld [vmem:[#allocation15 + $0x20] sm:$0xff]  ;;  %497 = vmatpush.msra.mxu0 %v472_v4  ;;  %517 = vmatpush.msra.mxu1 %v473_v5  ;;  %v469_v9 = vld [vmem:[#allocation15 + $0x28] sm:$0xff]  ;;  %v470_v10 = vld [vmem:[#allocation15 + $0x30] sm:$0xff] }
  0xcb   :  { %v471_v11 = vld [vmem:[#allocation15 + $0x38] sm:$0xff]  ;;  %537 = vmatpush.msra.mxu2 %v474_v6  ;;  %557 = vmatpush.msra.mxu3 %v475_v7  ;;  %v464_v12 = vld [vmem:[#allocation15] sm:$0xff]  ;;  %v465_v13 = vld [vmem:[#allocation15 + $0x8] sm:$0xff] }
  0xcc   :  { %498 = vmatpush.msra.mxu0 %v468_v8  ;;  %518 = vmatpush.msra.mxu1 %v469_v9  ;;  %v466_v14 = vld [vmem:[#allocation15 + $0x10] sm:$0xff]  ;;  %v467_v15 = vld [vmem:[#allocation15 + $0x18] sm:$0xff]  ;;  %v459_v19 = vld [vmem:[#allocation14 + $0x60] sm:$0xff] }
  0xcd   :  { %538 = vmatpush.msra.mxu2 %v470_v10  ;;  %558 = vmatpush.msra.mxu3 %v471_v11  ;;  %v463_v16 = vld [vmem:[#allocation3] sm:$0xff]  ;;  %v461_v17 = vld [vmem:[#allocation14 + $0x70] sm:$0xff]  ;;  %v460_v20 = vld [vmem:[#allocation14 + $0x68] sm:$0xff] }
  0xce   :  { %499 = vmatpush.msra.mxu0 %v464_v12  ;;  %519 = vmatpush.msra.mxu1 %v465_v13  ;;  %v462_v18 = vld [vmem:[#allocation14 + $0x78] sm:$0xff]  ;;  %v457_v21 = vld [vmem:[#allocation14 + $0x50] sm:$0xff]  ;;  %v455_v23 = vld [vmem:[#allocation14 + $0x40] sm:$0xff] }
  0xcf   :  { %539 = vmatpush.msra.mxu2 %v466_v14  ;;  %559 = vmatpush.msra.mxu3 %v467_v15  ;;  %v458_v22 = vld [vmem:[#allocation14 + $0x58] sm:$0xff]  ;;  %v456_v24 = vld [vmem:[#allocation14 + $0x48] sm:$0xff]  ;;  %v453_v25 = vld [vmem:[#allocation14 + $0x30] sm:$0xff] }
  0xd0   :  { %2810 = vmatmul.msk.f32.vlgmr.msra.gmra.mxu0 %vm480_vm0, %v463_v16  ;;  %2811 = vmatmul.msk.f32.vlgmr.msra.gmra.mxu1 %vm480_vm0, %v463_v16  ;;  %v454_v26 = vld [vmem:[#allocation14 + $0x38] sm:$0xff]  ;;  %v451_v27 = vld [vmem:[#allocation14 + $0x20] sm:$0xff]  ;;  %v452_v28 = vld [vmem:[#allocation14 + $0x28] sm:$0xff] }
  0xd1   :  { %2812 = vmatmul.msk.f32.vlgmr.msra.gmra.mxu2 %vm480_vm0, %v463_v16  ;;  %2813 = vmatmul.msk.f32.vlgmr.msra.gmra.mxu3 %vm480_vm0, %v463_v16  ;;  %v449_v29 = vld [vmem:[#allocation14 + $0x10] sm:$0xff]  ;;  %v450_v30 = vld [vmem:[#allocation14 + $0x18] sm:$0xff]  ;;  %v447_v31 = vld [vmem:[#allocation14] sm:$0xff] }
  0xd2   :  { %619 = vmatpush.msrb.mxu2 %v461_v17  ;;  %639 = vmatpush.msrb.mxu3 %v462_v18  ;;  %v448_v32 = vld [vmem:[#allocation14 + $0x8] sm:$0xff]  ;;  %v446_v33 = vld [vmem:[#allocation2] sm:$0xff]  ;;  %v3945_v35 = vld [vmem:[#allocation18 + $0x78] sm:$0xff] }
  0xd3   :  { %579 = vmatpush.msrb.mxu0 %v459_v19  ;;  %599 = vmatpush.msrb.mxu1 %v460_v20  ;;  %v3943_v34 = vld [vmem:[#allocation18 + $0x70] sm:$0xff]  ;;  %v3949_v36 = vld [vmem:[#allocation18 + $0x68] sm:$0xff]  ;;  %v3951_v37 = vld [vmem:[#allocation18 + $0x60] sm:$0xff] }
  0xd4   :  { %620 = vmatpush.msrb.mxu2 %v457_v21  ;;  %640 = vmatpush.msrb.mxu3 %v458_v22  ;;  %v3955_v38 = vld [vmem:[#allocation18 + $0x50] sm:$0xff]  ;;  %v3957_v39 = vld [vmem:[#allocation18 + $0x58] sm:$0xff]  ;;  %v3961_v40 = vld [vmem:[#allocation18 + $0x48] sm:$0xff] }
  0xd5   :  { %580 = vmatpush.msrb.mxu0 %v455_v23  ;;  %600 = vmatpush.msrb.mxu1 %v456_v24  ;;  %v3963_v41 = vld [vmem:[#allocation18 + $0x40] sm:$0xff]  ;;  %v3965_v42 = vld [vmem:[#allocation18 + $0x30] sm:$0xff]  ;;  %v3967_v43 = vld [vmem:[#allocation18 + $0x38] sm:$0xff] }
  0xd6   :  { %621 = vmatpush.msrb.mxu2 %v453_v25  ;;  %641 = vmatpush.msrb.mxu3 %v454_v26  ;;  %v3973_v44 = vld [vmem:[#allocation18 + $0x28] sm:$0xff]  ;;  %v3975_v45 = vld [vmem:[#allocation18 + $0x20] sm:$0xff]  ;;  %v3977_v46 = vld [vmem:[#allocation18 + $0x10] sm:$0xff] }
  0xd7   :  { %581 = vmatpush.msrb.mxu0 %v451_v27  ;;  %601 = vmatpush.msrb.mxu1 %v452_v28  ;;  %v3979_v47 = vld [vmem:[#allocation18 + $0x18] sm:$0xff]  ;;  %v681_v48 = vld [vmem:[%s4461_s6] sm:$0x1]  ;;  %v3992_v50 = vld [vmem:[#allocation18] sm:$0xff] }
  0xd8   :  { %622 = vmatpush.msrb.mxu2 %v449_v29  ;;  %642 = vmatpush.msrb.mxu3 %v450_v30  ;;  %v3990_v49 = vld [vmem:[#allocation18 + $0x8] sm:$0xff]  ;;  %v647_v53 = vld [vmem:[#allocation17] sm:$0xf] }
  0xd9   :  { %582 = vmatpush.msrb.mxu0 %v447_v31  ;;  %602 = vmatpush.msrb.mxu1 %v448_v32  ;;  %v649_v56 = vperm.slane %v647_v53, 0  ;;  %v650_v57 = vperm.slane %v647_v53, 1  ;;  %v651_v0 = vperm.slane %v647_v53, 2  ;;  %v652_v1 = vperm.slane %v647_v53, 3 }
  0xda   :  { %2814 = vmatmul.msk.f32.vlgmr.msrb.gmra.mxu0 %vm480_vm0, %v446_v33  ;;  %2815 = vmatmul.msk.f32.vlgmr.msrb.gmra.mxu1 %vm480_vm0, %v446_v33 }
  0xdb   :  { %2816 = vmatmul.msk.f32.vlgmr.msrb.gmra.mxu2 %vm480_vm0, %v446_v33  ;;  %2817 = vmatmul.msk.f32.vlgmr.msrb.gmra.mxu3 %vm480_vm0, %v446_v33 }
  0xdc   :  { %739 = vmatpush.msra.mxu2 %v3943_v34  ;;  %759 = vmatpush.msra.mxu3 %v3945_v35 }
  0xdd   :  { %719 = vmatpush.msra.mxu1 %v3949_v36  ;;  %699 = vmatpush.msra.mxu0 %v3951_v37 }
  0xde   :  { %740 = vmatpush.msra.mxu2 %v3955_v38  ;;  %760 = vmatpush.msra.mxu3 %v3957_v39 }
  0xdf   :  { %720 = vmatpush.msra.mxu1 %v3961_v40  ;;  %700 = vmatpush.msra.mxu0 %v3963_v41 }
  0xe0   :  { %741 = vmatpush.msra.mxu2 %v3965_v42  ;;  %761 = vmatpush.msra.mxu3 %v3967_v43 }
  0xe1   :  { %721 = vmatpush.msra.mxu1 %v3973_v44  ;;  %701 = vmatpush.msra.mxu0 %v3975_v45 }
  0xe2   :  { %742 = vmatpush.msra.mxu2 %v3977_v46  ;;  %762 = vmatpush.msra.mxu3 %v3979_v47 }
  0xe3   :  { %2820 = vmatmul.msk.f32.vlgmr.msra.gmra.mxu2 %vm480_vm0, %v681_v48  ;;  %2821 = vmatmul.msk.f32.vlgmr.msra.gmra.mxu3 %vm480_vm0, %v681_v48 }
  0xe4   :  { %722 = vmatpush.msra.mxu1 %v3990_v49  ;;  %702 = vmatpush.msra.mxu0 %v3992_v50 }
  0xe5   :  { %2819 = vmatmul.msk.f32.vlgmr.msra.gmra.mxu1 %vm480_vm0, %v681_v48  ;;  %2818 = vmatmul.msk.f32.vlgmr.msra.gmra.mxu0 %vm480_vm0, %v681_v48 }
  0xe6   :  { %911 = vmatpush.msrb.mxu2 %v3943_v34  ;;  %931 = vmatpush.msrb.mxu3 %v3945_v35 }
  0xe7   :  { %871 = vmatpush.msrb.mxu0 %v3951_v37  ;;  %891 = vmatpush.msrb.mxu1 %v3949_v36 }
  0xe8   :  { %912 = vmatpush.msrb.mxu2 %v3955_v38  ;;  %932 = vmatpush.msrb.mxu3 %v3957_v39 }
  0xe9   :  { %872 = vmatpush.msrb.mxu0 %v3963_v41  ;;  %892 = vmatpush.msrb.mxu1 %v3961_v40 }
  0xea   :  { %913 = vmatpush.msrb.mxu2 %v3965_v42  ;;  %933 = vmatpush.msrb.mxu3 %v3967_v43 }
  0xeb   :  { %873 = vmatpush.msrb.mxu0 %v3975_v45  ;;  %893 = vmatpush.msrb.mxu1 %v3973_v44 }
  0xec   :  { %914 = vmatpush.msrb.mxu2 %v3977_v46  ;;  %934 = vmatpush.msrb.mxu3 %v3979_v47 }
  0xed   :  { %874 = vmatpush.msrb.mxu0 %v3992_v50  ;;  %894 = vmatpush.msrb.mxu1 %v3990_v49 }
  0xee   :  { %1080 = vmatpush.msra.mxu2 %v3943_v34  ;;  %1100 = vmatpush.msra.mxu3 %v3945_v35 }
  0xef   :  { %1040 = vmatpush.msra.mxu0 %v3951_v37  ;;  %1060 = vmatpush.msra.mxu1 %v3949_v36 }
  0xf0   :  { %1081 = vmatpush.msra.mxu2 %v3955_v38  ;;  %1101 = vmatpush.msra.mxu3 %v3957_v39 }
  0xf1   :  { %1041 = vmatpush.msra.mxu0 %v3963_v41  ;;  %1061 = vmatpush.msra.mxu1 %v3961_v40 }
  0xf2   :  { %1082 = vmatpush.msra.mxu2 %v3965_v42  ;;  %1102 = vmatpush.msra.mxu3 %v3967_v43 }
  0xf3   :  { %1042 = vmatpush.msra.mxu0 %v3975_v45  ;;  %1062 = vmatpush.msra.mxu1 %v3973_v44 }
  0xf4   :  { %1083 = vmatpush.msra.mxu2 %v3977_v46  ;;  %1103 = vmatpush.msra.mxu3 %v3979_v47 }
  0xf5   :  { %1043 = vmatpush.msra.mxu0 %v3992_v50  ;;  %1063 = vmatpush.msra.mxu1 %v3990_v49 }
 0x14d   :  { %v501_v51 = vpop.f32.mrf.mxu0  ;;  %v521_v52 = vpop.f32.mrf.mxu1 }
 0x154   :  { %v541_v54 = vpop.f32.mrf.mxu2  ;;  %v561_v55 = vpop.f32.mrf.mxu3 }
 0x157   :  { %v584_v58 = vpop.f32.mrf.mxu0  ;;  %v604_v59 = vpop.f32.mrf.mxu1 }
 0x158   :  { %v585_v60 = vadd.f32 %v584_v58, %v501_v51  ;;  %v605_v61 = vadd.f32 %v604_v59, %v521_v52 }
 0x15a   :  { %v657_v62 = vadd.f32 %v649_v56, %v585_v60  ;;  %v658_v63 = vadd.f32 %v650_v57, %v605_v61 }
 0x15c   :  { %661 = vst [vmem:[#allocation5] sm:$0xff] %v657_v62 }
 0x15d   :  { %662 = vst [vmem:[#allocation5 + $0x8] sm:$0xff] %v658_v63 }
 0x15e   :  { %v624_v2 = vpop.f32.mrf.mxu2  ;;  %v644_v3 = vpop.f32.mrf.mxu3 }
 0x15f   :  { %v625_v4 = vadd.f32 %v624_v2, %v541_v54  ;;  %v645_v5 = vadd.f32 %v644_v3, %v561_v55  ;;  %v682_v3 = vld [vmem:[%s4462_s7] sm:$0x1] }
 0x161   :  { %v659_v6 = vadd.f32 %v651_v0, %v625_v4  ;;  %v660_v7 = vadd.f32 %v652_v1, %v645_v5 }
 0x162   :  { %v724_v8 = vpop.f32.mrf.mxu1  ;;  %v704_v10 = vpop.f32.mrf.mxu0 }
 0x163   :  { %663 = vst [vmem:[#allocation5 + $0x10] sm:$0xff] %v659_v6  ;;  %v771_v9 = vrot.slane %v724_v8, 7 }
 0x164   :  { %664 = vst [vmem:[#allocation5 + $0x18] sm:$0xff] %v660_v7 }
 0x165   :  { %v775_v15 = vsel %vm774_vm1, %v704_v10, %v771_v9 }
 0x166   :  { %v744_v11 = vpop.f32.mrf.mxu2  ;;  %v764_v12 = vpop.f32.mrf.mxu3 }
 0x167   :  { %v772_v13 = vrot.slane %v744_v11, 6  ;;  %v773_v14 = vrot.slane %v764_v12, 5 }
 0x169   :  { %v777_v16 = vsel %vm776_vm2, %v772_v13, %v773_v14 }
 0x16a   :  { %v779_v17 = vsel %vm778_vm3, %v775_v15, %v777_v16 }
 0x16b   :  { %v683_v18 = vld [vmem:[#allocation5] ss:$8 sm:$0xf] }
 0x16c   :  { %v781_v19 = vadd.f32 %v779_v17, %v683_v18 }
 0x16e   :  { %v2822_v20 = vmul.f32 -1.442695, %v781_v19  ;;  %v802_v21 = vrot.slane %v781_v19, 1  ;;  %v826_v22 = vrot.slane %v781_v19, 3  ;;  %v823_v51 = vrot.slane %v781_v19, 2 }
 0x170   :  { %2939 = vpow2.f32 %v2822_v20  ;;  %v2823_v23 = vmul.f32 -1.442695, %v802_v21  ;;  %v2824_v24 = vmul.f32 -1.442695, %v826_v22 }
 0x172   :  { %2941 = vpow2.f32 %v2823_v23 }
 0x173   :  { %2943 = vpow2.f32 %v2824_v24 }
 0x176   :  { %v2940_v25 = vpop.eup %2939 }
 0x177   :  { %v785_v26 = vadd.f32 1.0, %v2940_v25 }
 0x178   :  { %v2942_v27 = vpop.eup %2941 }
 0x179   :  { %v2944_v28 = vpop.eup %2943  ;;  %2945 = vrcp.f32 %v785_v26  ;;  %v807_v29 = vadd.f32 1.0, %v2942_v27  ;;  %v797_v55 = vand.u32 2147483648, %v785_v26  ;;  %v795_v57 = vand.u32 2147483647, %v785_v26 }
 0x17a   :  { %v831_v30 = vadd.f32 1.0, %v2944_v28  ;;  %vm791_vm5 = vweird.f32 %v785_v26 }
 0x17b   :  { %2947 = vrcp.f32 %v807_v29  ;;  %v819_v60 = vand.u32 2147483648, %v807_v29  ;;  %v817_v62 = vand.u32 2147483647, %v807_v29  ;;  %v798_v0 = vor.u32 1.1754944e-38, %v797_v55 }
 0x17c   :  { %2949 = vrcp.f32 %v831_v30  ;;  %vm796_vm8 = vcmp.eq.f32.partialorder %v795_v57, 8.507059e+37  ;;  %vm813_vm9 = vweird.f32 %v807_v29  ;;  %v843_v14 = vand.u32 2147483648, %v831_v30 }
 0x17d   :  { %2951 = vtanh.f32 %v823_v51  ;;  %v820_v5 = vor.u32 1.1754944e-38, %v819_v60  ;;  %vm818_vm11 = vcmp.eq.f32.partialorder %v817_v62, 8.507059e+37  ;;  %vm837_vm13 = vweird.f32 %v831_v30 }
 0x17e   :  { %v841_v15 = vand.u32 2147483647, %v831_v30  ;;  %v844_v17 = vor.u32 1.1754944e-38, %v843_v14 }
 0x17f   :  { %v2946_v31 = vpop.eup %2945 }
 0x180   :  { %v787_v32 = vmul.f32 %v2946_v31, %v785_v26  ;;  %vm792_vm4 = vweird.f32 %v2946_v31  ;;  %vm842_vm15 = vcmp.eq.f32.partialorder %v841_v15, 8.507059e+37 }
 0x181   :  { %v2948_v33 = vpop.eup %2947  ;;  %vm793_vm6 = vmor %vm791_vm5, %vm792_vm4 }
 0x182   :  { %v788_v48 = vsub.f32 1.0, %v787_v32  ;;  %v2950_v52 = vpop.eup %2949  ;;  %v809_v53 = vmul.f32 %v2948_v33, %v807_v29  ;;  %vm814_vm7 = vweird.f32 %v2948_v33 }
 0x183   :  { %v833_v56 = vmul.f32 %v2950_v52, %v831_v30  ;;  %vm815_vm10 = vmor %vm813_vm9, %vm814_vm7  ;;  %v2952_v7 = vpop.eup %2951  ;;  %vm838_vm12 = vweird.f32 %v2950_v52  ;;  %v855_v30 = vld [vmem:[#allocation5 + $0x1] ss:$8 sm:$0xf] }
 0x184   :  { %v789_v54 = vmul.f32 %v2946_v31, %v788_v48  ;;  %v810_v58 = vsub.f32 1.0, %v809_v53  ;;  %vm839_vm14 = vmor %vm837_vm13, %vm838_vm12 }
 0x185   :  { %v834_v1 = vsub.f32 1.0, %v833_v56 }
 0x186   :  { %v790_v59 = vadd.f32 %v2946_v31, %v789_v54  ;;  %v811_v61 = vmul.f32 %v2948_v33, %v810_v58 }
 0x187   :  { %v835_v9 = vmul.f32 %v2950_v52, %v834_v1 }
 0x188   :  { %v794_v63 = vsel %vm793_vm6, %v2946_v31, %v790_v59  ;;  %v812_v2 = vadd.f32 %v2948_v33, %v811_v61 }
 0x189   :  { %v799_v4 = vsel %vm796_vm8, %v798_v0, %v794_v63  ;;  %v836_v13 = vadd.f32 %v2950_v52, %v835_v9 }
 0x18a   :  { %v816_v6 = vsel %vm815_vm10, %v2948_v33, %v812_v2  ;;  %v848_v11 = vmul.f32 %v2952_v7, %v799_v4 }
 0x18b   :  { %v821_v8 = vsel %vm818_vm11, %v820_v5, %v816_v6  ;;  %v840_v16 = vsel %vm839_vm14, %v2950_v52, %v836_v13 }
 0x18c   :  { %v847_v10 = vmul.f32 %v821_v8, %v682_v3  ;;  %v845_v19 = vsel %vm842_vm15, %v844_v17, %v840_v16 }
 0x18e   :  { %v4040_v12 = vadd.f32 %v848_v11, %v847_v10 }
 0x190   :  { %2953 = vtanh.f32 %v4040_v12 }
 0x196   :  { %v2954_v18 = vpop.eup %2953 }
 0x197   :  { %v851_v20 = vmul.f32 %v2954_v18, %v845_v19 }
 0x199   :  { %852 = vst [vmem:[#allocation6] sm:$0x1] %v851_v20  ;;  %2825 = vmatmul.msk.f32.vlgmr.msrb.gmra.mxu0 %vm480_vm0, %v851_v20  ;;  %2826 = vmatmul.msk.f32.vlgmr.msrb.gmra.mxu1 %vm480_vm0, %v851_v20 }
 0x19a   :  { %853 = vst [vmem:[#allocation7 + $0x7] sm:$0x1] %v851_v20  ;;  %2827 = vmatmul.msk.f32.vlgmr.msrb.gmra.mxu2 %vm480_vm0, %v851_v20  ;;  %2828 = vmatmul.msk.f32.vlgmr.msrb.gmra.mxu3 %vm480_vm0, %v851_v20 }
 0x19b   :  { %1249 = vmatpush.msrb.mxu2 %v3943_v34  ;;  %1269 = vmatpush.msrb.mxu3 %v3945_v35 }
 0x19c   :  { %1209 = vmatpush.msrb.mxu0 %v3951_v37  ;;  %1229 = vmatpush.msrb.mxu1 %v3949_v36 }
 0x19d   :  { %1250 = vmatpush.msrb.mxu2 %v3955_v38  ;;  %1270 = vmatpush.msrb.mxu3 %v3957_v39 }
 0x19e   :  { %1210 = vmatpush.msrb.mxu0 %v3963_v41  ;;  %1230 = vmatpush.msrb.mxu1 %v3961_v40 }
 0x19f   :  { %1251 = vmatpush.msrb.mxu2 %v3965_v42  ;;  %1271 = vmatpush.msrb.mxu3 %v3967_v43 }
 0x1a0   :  { %1211 = vmatpush.msrb.mxu0 %v3975_v45  ;;  %1231 = vmatpush.msrb.mxu1 %v3973_v44 }
 0x1a1   :  { %1252 = vmatpush.msrb.mxu2 %v3977_v46  ;;  %1272 = vmatpush.msrb.mxu3 %v3979_v47 }
 0x1a2   :  { %1212 = vmatpush.msrb.mxu0 %v3992_v50  ;;  %1232 = vmatpush.msrb.mxu1 %v3990_v49 }
 0x216   :  { %v896_v21 = vpop.f32.mrf.mxu1  ;;  %v876_v27 = vpop.f32.mrf.mxu0 }
 0x217   :  { %v943_v22 = vrot.slane %v896_v21, 7 }
 0x219   :  { %v946_v28 = vsel %vm774_vm1, %v876_v27, %v943_v22 }
 0x21d   :  { %v916_v23 = vpop.f32.mrf.mxu2  ;;  %v936_v24 = vpop.f32.mrf.mxu3 }
 0x21e   :  { %v944_v25 = vrot.slane %v916_v23, 6  ;;  %v945_v26 = vrot.slane %v936_v24, 5 }
 0x220   :  { %v947_v29 = vsel %vm776_vm2, %v944_v25, %v945_v26 }
 0x221   :  { %v948_v31 = vsel %vm778_vm3, %v946_v28, %v947_v29 }
 0x222   :  { %v950_v32 = vadd.f32 %v948_v31, %v855_v30 }
 0x224   :  { %v2829_v33 = vmul.f32 -1.442695, %v950_v32  ;;  %v971_v48 = vrot.slane %v950_v32, 1  ;;  %v995_v51 = vrot.slane %v950_v32, 3  ;;  %v992_v0 = vrot.slane %v950_v32, 2 }
 0x226   :  { %2955 = vpow2.f32 %v2829_v33  ;;  %v2830_v52 = vmul.f32 -1.442695, %v971_v48  ;;  %v2831_v53 = vmul.f32 -1.442695, %v995_v51 }
 0x228   :  { %2957 = vpow2.f32 %v2830_v52 }
 0x229   :  { %2959 = vpow2.f32 %v2831_v53 }
 0x22c   :  { %v2956_v54 = vpop.eup %2955 }
 0x22d   :  { %v954_v55 = vadd.f32 1.0, %v2956_v54 }
 0x22e   :  { %v2958_v56 = vpop.eup %2957 }
 0x22f   :  { %v2960_v57 = vpop.eup %2959  ;;  %2961 = vrcp.f32 %v954_v55  ;;  %v976_v58 = vadd.f32 1.0, %v2958_v56  ;;  %v966_v4 = vand.u32 2147483648, %v954_v55  ;;  %v964_v6 = vand.u32 2147483647, %v954_v55 }
 0x230   :  { %v1000_v59 = vadd.f32 1.0, %v2960_v57  ;;  %vm960_vm5 = vweird.f32 %v954_v55 }
 0x231   :  { %2963 = vrcp.f32 %v976_v58  ;;  %v988_v9 = vand.u32 2147483648, %v976_v58  ;;  %v986_v11 = vand.u32 2147483647, %v976_v58  ;;  %v967_v14 = vor.u32 1.1754944e-38, %v966_v4 }
 0x232   :  { %2965 = vrcp.f32 %v1000_v59  ;;  %vm965_vm8 = vcmp.eq.f32.partialorder %v964_v6, 8.507059e+37  ;;  %vm982_vm9 = vweird.f32 %v976_v58  ;;  %v1012_v27 = vand.u32 2147483648, %v1000_v59 }
 0x233   :  { %2967 = vtanh.f32 %v992_v0  ;;  %v989_v18 = vor.u32 1.1754944e-38, %v988_v9  ;;  %vm987_vm11 = vcmp.eq.f32.partialorder %v986_v11, 8.507059e+37  ;;  %vm1006_vm13 = vweird.f32 %v1000_v59 }
 0x234   :  { %v1010_v28 = vand.u32 2147483647, %v1000_v59  ;;  %v1013_v30 = vor.u32 1.1754944e-38, %v1012_v27 }
 0x235   :  { %v2962_v60 = vpop.eup %2961 }
 0x236   :  { %v956_v61 = vmul.f32 %v2962_v60, %v954_v55  ;;  %vm961_vm4 = vweird.f32 %v2962_v60  ;;  %vm1011_vm15 = vcmp.eq.f32.partialorder %v1010_v28, 8.507059e+37 }
 0x237   :  { %v2964_v62 = vpop.eup %2963  ;;  %vm962_vm6 = vmor %vm960_vm5, %vm961_vm4 }
 0x238   :  { %v957_v63 = vsub.f32 1.0, %v956_v61  ;;  %v2966_v1 = vpop.eup %2965  ;;  %v978_v2 = vmul.f32 %v2964_v62, %v976_v58  ;;  %vm983_vm7 = vweird.f32 %v2964_v62  ;;  %v1024_v58 = vld [vmem:[#allocation5 + $0x2] ss:$8 sm:$0xf] }
 0x239   :  { %v1002_v5 = vmul.f32 %v2966_v1, %v1000_v59  ;;  %vm984_vm10 = vmor %vm982_vm9, %vm983_vm7  ;;  %v2968_v20 = vpop.eup %2967  ;;  %vm1007_vm12 = vweird.f32 %v2966_v1 }
 0x23a   :  { %v958_v3 = vmul.f32 %v2962_v60, %v957_v63  ;;  %v979_v7 = vsub.f32 1.0, %v978_v2  ;;  %vm1008_vm14 = vmor %vm1006_vm13, %vm1007_vm12 }
 0x23b   :  { %v1003_v15 = vsub.f32 1.0, %v1002_v5 }
 0x23c   :  { %v959_v8 = vadd.f32 %v2962_v60, %v958_v3  ;;  %v980_v10 = vmul.f32 %v2964_v62, %v979_v7 }
 0x23d   :  { %v1004_v22 = vmul.f32 %v2966_v1, %v1003_v15 }
 0x23e   :  { %v963_v13 = vsel %vm962_vm6, %v2962_v60, %v959_v8  ;;  %v981_v16 = vadd.f32 %v2964_v62, %v980_v10 }
 0x23f   :  { %v968_v17 = vsel %vm965_vm8, %v967_v14, %v963_v13  ;;  %v1005_v26 = vadd.f32 %v2966_v1, %v1004_v22 }
 0x240   :  { %v985_v19 = vsel %vm984_vm10, %v2964_v62, %v981_v16  ;;  %v1017_v24 = vmul.f32 %v2968_v20, %v968_v17 }
 0x241   :  { %v990_v21 = vsel %vm987_vm11, %v989_v18, %v985_v19  ;;  %v1009_v29 = vsel %vm1008_vm14, %v2966_v1, %v1005_v26 }
 0x242   :  { %v1016_v23 = vmul.f32 %v990_v21, %v4040_v12  ;;  %v1014_v32 = vsel %vm1011_vm15, %v1013_v30, %v1009_v29 }
 0x244   :  { %v4067_v25 = vadd.f32 %v1017_v24, %v1016_v23 }
 0x246   :  { %2969 = vtanh.f32 %v4067_v25 }
 0x24c   :  { %v2970_v31 = vpop.eup %2969 }
 0x24d   :  { %v1020_v33 = vmul.f32 %v2970_v31, %v1014_v32 }
 0x24f   :  { %1021 = vst [vmem:[#allocation6 + $0x1] sm:$0x1] %v1020_v33  ;;  %2832 = vmatmul.msk.f32.vlgmr.msra.gmra.mxu0 %vm480_vm0, %v1020_v33  ;;  %2833 = vmatmul.msk.f32.vlgmr.msra.gmra.mxu1 %vm480_vm0, %v1020_v33 }
 0x250   :  { %1022 = vst [vmem:[#allocation7 + $0x6] sm:$0x1] %v1020_v33  ;;  %2834 = vmatmul.msk.f32.vlgmr.msra.gmra.mxu2 %vm480_vm0, %v1020_v33  ;;  %2835 = vmatmul.msk.f32.vlgmr.msra.gmra.mxu3 %vm480_vm0, %v1020_v33 }
 0x251   :  { %1418 = vmatpush.msra.mxu2 %v3943_v34  ;;  %1438 = vmatpush.msra.mxu3 %v3945_v35 }
 0x252   :  { %1378 = vmatpush.msra.mxu0 %v3951_v37  ;;  %1398 = vmatpush.msra.mxu1 %v3949_v36 }
 0x253   :  { %1419 = vmatpush.msra.mxu2 %v3955_v38  ;;  %1439 = vmatpush.msra.mxu3 %v3957_v39 }
 0x254   :  { %1379 = vmatpush.msra.mxu0 %v3963_v41  ;;  %1399 = vmatpush.msra.mxu1 %v3961_v40 }
 0x255   :  { %1420 = vmatpush.msra.mxu2 %v3965_v42  ;;  %1440 = vmatpush.msra.mxu3 %v3967_v43 }
 0x256   :  { %1380 = vmatpush.msra.mxu0 %v3975_v45  ;;  %1400 = vmatpush.msra.mxu1 %v3973_v44 }
 0x257   :  { %1421 = vmatpush.msra.mxu2 %v3977_v46  ;;  %1441 = vmatpush.msra.mxu3 %v3979_v47 }
 0x258   :  { %1381 = vmatpush.msra.mxu0 %v3992_v50  ;;  %1401 = vmatpush.msra.mxu1 %v3990_v49 }
 0x2cc   :  { %v1065_v12 = vpop.f32.mrf.mxu1  ;;  %v1045_v55 = vpop.f32.mrf.mxu0 }
 0x2cd   :  { %v1112_v48 = vrot.slane %v1065_v12, 7 }
 0x2cf   :  { %v1115_v56 = vsel %vm774_vm1, %v1045_v55, %v1112_v48 }
 0x2d3   :  { %v1085_v51 = vpop.f32.mrf.mxu2  ;;  %v1105_v52 = vpop.f32.mrf.mxu3 }
 0x2d4   :  { %v1113_v53 = vrot.slane %v1085_v51, 6  ;;  %v1114_v54 = vrot.slane %v1105_v52, 5 }
 0x2d6   :  { %v1116_v57 = vsel %vm776_vm2, %v1113_v53, %v1114_v54 }
 0x2d7   :  { %v1117_v59 = vsel %vm778_vm3, %v1115_v56, %v1116_v57 }
 0x2d8   :  { %v1119_v60 = vadd.f32 %v1117_v59, %v1024_v58 }
 0x2da   :  { %v2836_v61 = vmul.f32 -1.442695, %v1119_v60  ;;  %v1140_v62 = vrot.slane %v1119_v60, 1  ;;  %v1164_v63 = vrot.slane %v1119_v60, 3  ;;  %v1161_v13 = vrot.slane %v1119_v60, 2 }
 0x2dc   :  { %2971 = vpow2.f32 %v2836_v61  ;;  %v2837_v0 = vmul.f32 -1.442695, %v1140_v62  ;;  %v2838_v1 = vmul.f32 -1.442695, %v1164_v63 }
 0x2de   :  { %2973 = vpow2.f32 %v2837_v0 }
 0x2df   :  { %2975 = vpow2.f32 %v2838_v1 }
 0x2e2   :  { %v2972_v2 = vpop.eup %2971 }
 0x2e3   :  { %v1123_v3 = vadd.f32 1.0, %v2972_v2 }
 0x2e4   :  { %v2974_v4 = vpop.eup %2973 }
 0x2e5   :  { %v2976_v5 = vpop.eup %2975  ;;  %2977 = vrcp.f32 %v1123_v3  ;;  %v1145_v6 = vadd.f32 1.0, %v2974_v4  ;;  %v1135_v17 = vand.u32 2147483648, %v1123_v3  ;;  %v1133_v19 = vand.u32 2147483647, %v1123_v3 }
 0x2e6   :  { %v1169_v7 = vadd.f32 1.0, %v2976_v5  ;;  %vm1129_vm5 = vweird.f32 %v1123_v3 }
 0x2e7   :  { %2979 = vrcp.f32 %v1145_v6  ;;  %v1157_v22 = vand.u32 2147483648, %v1145_v6  ;;  %v1155_v24 = vand.u32 2147483647, %v1145_v6  ;;  %v1136_v27 = vor.u32 1.1754944e-38, %v1135_v17 }
 0x2e8   :  { %2981 = vrcp.f32 %v1169_v7  ;;  %vm1134_vm8 = vcmp.eq.f32.partialorder %v1133_v19, 8.507059e+37  ;;  %vm1151_vm9 = vweird.f32 %v1145_v6  ;;  %v1181_v55 = vand.u32 2147483648, %v1169_v7 }
 0x2e9   :  { %2983 = vtanh.f32 %v1161_v13  ;;  %v1158_v31 = vor.u32 1.1754944e-38, %v1157_v22  ;;  %vm1156_vm11 = vcmp.eq.f32.partialorder %v1155_v24, 8.507059e+37  ;;  %vm1175_vm13 = vweird.f32 %v1169_v7 }
 0x2ea   :  { %v1179_v56 = vand.u32 2147483647, %v1169_v7  ;;  %v1182_v58 = vor.u32 1.1754944e-38, %v1181_v55 }
 0x2eb   :  { %v2978_v8 = vpop.eup %2977 }
 0x2ec   :  { %v1125_v9 = vmul.f32 %v2978_v8, %v1123_v3  ;;  %vm1130_vm4 = vweird.f32 %v2978_v8  ;;  %vm1180_vm15 = vcmp.eq.f32.partialorder %v1179_v56, 8.507059e+37 }
 0x2ed   :  { %v2980_v10 = vpop.eup %2979  ;;  %vm1131_vm6 = vmor %vm1129_vm5, %vm1130_vm4 }
 0x2ee   :  { %v1126_v11 = vsub.f32 1.0, %v1125_v9  ;;  %v2982_v14 = vpop.eup %2981  ;;  %v1147_v15 = vmul.f32 %v2980_v10, %v1145_v6  ;;  %vm1152_vm7 = vweird.f32 %v2980_v10  ;;  %v1193_v6 = vld [vmem:[#allocation5 + $0x3] ss:$8 sm:$0xf] }
 0x2ef   :  { %v1171_v18 = vmul.f32 %v2982_v14, %v1169_v7  ;;  %vm1153_vm10 = vmor %vm1151_vm9, %vm1152_vm7  ;;  %v2984_v33 = vpop.eup %2983  ;;  %vm1176_vm12 = vweird.f32 %v2982_v14 }
 0x2f0   :  { %v1127_v16 = vmul.f32 %v2978_v8, %v1126_v11  ;;  %v1148_v20 = vsub.f32 1.0, %v1147_v15  ;;  %vm1177_vm14 = vmor %vm1175_vm13, %vm1176_vm12 }
 0x2f1   :  { %v1172_v28 = vsub.f32 1.0, %v1171_v18 }
 0x2f2   :  { %v1128_v21 = vadd.f32 %v2978_v8, %v1127_v16  ;;  %v1149_v23 = vmul.f32 %v2980_v10, %v1148_v20 }
 0x2f3   :  { %v1173_v48 = vmul.f32 %v2982_v14, %v1172_v28 }
 0x2f4   :  { %v1132_v26 = vsel %vm1131_vm6, %v2978_v8, %v1128_v21  ;;  %v1150_v29 = vadd.f32 %v2980_v10, %v1149_v23 }
 0x2f5   :  { %v1137_v30 = vsel %vm1134_vm8, %v1136_v27, %v1132_v26  ;;  %v1174_v54 = vadd.f32 %v2982_v14, %v1173_v48 }
 0x2f6   :  { %v1154_v32 = vsel %vm1153_vm10, %v2980_v10, %v1150_v29  ;;  %v1186_v52 = vmul.f32 %v2984_v33, %v1137_v30 }
 0x2f7   :  { %v1159_v12 = vsel %vm1156_vm11, %v1158_v31, %v1154_v32  ;;  %v1178_v57 = vsel %vm1177_vm14, %v2982_v14, %v1174_v54 }
 0x2f8   :  { %v1185_v51 = vmul.f32 %v1159_v12, %v4067_v25  ;;  %v1183_v60 = vsel %vm1180_vm15, %v1182_v58, %v1178_v57 }
 0x2fa   :  { %v4094_v53 = vadd.f32 %v1186_v52, %v1185_v51 }
 0x2fc   :  { %2985 = vtanh.f32 %v4094_v53 }
 0x302   :  { %v2986_v59 = vpop.eup %2985 }
 0x303   :  { %v1189_v61 = vmul.f32 %v2986_v59, %v1183_v60 }
 0x305   :  { %1190 = vst [vmem:[#allocation6 + $0x2] sm:$0x1] %v1189_v61  ;;  %2839 = vmatmul.msk.f32.vlgmr.msrb.gmra.mxu0 %vm480_vm0, %v1189_v61  ;;  %2840 = vmatmul.msk.f32.vlgmr.msrb.gmra.mxu1 %vm480_vm0, %v1189_v61 }
 0x306   :  { %1191 = vst [vmem:[#allocation7 + $0x5] sm:$0x1] %v1189_v61  ;;  %2841 = vmatmul.msk.f32.vlgmr.msrb.gmra.mxu2 %vm480_vm0, %v1189_v61  ;;  %2842 = vmatmul.msk.f32.vlgmr.msrb.gmra.mxu3 %vm480_vm0, %v1189_v61 }
 0x307   :  { %1587 = vmatpush.msrb.mxu2 %v3943_v34  ;;  %1607 = vmatpush.msrb.mxu3 %v3945_v35 }
 0x308   :  { %1547 = vmatpush.msrb.mxu0 %v3951_v37  ;;  %1567 = vmatpush.msrb.mxu1 %v3949_v36 }
 0x309   :  { %1588 = vmatpush.msrb.mxu2 %v3955_v38  ;;  %1608 = vmatpush.msrb.mxu3 %v3957_v39 }
 0x30a   :  { %1548 = vmatpush.msrb.mxu0 %v3963_v41  ;;  %1568 = vmatpush.msrb.mxu1 %v3961_v40 }
 0x30b   :  { %1589 = vmatpush.msrb.mxu2 %v3965_v42  ;;  %1609 = vmatpush.msrb.mxu3 %v3967_v43 }
 0x30c   :  { %1549 = vmatpush.msrb.mxu0 %v3975_v45  ;;  %1569 = vmatpush.msrb.mxu1 %v3973_v44 }
 0x30d   :  { %1590 = vmatpush.msrb.mxu2 %v3977_v46  ;;  %1610 = vmatpush.msrb.mxu3 %v3979_v47 }
 0x30e   :  { %1550 = vmatpush.msrb.mxu0 %v3992_v50  ;;  %1570 = vmatpush.msrb.mxu1 %v3990_v49 }
 0x382   :  { %v1234_v25 = vpop.f32.mrf.mxu1  ;;  %v1214_v3 = vpop.f32.mrf.mxu0 }
 0x383   :  { %v1281_v62 = vrot.slane %v1234_v25, 7 }
 0x385   :  { %v1284_v4 = vsel %vm774_vm1, %v1214_v3, %v1281_v62 }
 0x389   :  { %v1254_v63 = vpop.f32.mrf.mxu2  ;;  %v1274_v0 = vpop.f32.mrf.mxu3 }
 0x38a   :  { %v1282_v1 = vrot.slane %v1254_v63, 6  ;;  %v1283_v2 = vrot.slane %v1274_v0, 5 }
 0x38c   :  { %v1285_v5 = vsel %vm776_vm2, %v1282_v1, %v1283_v2 }
 0x38d   :  { %v1286_v7 = vsel %vm778_vm3, %v1284_v4, %v1285_v5 }
 0x38e   :  { %v1288_v8 = vadd.f32 %v1286_v7, %v1193_v6 }
 0x390   :  { %v2843_v9 = vmul.f32 -1.442695, %v1288_v8  ;;  %v1309_v10 = vrot.slane %v1288_v8, 1  ;;  %v1333_v11 = vrot.slane %v1288_v8, 3  ;;  %v1330_v26 = vrot.slane %v1288_v8, 2 }
 0x392   :  { %2987 = vpow2.f32 %v2843_v9  ;;  %v2844_v13 = vmul.f32 -1.442695, %v1309_v10  ;;  %v2845_v14 = vmul.f32 -1.442695, %v1333_v11 }
 0x394   :  { %2989 = vpow2.f32 %v2844_v13 }
 0x395   :  { %2991 = vpow2.f32 %v2845_v14 }
 0x398   :  { %v2988_v15 = vpop.eup %2987 }
 0x399   :  { %v1292_v16 = vadd.f32 1.0, %v2988_v15 }
 0x39a   :  { %v2990_v17 = vpop.eup %2989 }
 0x39b   :  { %v2992_v18 = vpop.eup %2991  ;;  %2993 = vrcp.f32 %v1292_v16  ;;  %v1314_v19 = vadd.f32 1.0, %v2990_v17  ;;  %v1304_v30 = vand.u32 2147483648, %v1292_v16  ;;  %v1302_v32 = vand.u32 2147483647, %v1292_v16 }
 0x39c   :  { %v1338_v20 = vadd.f32 1.0, %v2992_v18  ;;  %vm1298_vm5 = vweird.f32 %v1292_v16 }
 0x39d   :  { %2995 = vrcp.f32 %v1314_v19  ;;  %v1326_v48 = vand.u32 2147483648, %v1314_v19  ;;  %v1324_v52 = vand.u32 2147483647, %v1314_v19  ;;  %v1305_v55 = vor.u32 1.1754944e-38, %v1304_v30 }
 0x39e   :  { %2997 = vrcp.f32 %v1338_v20  ;;  %vm1303_vm8 = vcmp.eq.f32.partialorder %v1302_v32, 8.507059e+37  ;;  %vm1320_vm9 = vweird.f32 %v1314_v19  ;;  %v1350_v3 = vand.u32 2147483648, %v1338_v20 }
 0x39f   :  { %2999 = vtanh.f32 %v1330_v26  ;;  %v1327_v59 = vor.u32 1.1754944e-38, %v1326_v48  ;;  %vm1325_vm11 = vcmp.eq.f32.partialorder %v1324_v52, 8.507059e+37  ;;  %vm1344_vm13 = vweird.f32 %v1338_v20 }
 0x3a0   :  { %v1348_v4 = vand.u32 2147483647, %v1338_v20  ;;  %v1351_v6 = vor.u32 1.1754944e-38, %v1350_v3 }
 0x3a1   :  { %v2994_v21 = vpop.eup %2993 }
 0x3a2   :  { %v1294_v22 = vmul.f32 %v2994_v21, %v1292_v16  ;;  %vm1299_vm4 = vweird.f32 %v2994_v21  ;;  %vm1349_vm15 = vcmp.eq.f32.partialorder %v1348_v4, 8.507059e+37 }
 0x3a3   :  { %v2996_v23 = vpop.eup %2995  ;;  %vm1300_vm6 = vmor %vm1298_vm5, %vm1299_vm4 }
 0x3a4   :  { %v1295_v24 = vsub.f32 1.0, %v1294_v22  ;;  %v2998_v27 = vpop.eup %2997  ;;  %v1316_v28 = vmul.f32 %v2996_v23, %v1314_v19  ;;  %vm1321_vm7 = vweird.f32 %v2996_v23 }
 0x3a5   :  { %v1340_v31 = vmul.f32 %v2998_v27, %v1338_v20  ;;  %vm1322_vm10 = vmor %vm1320_vm9, %vm1321_vm7  ;;  %v3000_v61 = vpop.eup %2999  ;;  %vm1345_vm12 = vweird.f32 %v2998_v27 }
 0x3a6   :  { %v1296_v29 = vmul.f32 %v2994_v21, %v1295_v24  ;;  %v1317_v33 = vsub.f32 1.0, %v1316_v28  ;;  %vm1346_vm14 = vmor %vm1344_vm13, %vm1345_vm12 }
 0x3a7   :  { %v1341_v56 = vsub.f32 1.0, %v1340_v31 }
 0x3a8   :  { %v1297_v12 = vadd.f32 %v2994_v21, %v1296_v29  ;;  %v1318_v51 = vmul.f32 %v2996_v23, %v1317_v33 }
 0x3a9   :  { %v1342_v62 = vmul.f32 %v2998_v27, %v1341_v56 }
 0x3aa   :  { %v1301_v54 = vsel %vm1300_vm6, %v2994_v21, %v1297_v12  ;;  %v1319_v57 = vadd.f32 %v2996_v23, %v1318_v51 }
 0x3ab   :  { %v1306_v58 = vsel %vm1303_vm8, %v1305_v55, %v1301_v54  ;;  %v1343_v2 = vadd.f32 %v2998_v27, %v1342_v62 }
 0x3ac   :  { %v1323_v60 = vsel %vm1322_vm10, %v2996_v23, %v1319_v57  ;;  %v1355_v0 = vmul.f32 %v3000_v61, %v1306_v58 }
 0x3ad   :  { %v1328_v25 = vsel %vm1325_vm11, %v1327_v59, %v1323_v60  ;;  %v1347_v5 = vsel %vm1346_vm14, %v2998_v27, %v1343_v2 }
 0x3ae   :  { %v1354_v63 = vmul.f32 %v1328_v25, %v4094_v53  ;;  %v1352_v8 = vsel %vm1349_vm15, %v1351_v6, %v1347_v5 }
 0x3b0   :  { %v4121_v1 = vadd.f32 %v1355_v0, %v1354_v63 }
 0x3b2   :  { %3001 = vtanh.f32 %v4121_v1 }
 0x3b8   :  { %v3002_v7 = vpop.eup %3001 }
 0x3b9   :  { %v1358_v9 = vmul.f32 %v3002_v7, %v1352_v8  ;;  %v3068_v7 = vld [vmem:[#allocation18 + $0x78] sm:$0xff]  ;;  %v3069_v8 = vld [vmem:[#allocation18 + $0x60] sm:$0xff] }
 0x3bb   :  { %1359 = vst [vmem:[#allocation6 + $0x3] sm:$0x1] %v1358_v9  ;;  %2846 = vmatmul.msk.f32.vlgmr.msra.gmra.mxu0 %vm480_vm0, %v1358_v9  ;;  %2847 = vmatmul.msk.f32.vlgmr.msra.gmra.mxu1 %vm480_vm0, %v1358_v9 }
 0x3bc   :  { %1360 = vst [vmem:[#allocation7 + $0x4] sm:$0x1] %v1358_v9  ;;  %2848 = vmatmul.msk.f32.vlgmr.msra.gmra.mxu2 %vm480_vm0, %v1358_v9  ;;  %2849 = vmatmul.msk.f32.vlgmr.msra.gmra.mxu3 %vm480_vm0, %v1358_v9  ;;  %v3070_v9 = vld [vmem:[#allocation18 + $0x68] sm:$0xff] }
 0x3bd   :  { %1756 = vmatpush.msra.mxu2 %v3943_v34  ;;  %1776 = vmatpush.msra.mxu3 %v3945_v35 }
 0x3be   :  { %1716 = vmatpush.msra.mxu0 %v3951_v37  ;;  %1736 = vmatpush.msra.mxu1 %v3949_v36 }
 0x3bf   :  { %1757 = vmatpush.msra.mxu2 %v3955_v38  ;;  %1777 = vmatpush.msra.mxu3 %v3957_v39 }
 0x3c0   :  { %1717 = vmatpush.msra.mxu0 %v3963_v41  ;;  %1737 = vmatpush.msra.mxu1 %v3961_v40 }
 0x3c1   :  { %1758 = vmatpush.msra.mxu2 %v3965_v42  ;;  %1778 = vmatpush.msra.mxu3 %v3967_v43  ;;  %v1362_v43 = vld [vmem:[#allocation5 + $0x4] ss:$8 sm:$0xf] }
 0x3c2   :  { %1718 = vmatpush.msra.mxu0 %v3975_v45  ;;  %1738 = vmatpush.msra.mxu1 %v3973_v44 }
 0x3c3   :  { %1759 = vmatpush.msra.mxu2 %v3977_v46  ;;  %1779 = vmatpush.msra.mxu3 %v3979_v47 }
 0x3c4   :  { %1719 = vmatpush.msra.mxu0 %v3992_v50  ;;  %1739 = vmatpush.msra.mxu1 %v3990_v49 }
 0x438   :  { %v1403_v34 = vpop.f32.mrf.mxu1  ;;  %v1383_v40 = vpop.f32.mrf.mxu0 }
 0x439   :  { %v1450_v35 = vrot.slane %v1403_v34, 7  ;;  %v3071_v34 = vld [vmem:[#allocation18 + $0x50] sm:$0xff] }
 0x43b   :  { %v1453_v41 = vsel %vm774_vm1, %v1383_v40, %v1450_v35  ;;  %v3072_v35 = vld [vmem:[#allocation18 + $0x58] sm:$0xff]  ;;  %v3077_v40 = vld [vmem:[#allocation18 + $0x20] sm:$0xff] }
 0x43f   :  { %v1423_v36 = vpop.f32.mrf.mxu2  ;;  %v1443_v37 = vpop.f32.mrf.mxu3 }
 0x440   :  { %v1451_v38 = vrot.slane %v1423_v36, 6  ;;  %v1452_v39 = vrot.slane %v1443_v37, 5  ;;  %v3073_v36 = vld [vmem:[#allocation18 + $0x40] sm:$0xff]  ;;  %v3074_v37 = vld [vmem:[#allocation18 + $0x48] sm:$0xff] }
 0x442   :  { %v1454_v42 = vsel %vm776_vm2, %v1451_v38, %v1452_v39  ;;  %v3075_v38 = vld [vmem:[#allocation18 + $0x30] sm:$0xff]  ;;  %v3076_v39 = vld [vmem:[#allocation18 + $0x38] sm:$0xff] }
 0x443   :  { %v1455_v44 = vsel %vm778_vm3, %v1453_v41, %v1454_v42  ;;  %v3078_v41 = vld [vmem:[#allocation18 + $0x28] sm:$0xff]  ;;  %v3079_v42 = vld [vmem:[#allocation18 + $0x10] sm:$0xff] }
 0x444   :  { %v1457_v45 = vadd.f32 %v1455_v44, %v1362_v43  ;;  %v3080_v43 = vld [vmem:[#allocation18 + $0x18] sm:$0xff]  ;;  %v3081_v44 = vld [vmem:[#allocation18] sm:$0xff] }
 0x446   :  { %v2850_v46 = vmul.f32 -1.442695, %v1457_v45  ;;  %v1478_v47 = vrot.slane %v1457_v45, 1  ;;  %v1502_v50 = vrot.slane %v1457_v45, 3  ;;  %v1499_v21 = vrot.slane %v1457_v45, 2  ;;  %v3082_v45 = vld [vmem:[#allocation18 + $0x8] sm:$0xff] }
 0x448   :  { %3003 = vpow2.f32 %v2850_v46  ;;  %v2851_v49 = vmul.f32 -1.442695, %v1478_v47  ;;  %v2852_v53 = vmul.f32 -1.442695, %v1502_v50 }
 0x44a   :  { %3005 = vpow2.f32 %v2851_v49 }
 0x44b   :  { %3007 = vpow2.f32 %v2852_v53 }
 0x44e   :  { %v3004_v10 = vpop.eup %3003 }
 0x44f   :  { %v1461_v11 = vadd.f32 1.0, %v3004_v10 }
 0x450   :  { %v3006_v13 = vpop.eup %3005 }
 0x451   :  { %v3008_v14 = vpop.eup %3007  ;;  %3009 = vrcp.f32 %v1461_v11  ;;  %v1483_v15 = vadd.f32 1.0, %v3006_v13  ;;  %v1473_v26 = vand.u32 2147483648, %v1461_v11  ;;  %v1471_v28 = vand.u32 2147483647, %v1461_v11 }
 0x452   :  { %v1507_v16 = vadd.f32 1.0, %v3008_v14  ;;  %vm1467_vm5 = vweird.f32 %v1461_v11 }
 0x453   :  { %3011 = vrcp.f32 %v1483_v15  ;;  %v1495_v31 = vand.u32 2147483648, %v1483_v15  ;;  %v1493_v33 = vand.u32 2147483647, %v1483_v15  ;;  %v1474_v48 = vor.u32 1.1754944e-38, %v1473_v26 }
 0x454   :  { %3013 = vrcp.f32 %v1507_v16  ;;  %vm1472_vm8 = vcmp.eq.f32.partialorder %v1471_v28, 8.507059e+37  ;;  %vm1489_vm9 = vweird.f32 %v1483_v15  ;;  %v1519_v63 = vand.u32 2147483648, %v1507_v16 }
 0x455   :  { %3015 = vtanh.f32 %v1499_v21  ;;  %v1496_v55 = vor.u32 1.1754944e-38, %v1495_v31  ;;  %vm1494_vm11 = vcmp.eq.f32.partialorder %v1493_v33, 8.507059e+37  ;;  %vm1513_vm13 = vweird.f32 %v1507_v16 }
 0x456   :  { %v1517_v0 = vand.u32 2147483647, %v1507_v16  ;;  %v1520_v3 = vor.u32 1.1754944e-38, %v1519_v63 }
 0x457   :  { %v3010_v17 = vpop.eup %3009 }
 0x458   :  { %v1463_v18 = vmul.f32 %v3010_v17, %v1461_v11  ;;  %vm1468_vm4 = vweird.f32 %v3010_v17  ;;  %vm1518_vm15 = vcmp.eq.f32.partialorder %v1517_v0, 8.507059e+37 }
 0x459   :  { %v3012_v19 = vpop.eup %3011  ;;  %vm1469_vm6 = vmor %vm1467_vm5, %vm1468_vm4 }
 0x45a   :  { %v1464_v20 = vsub.f32 1.0, %v1463_v18  ;;  %v3014_v22 = vpop.eup %3013  ;;  %v1485_v23 = vmul.f32 %v3012_v19, %v1483_v15  ;;  %vm1490_vm7 = vweird.f32 %v3012_v19  ;;  %v1531_v15 = vld [vmem:[#allocation5 + $0x5] ss:$8 sm:$0xf] }
 0x45b   :  { %v1509_v27 = vmul.f32 %v3014_v22, %v1507_v16  ;;  %vm1491_vm10 = vmor %vm1489_vm9, %vm1490_vm7  ;;  %v3016_v57 = vpop.eup %3015  ;;  %vm1514_vm12 = vweird.f32 %v3014_v22 }
 0x45c   :  { %v1465_v24 = vmul.f32 %v3010_v17, %v1464_v20  ;;  %v1486_v29 = vsub.f32 1.0, %v1485_v23  ;;  %vm1515_vm14 = vmor %vm1513_vm13, %vm1514_vm12 }
 0x45d   :  { %v1510_v51 = vsub.f32 1.0, %v1509_v27 }
 0x45e   :  { %v1466_v30 = vadd.f32 %v3010_v17, %v1465_v24  ;;  %v1487_v32 = vmul.f32 %v3012_v19, %v1486_v29 }
 0x45f   :  { %v1511_v59 = vmul.f32 %v3014_v22, %v1510_v51 }
 0x460   :  { %v1470_v12 = vsel %vm1469_vm6, %v3010_v17, %v1466_v30  ;;  %v1488_v52 = vadd.f32 %v3012_v19, %v1487_v32 }
 0x461   :  { %v1475_v54 = vsel %vm1472_vm8, %v1474_v48, %v1470_v12  ;;  %v1512_v62 = vadd.f32 %v3014_v22, %v1511_v59 }
 0x462   :  { %v1492_v56 = vsel %vm1491_vm10, %v3012_v19, %v1488_v52  ;;  %v1524_v61 = vmul.f32 %v3016_v57, %v1475_v54 }
 0x463   :  { %v1497_v58 = vsel %vm1494_vm11, %v1496_v55, %v1492_v56  ;;  %v1516_v2 = vsel %vm1515_vm14, %v3014_v22, %v1512_v62 }
 0x464   :  { %v1523_v60 = vmul.f32 %v1497_v58, %v4121_v1  ;;  %v1521_v5 = vsel %vm1518_vm15, %v1520_v3, %v1516_v2  ;;  %v3067_v1 = vld [vmem:[#allocation18 + $0x70] sm:$0xff] }
 0x466   :  { %v4148_v25 = vadd.f32 %v1524_v61, %v1523_v60 }
 0x468   :  { %3017 = vtanh.f32 %v4148_v25 }
 0x46e   :  { %v3018_v4 = vpop.eup %3017 }
 0x46f   :  { %v1527_v6 = vmul.f32 %v3018_v4, %v1521_v5 }
 0x471   :  { %1528 = vst [vmem:[#allocation6 + $0x4] sm:$0x1] %v1527_v6  ;;  %2853 = vmatmul.msk.f32.vlgmr.msrb.gmra.mxu0 %vm480_vm0, %v1527_v6  ;;  %2854 = vmatmul.msk.f32.vlgmr.msrb.gmra.mxu1 %vm480_vm0, %v1527_v6 }
 0x472   :  { %1529 = vst [vmem:[#allocation7 + $0x3] sm:$0x1] %v1527_v6  ;;  %2855 = vmatmul.msk.f32.vlgmr.msrb.gmra.mxu2 %vm480_vm0, %v1527_v6  ;;  %2856 = vmatmul.msk.f32.vlgmr.msrb.gmra.mxu3 %vm480_vm0, %v1527_v6 }
 0x473   :  { %1925 = vmatpush.msrb.mxu2 %v3067_v1  ;;  %1945 = vmatpush.msrb.mxu3 %v3068_v7 }
 0x474   :  { %1885 = vmatpush.msrb.mxu0 %v3069_v8  ;;  %1905 = vmatpush.msrb.mxu1 %v3070_v9 }
 0x475   :  { %1926 = vmatpush.msrb.mxu2 %v3071_v34  ;;  %1946 = vmatpush.msrb.mxu3 %v3072_v35 }
 0x476   :  { %1886 = vmatpush.msrb.mxu0 %v3073_v36  ;;  %1906 = vmatpush.msrb.mxu1 %v3074_v37 }
 0x477   :  { %1927 = vmatpush.msrb.mxu2 %v3075_v38  ;;  %1947 = vmatpush.msrb.mxu3 %v3076_v39 }
 0x478   :  { %1887 = vmatpush.msrb.mxu0 %v3077_v40  ;;  %1907 = vmatpush.msrb.mxu1 %v3078_v41 }
 0x479   :  { %1928 = vmatpush.msrb.mxu2 %v3079_v42  ;;  %1948 = vmatpush.msrb.mxu3 %v3080_v43 }
 0x47a   :  { %1888 = vmatpush.msrb.mxu0 %v3081_v44  ;;  %1908 = vmatpush.msrb.mxu1 %v3082_v45 }
 0x4ee   :  { %v1572_v46 = vpop.f32.mrf.mxu1  ;;  %v1552_v11 = vpop.f32.mrf.mxu0 }
 0x4ef   :  { %v1619_v47 = vrot.slane %v1572_v46, 7 }
 0x4f1   :  { %v1622_v13 = vsel %vm774_vm1, %v1552_v11, %v1619_v47 }
 0x4f5   :  { %v1592_v50 = vpop.f32.mrf.mxu2  ;;  %v1612_v49 = vpop.f32.mrf.mxu3 }
 0x4f6   :  { %v1620_v53 = vrot.slane %v1592_v50, 6  ;;  %v1621_v10 = vrot.slane %v1612_v49, 5 }
 0x4f8   :  { %v1623_v14 = vsel %vm776_vm2, %v1620_v53, %v1621_v10  ;;  %v1700_v10 = vld [vmem:[#allocation5 + $0x6] ss:$8 sm:$0xf] }
 0x4f9   :  { %v1624_v16 = vsel %vm778_vm3, %v1622_v13, %v1623_v14 }
 0x4fa   :  { %v1626_v17 = vadd.f32 %v1624_v16, %v1531_v15 }
 0x4fc   :  { %v2857_v18 = vmul.f32 -1.442695, %v1626_v17  ;;  %v1647_v19 = vrot.slane %v1626_v17, 1  ;;  %v1671_v20 = vrot.slane %v1626_v17, 3  ;;  %v1668_v12 = vrot.slane %v1626_v17, 2 }
 0x4fe   :  { %3019 = vpow2.f32 %v2857_v18  ;;  %v2858_v21 = vmul.f32 -1.442695, %v1647_v19  ;;  %v2859_v22 = vmul.f32 -1.442695, %v1671_v20 }
 0x500   :  { %3021 = vpow2.f32 %v2858_v21 }
 0x501   :  { %3023 = vpow2.f32 %v2859_v22 }
 0x504   :  { %v3020_v23 = vpop.eup %3019 }
 0x505   :  { %v1630_v24 = vadd.f32 1.0, %v3020_v23 }
 0x506   :  { %v3022_v26 = vpop.eup %3021 }
 0x507   :  { %v3024_v27 = vpop.eup %3023  ;;  %3025 = vrcp.f32 %v1630_v24  ;;  %v1652_v28 = vadd.f32 1.0, %v3022_v26  ;;  %v1642_v54 = vand.u32 2147483648, %v1630_v24  ;;  %v1640_v56 = vand.u32 2147483647, %v1630_v24 }
 0x508   :  { %v1676_v29 = vadd.f32 1.0, %v3024_v27  ;;  %vm1636_vm5 = vweird.f32 %v1630_v24  ;;  %v3743_v26 = vmov 1.0  }
 0x509   :  { %3027 = vrcp.f32 %v1652_v28  ;;  %v1664_v59 = vand.u32 2147483648, %v1652_v28  ;;  %v1662_v61 = vand.u32 2147483647, %v1652_v28  ;;  %v1643_v63 = vor.u32 1.1754944e-38, %v1642_v54 }
 0x50a   :  { %3029 = vrcp.f32 %v1676_v29  ;;  %vm1641_vm8 = vcmp.eq.f32.partialorder %v1640_v56, 8.507059e+37  ;;  %vm1658_vm9 = vweird.f32 %v1652_v28  ;;  %v1688_v36 = vand.u32 2147483648, %v1676_v29 }
 0x50b   :  { %3031 = vtanh.f32 %v1668_v12  ;;  %v1665_v4 = vor.u32 1.1754944e-38, %v1664_v59  ;;  %vm1663_vm11 = vcmp.eq.f32.partialorder %v1662_v61, 8.507059e+37  ;;  %vm1682_vm13 = vweird.f32 %v1676_v29 }
 0x50c   :  { %v1686_v37 = vand.u32 2147483647, %v1676_v29  ;;  %v1689_v39 = vor.u32 1.1754944e-38, %v1688_v36 }
 0x50d   :  { %v3026_v30 = vpop.eup %3025 }
 0x50e   :  { %v1632_v31 = vmul.f32 %v3026_v30, %v1630_v24  ;;  %vm1637_vm4 = vweird.f32 %v3026_v30  ;;  %vm1687_vm15 = vcmp.eq.f32.partialorder %v1686_v37, 8.507059e+37 }
 0x50f   :  { %v3028_v32 = vpop.eup %3027  ;;  %vm1638_vm6 = vmor %vm1636_vm5, %vm1637_vm4 }
 0x510   :  { %v1633_v33 = vsub.f32 1.0, %v1632_v31  ;;  %v3030_v48 = vpop.eup %3029  ;;  %v1654_v51 = vmul.f32 %v3028_v32, %v1652_v28  ;;  %vm1659_vm7 = vweird.f32 %v3028_v32 }
 0x511   :  { %v1678_v55 = vmul.f32 %v3030_v48, %v1676_v29  ;;  %vm1660_vm10 = vmor %vm1658_vm9, %vm1659_vm7  ;;  %v3032_v6 = vpop.eup %3031  ;;  %vm1683_vm12 = vweird.f32 %v3030_v48 }
 0x512   :  { %v1634_v52 = vmul.f32 %v3026_v30, %v1633_v33  ;;  %v1655_v57 = vsub.f32 1.0, %v1654_v51  ;;  %vm1684_vm14 = vmor %vm1682_vm13, %vm1683_vm12 }
 0x513   :  { %v1679_v0 = vsub.f32 1.0, %v1678_v55 }
 0x514   :  { %v1635_v58 = vadd.f32 %v3026_v30, %v1634_v52  ;;  %v1656_v60 = vmul.f32 %v3028_v32, %v1655_v57 }
 0x515   :  { %v1680_v7 = vmul.f32 %v3030_v48, %v1679_v0 }
 0x516   :  { %v1639_v62 = vsel %vm1638_vm6, %v3026_v30, %v1635_v58  ;;  %v1657_v2 = vadd.f32 %v3028_v32, %v1656_v60 }
 0x517   :  { %v1644_v3 = vsel %vm1641_vm8, %v1643_v63, %v1639_v62  ;;  %v1681_v35 = vadd.f32 %v3030_v48, %v1680_v7 }
 0x518   :  { %v1661_v5 = vsel %vm1660_vm10, %v3028_v32, %v1657_v2  ;;  %v1693_v9 = vmul.f32 %v3032_v6, %v1644_v3 }
 0x519   :  { %v1666_v1 = vsel %vm1663_vm11, %v1665_v4, %v1661_v5  ;;  %v1685_v38 = vsel %vm1684_vm14, %v3030_v48, %v1681_v35 }
 0x51a   :  { %v1692_v8 = vmul.f32 %v1666_v1, %v4148_v25  ;;  %v1690_v41 = vsel %vm1687_vm15, %v1689_v39, %v1685_v38 }
 0x51c   :  { %v4159_v34 = vadd.f32 %v1693_v9, %v1692_v8 }
 0x51e   :  { %3033 = vtanh.f32 %v4159_v34 }
 0x524   :  { %v3034_v40 = vpop.eup %3033 }
 0x525   :  { %v1696_v42 = vmul.f32 %v3034_v40, %v1690_v41  ;;  %v2037_v40 = vlaneseq }
 0x527   :  { %1697 = vst [vmem:[#allocation6 + $0x5] sm:$0x1] %v1696_v42  ;;  %2860 = vmatmul.msk.f32.vlgmr.msra.gmra.mxu0 %vm480_vm0, %v1696_v42  ;;  %2861 = vmatmul.msk.f32.vlgmr.msra.gmra.mxu1 %vm480_vm0, %v1696_v42  ;;  %v4287_v41 = vand.u32 127, %v2037_v40 }
 0x528   :  { %1698 = vst [vmem:[#allocation7 + $0x2] sm:$0x1] %v1696_v42  ;;  %2862 = vmatmul.msk.f32.vlgmr.msra.gmra.mxu2 %vm480_vm0, %v1696_v42  ;;  %2863 = vmatmul.msk.f32.vlgmr.msra.gmra.mxu3 %vm480_vm0, %v1696_v42  ;;  %v4289_v42 = vshrl.u32 %v2037_v40, 7 }
 0x529   :  { %2088 = vmatpush.msra.mxu1 %v3743_v26  ;;  %2139 = vmatpush.msra.mxu2 %v3743_v26 }
 0x52a   :  { %2190 = vmatpush.msra.mxu3 %v3743_v26 }
 0x52b   :  { %2089 = vmatpush.msra.mxu1 %v3743_v26  ;;  %2140 = vmatpush.msra.mxu2 %v3743_v26 }
 0x52c   :  { %2191 = vmatpush.msra.mxu3 %v3743_v26 }
 0x52d   :  { %2090 = vmatpush.msra.mxu1 %v3743_v26  ;;  %2141 = vmatpush.msra.mxu2 %v3743_v26 }
 0x52e   :  { %2192 = vmatpush.msra.mxu3 %v3743_v26 }
 0x52f   :  { %2091 = vmatpush.msra.mxu1 %v3743_v26  ;;  %2142 = vmatpush.msra.mxu2 %v3743_v26 }
 0x530   :  { %2193 = vmatpush.msra.mxu3 %v3743_v26 }
 0x531   :  { %2092 = vmatpush.msra.mxu1 %v3743_v26  ;;  %2143 = vmatpush.msra.mxu2 %v3743_v26 }
 0x532   :  { %2194 = vmatpush.msra.mxu3 %v3743_v26 }
 0x533   :  { %2093 = vmatpush.msra.mxu1 %v3743_v26  ;;  %2144 = vmatpush.msra.mxu2 %v3743_v26 }
 0x534   :  { %2195 = vmatpush.msra.mxu3 %v3743_v26 }
 0x535   :  { %2094 = vmatpush.msra.mxu1 %v3743_v26  ;;  %2145 = vmatpush.msra.mxu2 %v3743_v26 }
 0x536   :  { %2196 = vmatpush.msra.mxu3 %v3743_v26 }
 0x537   :  { %2095 = vmatpush.msra.mxu1 %v3743_v26  ;;  %2146 = vmatpush.msra.mxu2 %v3743_v26 }
 0x538   :  { %2197 = vmatpush.msra.mxu3 %v3743_v26 }
 0x539   :  { %2096 = vmatpush.msra.mxu1 %v3743_v26  ;;  %2147 = vmatpush.msra.mxu2 %v3743_v26 }
 0x53a   :  { %2198 = vmatpush.msra.mxu3 %v3743_v26 }
 0x53b   :  { %2097 = vmatpush.msra.mxu1 %v3743_v26  ;;  %2148 = vmatpush.msra.mxu2 %v3743_v26 }
 0x53c   :  { %2199 = vmatpush.msra.mxu3 %v3743_v26 }
 0x53d   :  { %2098 = vmatpush.msra.mxu1 %v3743_v26  ;;  %2149 = vmatpush.msra.mxu2 %v3743_v26 }
 0x53e   :  { %2200 = vmatpush.msra.mxu3 %v3743_v26 }
 0x53f   :  { %2099 = vmatpush.msra.mxu1 %v3743_v26  ;;  %2150 = vmatpush.msra.mxu2 %v3743_v26 }
 0x540   :  { %2201 = vmatpush.msra.mxu3 %v3743_v26 }
 0x541   :  { %2100 = vmatpush.msra.mxu1 %v3743_v26  ;;  %2151 = vmatpush.msra.mxu2 %v3743_v26 }
 0x542   :  { %2202 = vmatpush.msra.mxu3 %v3743_v26 }
 0x543   :  { %2101 = vmatpush.msra.mxu1 %v3743_v26  ;;  %2152 = vmatpush.msra.mxu2 %v3743_v26 }
 0x544   :  { %2203 = vmatpush.msra.mxu3 %v3743_v26 }
 0x545   :  { %2102 = vmatpush.msra.mxu1 %v3743_v26  ;;  %2153 = vmatpush.msra.mxu2 %v3743_v26 }
 0x546   :  { %2204 = vmatpush.msra.mxu3 %v3743_v26 }
 0x547   :  { %2103 = vmatpush.msra.mxu1 %v3743_v26  ;;  %2154 = vmatpush.msra.mxu2 %v3743_v26 }
 0x548   :  { %2205 = vmatpush.msra.mxu3 %v3743_v26 }
 0x5a4   :  { %v1741_v25 = vpop.f32.mrf.mxu1  ;;  %v1721_v50 = vpop.f32.mrf.mxu0 }
 0x5a5   :  { %v1788_v43 = vrot.slane %v1741_v25, 7 }
 0x5a7   :  { %v1791_v49 = vsel %vm774_vm1, %v1721_v50, %v1788_v43  ;;  %v3744_v43 = vmov -10000.0  }
 0x5ab   :  { %v1761_v44 = vpop.f32.mrf.mxu2  ;;  %v1781_v45 = vpop.f32.mrf.mxu3 }
 0x5ac   :  { %v1789_v46 = vrot.slane %v1761_v44, 6  ;;  %v1790_v47 = vrot.slane %v1781_v45, 5  ;;  %v4303_v45 = vadd.s32 8, %v4289_v42 }
 0x5ae   :  { %v1792_v53 = vsel %vm776_vm2, %v1789_v46, %v1790_v47  ;;  %v2493_v46 = vld [vmem:[%s4466_s11] sm:$0x1]  ;;  %s3745_s11 = smov [#allocation24]  }
 0x5af   :  { %v1793_v11 = vsel %vm778_vm3, %v1791_v49, %v1792_v53  ;;  %s2664_s22 = sshll.u32 %s3745_s11, 4  ;;  %s2665_s22 = int_to_ptr.vmem [resolvable:$true] %s2664_s22 }
 0x5b0   :  { %v1795_v13 = vadd.f32 %v1793_v11, %v1700_v10 }
 0x5b2   :  { %v2864_v14 = vmul.f32 -1.442695, %v1795_v13  ;;  %v1816_v15 = vrot.slane %v1795_v13, 1  ;;  %v1840_v16 = vrot.slane %v1795_v13, 3  ;;  %v1837_v31 = vrot.slane %v1795_v13, 2 }
 0x5b4   :  { %3035 = vpow2.f32 %v2864_v14  ;;  %v2865_v17 = vmul.f32 -1.442695, %v1816_v15  ;;  %v2866_v18 = vmul.f32 -1.442695, %v1840_v16 }
 0x5b5   :  { %v1869_v16 = vld [vmem:[#allocation5 + $0x7] ss:$8 sm:$0xf] }
 0x5b6   :  { %3037 = vpow2.f32 %v2865_v17 }
 0x5b7   :  { %3039 = vpow2.f32 %v2866_v18 }
 0x5ba   :  { %v3036_v19 = vpop.eup %3035 }
 0x5bb   :  { %v1799_v20 = vadd.f32 1.0, %v3036_v19 }
 0x5bc   :  { %v3038_v21 = vpop.eup %3037 }
 0x5bd   :  { %v3040_v22 = vpop.eup %3039  ;;  %3041 = vrcp.f32 %v1799_v20  ;;  %v1821_v23 = vadd.f32 1.0, %v3038_v21  ;;  %v1811_v48 = vand.u32 2147483648, %v1799_v20  ;;  %v1809_v52 = vand.u32 2147483647, %v1799_v20 }
 0x5be   :  { %v4169_v24 = vadd.f32 1.0, %v3040_v22  ;;  %vm1805_vm5 = vweird.f32 %v1799_v20 }
 0x5bf   :  { %3043 = vrcp.f32 %v1821_v23  ;;  %v1833_v56 = vand.u32 2147483648, %v1821_v23  ;;  %v1831_v58 = vand.u32 2147483647, %v1821_v23  ;;  %v1812_v60 = vor.u32 1.1754944e-38, %v1811_v48 }
 0x5c0   :  { %3045 = vrcp.f32 %v4169_v24  ;;  %vm1810_vm8 = vcmp.eq.f32.partialorder %v1809_v52, 8.507059e+37  ;;  %vm1827_vm9 = vweird.f32 %v1821_v23  ;;  %v1857_v9 = vand.u32 2147483648, %v4169_v24 }
 0x5c1   :  { %3047 = vtanh.f32 %v1837_v31  ;;  %v1834_v0 = vor.u32 1.1754944e-38, %v1833_v56  ;;  %vm1832_vm11 = vcmp.eq.f32.partialorder %v1831_v58, 8.507059e+37  ;;  %vm1851_vm13 = vweird.f32 %v4169_v24 }
 0x5c2   :  { %v1858_v36 = vor.u32 1.1754944e-38, %v1857_v9 }
 0x5c3   :  { %v3042_v27 = vpop.eup %3041 }
 0x5c4   :  { %v1801_v28 = vmul.f32 %v3042_v27, %v1799_v20  ;;  %vm1806_vm4 = vweird.f32 %v3042_v27 }
 0x5c5   :  { %v3044_v29 = vpop.eup %3043  ;;  %vm1807_vm6 = vmor %vm1805_vm5, %vm1806_vm4  ;;  %vm2084_vm4 = vcmp.eq.s32.totalorder %v4287_v41, 7  ;;  %vm4294_vm5 = vcmp.eq.s32.totalorder %v4289_v42, %v4287_v41 }
 0x5c6   :  { %v1802_v30 = vsub.f32 1.0, %v1801_v28  ;;  %v4183_v32 = vpop.eup %3045  ;;  %v1823_v33 = vmul.f32 %v3044_v29, %v1821_v23  ;;  %vm1828_vm7 = vweird.f32 %v3044_v29  ;;  %v2085_v44 = vsel %vm2084_vm4, 0.0, %v3744_v43 }
 0x5c7   :  { %v1847_v51 = vmul.f32 %v4183_v32, %v4169_v24  ;;  %vm1829_vm10 = vmor %vm1827_vm9, %vm1828_vm7  ;;  %v3048_v3 = vpop.eup %3047  ;;  %vm1852_vm12 = vweird.f32 %v4183_v32 }
 0x5c8   :  { %v1803_v12 = vmul.f32 %v3042_v27, %v1802_v30  ;;  %v1824_v54 = vsub.f32 1.0, %v1823_v33  ;;  %vm1853_vm14 = vmor %vm1851_vm13, %vm1852_vm12  ;;  %v2047_v33 = vld [vmem:[#allocation20 + $0x10] sm:$0xff] }
 0x5c9   :  { %v1848_v61 = vsub.f32 1.0, %v1847_v51  ;;  %v2045_v51 = vld [vmem:[#allocation20] sm:$0xff] }
 0x5ca   :  { %v1804_v55 = vadd.f32 %v3042_v27, %v1803_v12  ;;  %v1825_v57 = vmul.f32 %v3044_v29, %v1824_v54  ;;  %v2046_v12 = vld [vmem:[#allocation20 + $0x8] sm:$0xff] }
 0x5cb   :  { %v1849_v5 = vmul.f32 %v4183_v32, %v1848_v61 }
 0x5cc   :  { %v1808_v59 = vsel %vm1807_vm6, %v3042_v27, %v1804_v55  ;;  %v1826_v62 = vadd.f32 %v3044_v29, %v1825_v57  ;;  %vm4307_vm6 = vcmp.eq.s32.totalorder %v4303_v45, %v4287_v41 }
 0x5cd   :  { %v1813_v63 = vsel %vm1810_vm8, %v1812_v60, %v1808_v59  ;;  %v1850_v8 = vadd.f32 %v4183_v32, %v1849_v5 }
 0x5ce   :  { %v1830_v2 = vsel %vm1829_vm10, %v3044_v29, %v1826_v62  ;;  %v1862_v1 = vmul.f32 %v3048_v3, %v1813_v63 }
 0x5cf   :  { %v1835_v4 = vsel %vm1832_vm11, %v1834_v0, %v1830_v2  ;;  %v1854_v35 = vsel %vm1853_vm14, %v4183_v32, %v1850_v8  ;;  %v2048_v32 = vld [vmem:[#allocation20 + $0x18] sm:$0xff] }
 0x5d0   :  { %v1861_v6 = vmul.f32 %v1835_v4, %v4159_v34  ;;  %v1855_v34 = vand.u32 2147483647, %v4169_v24  ;;  %2068 = vmatpush.msra.mxu0 %v2048_v32 }
 0x5d2   :  { %v4207_v7 = vadd.f32 %v1862_v1, %v1861_v6  ;;  %vm1856_vm15 = vcmp.eq.f32.partialorder %v1855_v34, 8.507059e+37  ;;  %2069 = vmatpush.msra.mxu0 %v2047_v33 }
 0x5d3   :  { %v1859_v38 = vsel %vm1856_vm15, %v1858_v36, %v1854_v35 }
 0x5d4   :  { %3049 = vtanh.f32 %v4207_v7  ;;  %2070 = vmatpush.msra.mxu0 %v2046_v12 }
 0x5d6   :  { %2071 = vmatpush.msra.mxu0 %v2045_v51 }
 0x5da   :  { %v3050_v37 = vpop.eup %3049 }
 0x5db   :  { %v1865_v39 = vmul.f32 %v3050_v37, %v1859_v38 }
 0x5dd   :  { %1866 = vst [vmem:[#allocation6 + $0x6] sm:$0x1] %v1865_v39  ;;  %2867 = vmatmul.msk.f32.vlgmr.msrb.gmra.mxu0 %vm480_vm0, %v1865_v39  ;;  %2868 = vmatmul.msk.f32.vlgmr.msrb.gmra.mxu1 %vm480_vm0, %v1865_v39 }
 0x5de   :  { %1867 = vst [vmem:[#allocation7 + $0x1] sm:$0x1] %v1865_v39  ;;  %2869 = vmatmul.msk.f32.vlgmr.msrb.gmra.mxu2 %vm480_vm0, %v1865_v39  ;;  %2870 = vmatmul.msk.f32.vlgmr.msrb.gmra.mxu3 %vm480_vm0, %v1865_v39 }
 0x5df   :  { %2292 = vmatpush.msrb.mxu1 %v3743_v26  ;;  %2343 = vmatpush.msrb.mxu2 %v3743_v26 }
 0x5e0   :  { %2394 = vmatpush.msrb.mxu3 %v3743_v26  ;;  %2241 = vmatpush.msrb.mxu0 %v3743_v26 }
 0x5e1   :  { %2293 = vmatpush.msrb.mxu1 %v3743_v26  ;;  %2344 = vmatpush.msrb.mxu2 %v3743_v26 }
 0x5e2   :  { %2395 = vmatpush.msrb.mxu3 %v3743_v26  ;;  %2242 = vmatpush.msrb.mxu0 %v3743_v26 }
 0x5e3   :  { %2294 = vmatpush.msrb.mxu1 %v3743_v26  ;;  %2345 = vmatpush.msrb.mxu2 %v3743_v26 }
 0x5e4   :  { %2396 = vmatpush.msrb.mxu3 %v3743_v26  ;;  %2243 = vmatpush.msrb.mxu0 %v3743_v26 }
 0x5e5   :  { %2295 = vmatpush.msrb.mxu1 %v3743_v26  ;;  %2346 = vmatpush.msrb.mxu2 %v3743_v26 }
 0x5e6   :  { %2397 = vmatpush.msrb.mxu3 %v3743_v26  ;;  %2875 = vmatmul.msk.f32.vlgmr.msra.gmra.mxu1 %vm4294_vm5, %v2085_v44 }
 0x5e7   :  { %2296 = vmatpush.msrb.mxu1 %v3743_v26  ;;  %2347 = vmatpush.msrb.mxu2 %v3743_v26 }
 0x5e8   :  { %2398 = vmatpush.msrb.mxu3 %v3743_v26  ;;  %2244 = vmatpush.msrb.mxu0 %v3743_v26 }
 0x5e9   :  { %2297 = vmatpush.msrb.mxu1 %v3743_v26  ;;  %2348 = vmatpush.msrb.mxu2 %v3743_v26 }
 0x5ea   :  { %2399 = vmatpush.msrb.mxu3 %v3743_v26  ;;  %2245 = vmatpush.msrb.mxu0 %v3743_v26 }
 0x5eb   :  { %2298 = vmatpush.msrb.mxu1 %v3743_v26  ;;  %2349 = vmatpush.msrb.mxu2 %v3743_v26 }
 0x5ec   :  { %2400 = vmatpush.msrb.mxu3 %v3743_v26  ;;  %2246 = vmatpush.msrb.mxu0 %v3743_v26 }
 0x5ed   :  { %2299 = vmatpush.msrb.mxu1 %v3743_v26  ;;  %2350 = vmatpush.msrb.mxu2 %v3743_v26 }
 0x5ee   :  { %2401 = vmatpush.msrb.mxu3 %v3743_v26  ;;  %2876 = vmatmul.msk.f32.gmra.mxu1 %vm4307_vm6, %v2085_v44 }
 0x5ef   :  { %2300 = vmatpush.msrb.mxu1 %v3743_v26  ;;  %2351 = vmatpush.msrb.mxu2 %v3743_v26 }
 0x5f0   :  { %2402 = vmatpush.msrb.mxu3 %v3743_v26  ;;  %2247 = vmatpush.msrb.mxu0 %v3743_v26 }
 0x5f1   :  { %2301 = vmatpush.msrb.mxu1 %v3743_v26  ;;  %2352 = vmatpush.msrb.mxu2 %v3743_v26 }
 0x5f2   :  { %2403 = vmatpush.msrb.mxu3 %v3743_v26  ;;  %2248 = vmatpush.msrb.mxu0 %v3743_v26 }
 0x5f3   :  { %2302 = vmatpush.msrb.mxu1 %v3743_v26  ;;  %2353 = vmatpush.msrb.mxu2 %v3743_v26 }
 0x5f4   :  { %2404 = vmatpush.msrb.mxu3 %v3743_v26  ;;  %2249 = vmatpush.msrb.mxu0 %v3743_v26 }
 0x5f5   :  { %2303 = vmatpush.msrb.mxu1 %v3743_v26  ;;  %2354 = vmatpush.msrb.mxu2 %v3743_v26 }
 0x5f6   :  { %2405 = vmatpush.msrb.mxu3 %v3743_v26  ;;  %2250 = vmatpush.msrb.mxu0 %v3743_v26 }
 0x5f7   :  { %2304 = vmatpush.msrb.mxu1 %v3743_v26  ;;  %2355 = vmatpush.msrb.mxu2 %v3743_v26 }
 0x5f8   :  { %2406 = vmatpush.msrb.mxu3 %v3743_v26  ;;  %2251 = vmatpush.msrb.mxu0 %v3743_v26 }
 0x5f9   :  { %2305 = vmatpush.msrb.mxu1 %v3743_v26  ;;  %2356 = vmatpush.msrb.mxu2 %v3743_v26 }
 0x5fa   :  { %2407 = vmatpush.msrb.mxu3 %v3743_v26  ;;  %2252 = vmatpush.msrb.mxu0 %v3743_v26 }
 0x5fb   :  { %2306 = vmatpush.msrb.mxu1 %v3743_v26  ;;  %2357 = vmatpush.msrb.mxu2 %v3743_v26 }
 0x5fc   :  { %2408 = vmatpush.msrb.mxu3 %v3743_v26  ;;  %2253 = vmatpush.msrb.mxu0 %v3743_v26 }
 0x5fd   :  { %2307 = vmatpush.msrb.mxu1 %v3743_v26  ;;  %2358 = vmatpush.msrb.mxu2 %v3743_v26 }
 0x5fe   :  { %2409 = vmatpush.msrb.mxu3 %v3743_v26  ;;  %2254 = vmatpush.msrb.mxu0 %v3743_v26 }
 0x600   :  { %2255 = vmatpush.msrb.mxu0 %v3743_v26 }
 0x602   :  { %2256 = vmatpush.msrb.mxu0 %v3743_v26 }
 0x65a   :  { %v1910_v47 = vpop.f32.mrf.mxu1  ;;  %v1890_v13 = vpop.f32.mrf.mxu0 }
 0x65b   :  { %v1957_v50 = vrot.slane %v1910_v47, 7 }
 0x65d   :  { %v1960_v14 = vsel %vm774_vm1, %v1890_v13, %v1957_v50 }
 0x661   :  { %v1930_v49 = vpop.f32.mrf.mxu2  ;;  %v1950_v53 = vpop.f32.mrf.mxu3 }
 0x662   :  { %v1958_v10 = vrot.slane %v1930_v49, 6  ;;  %v1959_v11 = vrot.slane %v1950_v53, 5 }
 0x664   :  { %v1961_v15 = vsel %vm776_vm2, %v1958_v10, %v1959_v11 }
 0x665   :  { %v1962_v17 = vsel %vm778_vm3, %v1960_v14, %v1961_v15 }
 0x666   :  { %v1964_v18 = vadd.f32 %v1962_v17, %v1869_v16  ;;  %v2105_v16 = vpop.f32.mrf.mxu1  ;;  %v4358_v17 = vld [vmem:[#allocation23] sm:$0xff] }
 0x668   :  { %v2871_v19 = vmul.f32 -1.442695, %v1964_v18  ;;  %v1985_v20 = vrot.slane %v1964_v18, 1  ;;  %v2009_v21 = vrot.slane %v1964_v18, 3  ;;  %v2006_v56 = vrot.slane %v1964_v18, 2  ;;  %v4360_v18 = vld [vmem:[#allocation23 + $0x8] sm:$0xff] }
 0x66a   :  { %3051 = vpow2.f32 %v2871_v19  ;;  %v2872_v22 = vmul.f32 -1.442695, %v1985_v20  ;;  %v2873_v23 = vmul.f32 -1.442695, %v2009_v21  ;;  %v2106_v19 = vadd.f32 %v2105_v16, %v4358_v17 }
 0x66c   :  { %3053 = vpow2.f32 %v2872_v22 }
 0x66d   :  { %3055 = vpow2.f32 %v2873_v23 }
 0x66e   :  { %v2108_v20 = vpop.f32.mrf.mxu1 }
 0x66f   :  { %v2109_v21 = vadd.f32 %v2108_v20, %v4360_v18 }
 0x670   :  { %v3052_v24 = vpop.eup %3051 }
 0x671   :  { %v1968_v27 = vadd.f32 1.0, %v3052_v24  ;;  %v2111_v22 = vmax.f32 %v2106_v19, %v2109_v21 }
 0x672   :  { %v3054_v28 = vpop.eup %3053 }
 0x673   :  { %v3056_v29 = vpop.eup %3055  ;;  %3057 = vrcp.f32 %v1968_v27  ;;  %v1990_v30 = vadd.f32 1.0, %v3054_v28  ;;  %v1980_v60 = vand.u32 2147483648, %v1968_v27  ;;  %v1978_v62 = vand.u32 2147483647, %v1968_v27 }
 0x674   :  { %v4316_v31 = vadd.f32 1.0, %v3056_v29  ;;  %vm1974_vm3 = vweird.f32 %v1968_v27  ;;  %v2112_v23 = vrot.slane %v2111_v22, 4 }
 0x675   :  { %3059 = vrcp.f32 %v1990_v30  ;;  %v2002_v2 = vand.u32 2147483648, %v1990_v30  ;;  %v2000_v4 = vand.u32 2147483647, %v1990_v30  ;;  %v1981_v6 = vor.u32 1.1754944e-38, %v1980_v60 }
 0x676   :  { %3061 = vrcp.f32 %v4316_v31  ;;  %vm1979_vm9 = vcmp.eq.f32.partialorder %v1978_v62, 8.507059e+37  ;;  %vm1996_vm10 = vweird.f32 %v1990_v30  ;;  %v2026_v47 = vand.u32 2147483648, %v4316_v31 }
 0x677   :  { %3063 = vtanh.f32 %v2006_v56  ;;  %v2003_v34 = vor.u32 1.1754944e-38, %v2002_v2  ;;  %vm2001_vm12 = vcmp.eq.f32.partialorder %v2000_v4, 8.507059e+37  ;;  %vm2020_vm14 = vweird.f32 %v4316_v31 }
 0x678   :  { %v2024_v50 = vand.u32 2147483647, %v4316_v31  ;;  %v2027_v49 = vor.u32 1.1754944e-38, %v2026_v47  ;;  %v2113_v24 = vmax.f32 %v2111_v22, %v2112_v23 }
 0x679   :  { %v3058_v48 = vpop.eup %3057 }
 0x67a   :  { %v1970_v52 = vmul.f32 %v3058_v48, %v1968_v27  ;;  %vm1975_vm2 = vweird.f32 %v3058_v48  ;;  %v2114_v27 = vrot.slane %v2113_v24, 2 }
 0x67b   :  { %v3060_v54 = vpop.eup %3059  ;;  %vm1976_vm7 = vmor %vm1974_vm3, %vm1975_vm2  ;;  %vm2025_vm2 = vcmp.eq.f32.partialorder %v2024_v50, 8.507059e+37  ;;  %vm2039_vm3 = vcmp.lt.s32.totalorder %v4287_v41, 16 }
 0x67c   :  { %v1971_v55 = vsub.f32 1.0, %v1970_v52  ;;  %v3062_v57 = vpop.eup %3061  ;;  %v1992_v58 = vmul.f32 %v3060_v54, %v1990_v30  ;;  %vm1997_vm8 = vweird.f32 %v3060_v54  ;;  %v2115_v28 = vmax.f32 %v2113_v24, %v2114_v27 }
 0x67d   :  { %v2016_v61 = vmul.f32 %v3062_v57, %v4316_v31  ;;  %vm1998_vm11 = vmor %vm1996_vm10, %vm1997_vm8  ;;  %v3064_v36 = vpop.eup %3063  ;;  %vm2021_vm13 = vweird.f32 %v3062_v57  ;;  %v2938_v31 = vld [vmem:[#allocation21] ss:$0 sm:$0xff] }
 0x67e   :  { %v1972_v59 = vmul.f32 %v3058_v48, %v1971_v55  ;;  %v1993_v63 = vsub.f32 1.0, %v1992_v58  ;;  %vm2022_vm15 = vmor %vm2020_vm14, %vm2021_vm13  ;;  %v2116_v29 = vrot.slane %v2115_v28, 1 }
 0x67f   :  { %v2017_v1 = vsub.f32 1.0, %v2016_v61 }
 0x680   :  { %v1973_v0 = vadd.f32 %v3058_v48, %v1972_v59  ;;  %v1994_v3 = vmul.f32 %v3060_v54, %v1993_v63  ;;  %v2117_v30 = vmax.f32 %v2115_v28, %v2116_v29 }
 0x681   :  { %v2018_v38 = vmul.f32 %v3062_v57, %v2017_v1 }
 0x682   :  { %v1977_v5 = vsel %vm1976_vm7, %v3058_v48, %v1973_v0  ;;  %v1995_v8 = vadd.f32 %v3060_v54, %v1994_v3 }
 0x683   :  { %v1982_v9 = vsel %vm1979_vm9, %v1981_v6, %v1977_v5  ;;  %v2019_v44 = vadd.f32 %v3062_v57, %v2018_v38 }
 0x684   :  { %v1999_v35 = vsel %vm1998_vm11, %v3060_v54, %v1995_v8  ;;  %v2031_v40 = vmul.f32 %v3064_v36, %v1982_v9 }
 0x685   :  { %v2004_v37 = vsel %vm2001_vm12, %v2003_v34, %v1999_v35 }
 0x686   :  { %v2030_v39 = vmul.f32 %v2004_v37, %v4207_v7  ;;  %v2023_v7 = vsel %vm2022_vm15, %v3062_v57, %v2019_v44 }
 0x687   :  { %v2028_v10 = vsel %vm2025_vm2, %v2027_v49, %v2023_v7 }
 0x688   :  { %v2032_v43 = vadd.f32 %v2031_v40, %v2030_v39 }
 0x68a   :  { %3065 = vtanh.f32 %v2032_v43 }
 0x690   :  { %v3066_v53 = vpop.eup %3065 }
 0x691   :  { %v2034_v11 = vmul.f32 %v3066_v53, %v2028_v10 }
 0x693   :  { %2035 = vst [vmem:[#allocation6 + $0x7] sm:$0x1] %v2034_v11 }
 0x694   :  { %2036 = vst [vmem:[#allocation7] sm:$0x1] %v2034_v11 }
 0x69a   :  { %v2040_v13 = vld [vmem:[#allocation6] sm:$0xff] }
 0x69b   :  { %v2041_v14 = vld [vmem:[#allocation7] sm:$0xff] }
 0x69c   :  { %v2044_v15 = vsel %vm2039_vm3, %v2040_v13, %v2041_v14 }
 0x69d   :  { %2874 = vmatmul.msk.f32.vlgmr.msra.gmra.mxu0 %vm480_vm0, %v2044_v15 }
 0x69e   :  { %2445 = vmatpush.msra.mxu0 %v3743_v26 }
 0x6a0   :  { %2446 = vmatpush.msra.mxu0 %v3743_v26 }
 0x6a2   :  { %2447 = vmatpush.msra.mxu0 %v3743_v26 }
 0x6a4   :  { %2448 = vmatpush.msra.mxu0 %v3743_v26 }
 0x6a6   :  { %2449 = vmatpush.msra.mxu0 %v3743_v26 }
 0x6a8   :  { %2450 = vmatpush.msra.mxu0 %v3743_v26 }
 0x6aa   :  { %2451 = vmatpush.msra.mxu0 %v3743_v26 }
 0x6ac   :  { %2452 = vmatpush.msra.mxu0 %v3743_v26 }
 0x6ae   :  { %2453 = vmatpush.msra.mxu0 %v3743_v26 }
 0x6b0   :  { %2454 = vmatpush.msra.mxu0 %v3743_v26 }
 0x6b2   :  { %2455 = vmatpush.msra.mxu0 %v3743_v26 }
 0x6b4   :  { %2456 = vmatpush.msra.mxu0 %v3743_v26 }
 0x6b6   :  { %2457 = vmatpush.msra.mxu0 %v3743_v26 }
 0x6b8   :  { %2458 = vmatpush.msra.mxu0 %v3743_v26 }
 0x6ba   :  { %2459 = vmatpush.msra.mxu0 %v3743_v26 }
 0x6bc   :  { %2460 = vmatpush.msra.mxu0 %v3743_v26 }
 0x71a   :  { %v2073_v32 = vpop.f32.mrf.mxu0 }
 0x71b   :  { %v2074_v26 = vadd.f32 %v2938_v31, %v2073_v32 }
 0x71d   :  { %2076 = vst [vmem:[#allocation8] sm:$0xff] %v2074_v26 }
 0x724   :  { %v2134_v33 = vld [vmem:[#allocation8] sm:$0x1]  ;;  %v2185_v63 = vld [vmem:[#allocation8 + $0x1] sm:$0x1]  ;;  %v2236_v53 = vld [vmem:[#allocation8 + $0x2] sm:$0x1] }
 0x725   :  { %v2135_v12 = vadd.f32 %v2134_v33, %v2117_v30 }
 0x727   :  { %v2136_v48 = vperm.slane %v2135_v12, 0 }
 0x729   :  { %2877 = vmatmul.msk.f32.vlgmr.msra.gmra.mxu2 %vm4294_vm5, %v2136_v48 }
 0x731   :  { %2878 = vmatmul.msk.f32.gmra.mxu2 %vm4307_vm6, %v2136_v48 }
 0x7ac   :  { %v2156_v51 = vpop.f32.mrf.mxu2 }
 0x7ad   :  { %v2157_v54 = vadd.f32 %v2156_v51, %v4358_v17  ;;  %v2287_v51 = vld [vmem:[#allocation8 + $0x3] sm:$0x1] }
 0x7b4   :  { %v2159_v52 = vpop.f32.mrf.mxu2 }
 0x7b5   :  { %v2160_v55 = vadd.f32 %v2159_v52, %v4360_v18 }
 0x7b7   :  { %v2162_v56 = vmax.f32 %v2157_v54, %v2160_v55 }
 0x7b9   :  { %v2163_v57 = vrot.slane %v2162_v56, 4 }
 0x7bb   :  { %v2164_v58 = vmax.f32 %v2162_v56, %v2163_v57 }
 0x7bd   :  { %v2165_v59 = vrot.slane %v2164_v58, 2 }
 0x7bf   :  { %v2166_v60 = vmax.f32 %v2164_v58, %v2165_v59 }
 0x7c1   :  { %v2167_v61 = vrot.slane %v2166_v60, 1 }
 0x7c3   :  { %v2168_v62 = vmax.f32 %v2166_v60, %v2167_v61 }
 0x7c5   :  { %vm2169_vm0 = vcmp.eq.f32.partialorder %v2157_v54, %v2168_v62  ;;  %vm2170_vm7 = vcmp.eq.f32.partialorder %v2160_v55, %v2168_v62  ;;  %v2186_v0 = vadd.f32 %v2185_v63, %v2168_v62 }
 0x7c6   :  { %v2171_v2 = vsel %vm2169_vm0, %v4289_v42, 16  ;;  %v2172_v3 = vsel %vm2170_vm7, %v4303_v45, 16 }
 0x7c7   :  { %vm2173_vm8 = vcmp.lt.s32.totalorder %v2171_v2, %v2172_v3  ;;  %v2187_v4 = vperm.slane %v2186_v0, 0 }
 0x7c8   :  { %v2174_v5 = vsel %vm2173_vm8, %v2171_v2, %v2172_v3 }
 0x7c9   :  { %v2175_v6 = vrot.slane %v2174_v5, 4  ;;  %2879 = vmatmul.msk.f32.vlgmr.msra.gmra.mxu3 %vm4294_vm5, %v2187_v4 }
 0x7cb   :  { %vm2176_vm9 = vcmp.lt.s32.totalorder %v2174_v5, %v2175_v6 }
 0x7cc   :  { %v2177_v1 = vsel %vm2176_vm9, %v2174_v5, %v2175_v6 }
 0x7cd   :  { %v2178_v8 = vrot.slane %v2177_v1, 2 }
 0x7cf   :  { %vm2179_vm10 = vcmp.lt.s32.totalorder %v2177_v1, %v2178_v8 }
 0x7d0   :  { %v2180_v9 = vsel %vm2179_vm10, %v2177_v1, %v2178_v8 }
 0x7d1   :  { %v2181_v34 = vrot.slane %v2180_v9, 1  ;;  %2880 = vmatmul.msk.f32.gmra.mxu3 %vm4307_vm6, %v2187_v4 }
 0x7d3   :  { %vm2182_vm11 = vcmp.lt.s32.totalorder %v2180_v9, %v2181_v34 }
 0x7d4   :  { %v2183_v35 = vsel %vm2182_vm11, %v2180_v9, %v2181_v34 }
 0x7d5   :  { %2184 = vst [vmem:[#allocation9 + $0x1] sm:$0x1] %v2183_v35 }
 0x84c   :  { %v2207_v36 = vpop.f32.mrf.mxu3 }
 0x84d   :  { %v2208_v38 = vadd.f32 %v2207_v36, %v4358_v17  ;;  %v2338_v36 = vld [vmem:[#allocation8 + $0x4] sm:$0x1] }
 0x854   :  { %v2210_v37 = vpop.f32.mrf.mxu3 }
 0x855   :  { %v2211_v39 = vadd.f32 %v2210_v37, %v4360_v18 }
 0x857   :  { %v2213_v40 = vmax.f32 %v2208_v38, %v2211_v39 }
 0x859   :  { %v2214_v43 = vrot.slane %v2213_v40, 4 }
 0x85b   :  { %v2215_v44 = vmax.f32 %v2213_v40, %v2214_v43 }
 0x85d   :  { %v2216_v47 = vrot.slane %v2215_v44, 2 }
 0x85f   :  { %v2217_v50 = vmax.f32 %v2215_v44, %v2216_v47 }
 0x861   :  { %v2218_v7 = vrot.slane %v2217_v50, 1 }
 0x863   :  { %v2219_v49 = vmax.f32 %v2217_v50, %v2218_v7 }
 0x865   :  { %vm2220_vm12 = vcmp.eq.f32.partialorder %v2208_v38, %v2219_v49  ;;  %vm2221_vm13 = vcmp.eq.f32.partialorder %v2211_v39, %v2219_v49  ;;  %v2237_v10 = vadd.f32 %v2236_v53, %v2219_v49 }
 0x866   :  { %v2222_v11 = vsel %vm2220_vm12, %v4289_v42, 16  ;;  %v2223_v13 = vsel %vm2221_vm13, %v4303_v45, 16 }
 0x867   :  { %vm2224_vm14 = vcmp.lt.s32.totalorder %v2222_v11, %v2223_v13  ;;  %v2238_v14 = vperm.slane %v2237_v10, 0 }
 0x868   :  { %v2225_v15 = vsel %vm2224_vm14, %v2222_v11, %v2223_v13 }
 0x869   :  { %v2226_v16 = vrot.slane %v2225_v15, 4  ;;  %2881 = vmatmul.msk.f32.vlgmr.msrb.gmra.mxu0 %vm4294_vm5, %v2238_v14 }
 0x86b   :  { %vm2227_vm15 = vcmp.lt.s32.totalorder %v2225_v15, %v2226_v16 }
 0x86c   :  { %v2228_v19 = vsel %vm2227_vm15, %v2225_v15, %v2226_v16 }
 0x86d   :  { %v2229_v20 = vrot.slane %v2228_v19, 2 }
 0x86f   :  { %vm2230_vm2 = vcmp.lt.s32.totalorder %v2228_v19, %v2229_v20 }
 0x870   :  { %v2231_v21 = vsel %vm2230_vm2, %v2228_v19, %v2229_v20 }
 0x871   :  { %v2232_v22 = vrot.slane %v2231_v21, 1  ;;  %2882 = vmatmul.msk.f32.gmra.mxu0 %vm4307_vm6, %v2238_v14 }
 0x873   :  { %vm2233_vm3 = vcmp.lt.s32.totalorder %v2231_v21, %v2232_v22 }
 0x874   :  { %v2234_v23 = vsel %vm2233_vm3, %v2231_v21, %v2232_v22 }
 0x875   :  { %2235 = vst [vmem:[#allocation9 + $0x2] sm:$0x1] %v2234_v23 }
 0x8e6   :  { %v2258_v24 = vpop.f32.mrf.mxu0 }
 0x8e7   :  { %v2259_v28 = vadd.f32 %v2258_v24, %v4358_v17  ;;  %v2389_v24 = vld [vmem:[#allocation8 + $0x5] sm:$0x1] }
 0x8ee   :  { %v2261_v27 = vpop.f32.mrf.mxu0 }
 0x8ef   :  { %v2262_v29 = vadd.f32 %v2261_v27, %v4360_v18 }
 0x8f1   :  { %v2264_v30 = vmax.f32 %v2259_v28, %v2262_v29 }
 0x8f3   :  { %v2265_v31 = vrot.slane %v2264_v30, 4 }
 0x8f5   :  { %v2266_v32 = vmax.f32 %v2264_v30, %v2265_v31 }
 0x8f7   :  { %v2267_v26 = vrot.slane %v2266_v32, 2 }
 0x8f9   :  { %v2268_v33 = vmax.f32 %v2266_v32, %v2267_v26 }
 0x8fb   :  { %v2269_v12 = vrot.slane %v2268_v33, 1 }
 0x8fd   :  { %v2270_v48 = vmax.f32 %v2268_v33, %v2269_v12 }
 0x8ff   :  { %vm2271_vm0 = vcmp.eq.f32.partialorder %v2259_v28, %v2270_v48  ;;  %vm2272_vm7 = vcmp.eq.f32.partialorder %v2262_v29, %v2270_v48  ;;  %v2288_v52 = vadd.f32 %v2287_v51, %v2270_v48 }
 0x900   :  { %v2273_v54 = vsel %vm2271_vm0, %v4289_v42, 16  ;;  %v2274_v55 = vsel %vm2272_vm7, %v4303_v45, 16 }
 0x901   :  { %vm2275_vm8 = vcmp.lt.s32.totalorder %v2273_v54, %v2274_v55  ;;  %v2289_v56 = vperm.slane %v2288_v52, 0 }
 0x902   :  { %v2276_v57 = vsel %vm2275_vm8, %v2273_v54, %v2274_v55 }
 0x903   :  { %v2277_v58 = vrot.slane %v2276_v57, 4  ;;  %2883 = vmatmul.msk.f32.vlgmr.msrb.gmra.mxu1 %vm4294_vm5, %v2289_v56 }
 0x905   :  { %vm2278_vm9 = vcmp.lt.s32.totalorder %v2276_v57, %v2277_v58 }
 0x906   :  { %v2279_v59 = vsel %vm2278_vm9, %v2276_v57, %v2277_v58 }
 0x907   :  { %v2280_v60 = vrot.slane %v2279_v59, 2 }
 0x909   :  { %vm2281_vm10 = vcmp.lt.s32.totalorder %v2279_v59, %v2280_v60 }
 0x90a   :  { %v2282_v61 = vsel %vm2281_vm10, %v2279_v59, %v2280_v60 }
 0x90b   :  { %v2283_v62 = vrot.slane %v2282_v61, 1  ;;  %2884 = vmatmul.msk.f32.gmra.mxu1 %vm4307_vm6, %v2289_v56 }
 0x90d   :  { %vm2284_vm11 = vcmp.lt.s32.totalorder %v2282_v61, %v2283_v62 }
 0x90e   :  { %v2285_v63 = vsel %vm2284_vm11, %v2282_v61, %v2283_v62 }
 0x90f   :  { %2286 = vst [vmem:[#allocation9 + $0x3] sm:$0x1] %v2285_v63 }
 0x980   :  { %v2309_v0 = vpop.f32.mrf.mxu1 }
 0x981   :  { %v2310_v3 = vadd.f32 %v2309_v0, %v4358_v17  ;;  %v2440_v0 = vld [vmem:[#allocation8 + $0x6] sm:$0x1] }
 0x988   :  { %v2312_v2 = vpop.f32.mrf.mxu1 }
 0x989   :  { %v2313_v4 = vadd.f32 %v2312_v2, %v4360_v18 }
 0x98b   :  { %v2315_v5 = vmax.f32 %v2310_v3, %v2313_v4 }
 0x98d   :  { %v2316_v6 = vrot.slane %v2315_v5, 4 }
 0x98f   :  { %v2317_v1 = vmax.f32 %v2315_v5, %v2316_v6 }
 0x991   :  { %v2318_v8 = vrot.slane %v2317_v1, 2 }
 0x993   :  { %v2319_v9 = vmax.f32 %v2317_v1, %v2318_v8 }
 0x995   :  { %v2320_v34 = vrot.slane %v2319_v9, 1 }
 0x997   :  { %v2321_v35 = vmax.f32 %v2319_v9, %v2320_v34 }
 0x999   :  { %vm2322_vm12 = vcmp.eq.f32.partialorder %v2310_v3, %v2321_v35  ;;  %vm2323_vm13 = vcmp.eq.f32.partialorder %v2313_v4, %v2321_v35  ;;  %v2339_v37 = vadd.f32 %v2338_v36, %v2321_v35 }
 0x99a   :  { %v2324_v38 = vsel %vm2322_vm12, %v4289_v42, 16  ;;  %v2325_v39 = vsel %vm2323_vm13, %v4303_v45, 16 }
 0x99b   :  { %vm2326_vm14 = vcmp.lt.s32.totalorder %v2324_v38, %v2325_v39  ;;  %v2340_v40 = vperm.slane %v2339_v37, 0 }
 0x99c   :  { %v2327_v43 = vsel %vm2326_vm14, %v2324_v38, %v2325_v39 }
 0x99d   :  { %v2328_v44 = vrot.slane %v2327_v43, 4  ;;  %2885 = vmatmul.msk.f32.vlgmr.msrb.gmra.mxu2 %vm4294_vm5, %v2340_v40 }
 0x99f   :  { %vm2329_vm15 = vcmp.lt.s32.totalorder %v2327_v43, %v2328_v44 }
 0x9a0   :  { %v2330_v47 = vsel %vm2329_vm15, %v2327_v43, %v2328_v44 }
 0x9a1   :  { %v2331_v50 = vrot.slane %v2330_v47, 2 }
 0x9a3   :  { %vm2332_vm2 = vcmp.lt.s32.totalorder %v2330_v47, %v2331_v50 }
 0x9a4   :  { %v2333_v7 = vsel %vm2332_vm2, %v2330_v47, %v2331_v50 }
 0x9a5   :  { %v2334_v49 = vrot.slane %v2333_v7, 1  ;;  %2886 = vmatmul.msk.f32.gmra.mxu2 %vm4307_vm6, %v2340_v40 }
 0x9a7   :  { %vm2335_vm3 = vcmp.lt.s32.totalorder %v2333_v7, %v2334_v49 }
 0x9a8   :  { %v2336_v53 = vsel %vm2335_vm3, %v2333_v7, %v2334_v49 }
 0x9a9   :  { %2337 = vst [vmem:[#allocation9 + $0x4] sm:$0x1] %v2336_v53  ;;  %v2491_v53 = vld [vmem:[#allocation8 + $0x7] sm:$0x1] }
 0xa20   :  { %v2360_v10 = vpop.f32.mrf.mxu2 }
 0xa21   :  { %v2361_v13 = vadd.f32 %v2360_v10, %v4358_v17 }
 0xa28   :  { %v2363_v11 = vpop.f32.mrf.mxu2 }
 0xa29   :  { %v2364_v14 = vadd.f32 %v2363_v11, %v4360_v18 }
 0xa2b   :  { %v2366_v15 = vmax.f32 %v2361_v13, %v2364_v14 }
 0xa2d   :  { %v2367_v16 = vrot.slane %v2366_v15, 4 }
 0xa2f   :  { %v2368_v19 = vmax.f32 %v2366_v15, %v2367_v16 }
 0xa31   :  { %v2369_v20 = vrot.slane %v2368_v19, 2 }
 0xa33   :  { %v2370_v21 = vmax.f32 %v2368_v19, %v2369_v20 }
 0xa35   :  { %v2371_v22 = vrot.slane %v2370_v21, 1 }
 0xa37   :  { %v2372_v23 = vmax.f32 %v2370_v21, %v2371_v22 }
 0xa39   :  { %vm2373_vm0 = vcmp.eq.f32.partialorder %v2361_v13, %v2372_v23  ;;  %vm2374_vm7 = vcmp.eq.f32.partialorder %v2364_v14, %v2372_v23  ;;  %v2390_v27 = vadd.f32 %v2389_v24, %v2372_v23 }
 0xa3a   :  { %v2375_v28 = vsel %vm2373_vm0, %v4289_v42, 16  ;;  %v2376_v29 = vsel %vm2374_vm7, %v4303_v45, 16 }
 0xa3b   :  { %vm2377_vm8 = vcmp.lt.s32.totalorder %v2375_v28, %v2376_v29  ;;  %v2391_v30 = vperm.slane %v2390_v27, 0 }
 0xa3c   :  { %v2378_v31 = vsel %vm2377_vm8, %v2375_v28, %v2376_v29 }
 0xa3d   :  { %v2379_v32 = vrot.slane %v2378_v31, 4  ;;  %2887 = vmatmul.msk.f32.vlgmr.msrb.gmra.mxu3 %vm4294_vm5, %v2391_v30 }
 0xa3f   :  { %vm2380_vm9 = vcmp.lt.s32.totalorder %v2378_v31, %v2379_v32 }
 0xa40   :  { %v2381_v26 = vsel %vm2380_vm9, %v2378_v31, %v2379_v32 }
 0xa41   :  { %v2382_v33 = vrot.slane %v2381_v26, 2 }
 0xa43   :  { %vm2383_vm10 = vcmp.lt.s32.totalorder %v2381_v26, %v2382_v33 }
 0xa44   :  { %v2384_v12 = vsel %vm2383_vm10, %v2381_v26, %v2382_v33  ;;  %vm2656_vm10 = vcmask 0  }
 0xa45   :  { %v2385_v48 = vrot.slane %v2384_v12, 1  ;;  %2888 = vmatmul.msk.f32.gmra.mxu3 %vm4307_vm6, %v2391_v30 }
 0xa47   :  { %vm2386_vm11 = vcmp.lt.s32.totalorder %v2384_v12, %v2385_v48 }
 0xa48   :  { %v2387_v51 = vsel %vm2386_vm11, %v2384_v12, %v2385_v48 }
 0xa49   :  { %2388 = vst [vmem:[#allocation9 + $0x5] sm:$0x1] %v2387_v51 }
 0xac0   :  { %v2411_v52 = vpop.f32.mrf.mxu3 }
 0xac1   :  { %v2412_v55 = vadd.f32 %v2411_v52, %v4358_v17 }
 0xac8   :  { %v2414_v54 = vpop.f32.mrf.mxu3 }
 0xac9   :  { %v2415_v56 = vadd.f32 %v2414_v54, %v4360_v18 }
 0xacb   :  { %v2417_v57 = vmax.f32 %v2412_v55, %v2415_v56 }
 0xacd   :  { %v2418_v58 = vrot.slane %v2417_v57, 4 }
 0xacf   :  { %v2419_v59 = vmax.f32 %v2417_v57, %v2418_v58 }
 0xad1   :  { %v2420_v60 = vrot.slane %v2419_v59, 2 }
 0xad3   :  { %v2421_v61 = vmax.f32 %v2419_v59, %v2420_v60 }
 0xad5   :  { %v2422_v62 = vrot.slane %v2421_v61, 1 }
 0xad7   :  { %v2423_v63 = vmax.f32 %v2421_v61, %v2422_v62 }
 0xad9   :  { %vm2424_vm12 = vcmp.eq.f32.partialorder %v2412_v55, %v2423_v63  ;;  %vm2425_vm13 = vcmp.eq.f32.partialorder %v2415_v56, %v2423_v63  ;;  %v2441_v2 = vadd.f32 %v2440_v0, %v2423_v63 }
 0xada   :  { %v2426_v3 = vsel %vm2424_vm12, %v4289_v42, 16  ;;  %v2427_v4 = vsel %vm2425_vm13, %v4303_v45, 16 }
 0xadb   :  { %vm2428_vm14 = vcmp.lt.s32.totalorder %v2426_v3, %v2427_v4  ;;  %v2442_v5 = vperm.slane %v2441_v2, 0 }
 0xadc   :  { %v2429_v6 = vsel %vm2428_vm14, %v2426_v3, %v2427_v4 }
 0xadd   :  { %v2430_v1 = vrot.slane %v2429_v6, 4  ;;  %2889 = vmatmul.msk.f32.vlgmr.msra.gmra.mxu0 %vm4294_vm5, %v2442_v5 }
 0xadf   :  { %vm2431_vm15 = vcmp.lt.s32.totalorder %v2429_v6, %v2430_v1 }
 0xae0   :  { %v2432_v8 = vsel %vm2431_vm15, %v2429_v6, %v2430_v1  ;;  %vm2534_vm15 = vcmp.eq.s32.totalorder %v4287_v41, 6 }
 0xae1   :  { %v2433_v9 = vrot.slane %v2432_v8, 2 }
 0xae3   :  { %vm2434_vm2 = vcmp.lt.s32.totalorder %v2432_v8, %v2433_v9 }
 0xae4   :  { %v2435_v34 = vsel %vm2434_vm2, %v2432_v8, %v2433_v9 }
 0xae5   :  { %v2436_v35 = vrot.slane %v2435_v34, 1  ;;  %2890 = vmatmul.msk.f32.gmra.mxu0 %vm4307_vm6, %v2442_v5 }
 0xae7   :  { %vm2437_vm3 = vcmp.lt.s32.totalorder %v2435_v34, %v2436_v35 }
 0xae8   :  { %v2438_v36 = vsel %vm2437_vm3, %v2435_v34, %v2436_v35 }
 0xae9   :  { %2439 = vst [vmem:[#allocation9 + $0x6] sm:$0x1] %v2438_v36 }
 0xaf0   :  { %v2536_v5 = vld [vmem:[#allocation9 + $0x6] sm:$0x1] }
 0xb5a   :  { %v2462_v37 = vpop.f32.mrf.mxu0 }
 0xb5b   :  { %v2463_v39 = vadd.f32 %v2462_v37, %v4358_v17 }
 0xb62   :  { %v2465_v38 = vpop.f32.mrf.mxu0 }
 0xb63   :  { %v2466_v40 = vadd.f32 %v2465_v38, %v4360_v18 }
 0xb65   :  { %v2468_v25 = vmax.f32 %v2463_v39, %v2466_v40 }
 0xb67   :  { %v2469_v43 = vrot.slane %v2468_v25, 4 }
 0xb69   :  { %v2470_v44 = vmax.f32 %v2468_v25, %v2469_v43 }
 0xb6b   :  { %v2471_v47 = vrot.slane %v2470_v44, 2 }
 0xb6d   :  { %v2472_v50 = vmax.f32 %v2470_v44, %v2471_v47  ;;  %v2556_v47 = vld [vmem:[#allocation9 + $0x5] sm:$0x1] }
 0xb6f   :  { %v2473_v7 = vrot.slane %v2472_v50, 1 }
 0xb71   :  { %v2474_v49 = vmax.f32 %v2472_v50, %v2473_v7 }
 0xb73   :  { %vm2475_vm5 = vcmp.eq.f32.partialorder %v2463_v39, %v2474_v49  ;;  %vm2476_vm6 = vcmp.eq.f32.partialorder %v2466_v40, %v2474_v49  ;;  %v2492_v10 = vadd.f32 %v2491_v53, %v2474_v49 }
 0xb74   :  { %v2477_v11 = vsel %vm2475_vm5, %v4289_v42, 16  ;;  %v2478_v17 = vsel %vm2476_vm6, %v4303_v45, 16 }
 0xb75   :  { %vm2479_vm0 = vcmp.lt.s32.totalorder %v2477_v11, %v2478_v17  ;;  %v2494_v18 = vadd.f32 %v2493_v46, %v2492_v10 }
 0xb76   :  { %v2480_v13 = vsel %vm2479_vm0, %v2477_v11, %v2478_v17  ;;  %vm2574_vm0 = vcmp.eq.s32.totalorder %v4287_v41, 4 }
 0xb77   :  { %v2481_v14 = vrot.slane %v2480_v13, 4  ;;  %v2495_v15 = vsel %vm774_vm1, %v2494_v18, -inf }
 0xb78   :  { %2496 = vmax.xlane.f32.xlu0 %v2495_v15 }
 0xb79   :  { %vm2482_vm7 = vcmp.lt.s32.totalorder %v2480_v13, %v2481_v14 }
 0xb7a   :  { %v2483_v16 = vsel %vm2482_vm7, %v2480_v13, %v2481_v14 }
 0xb7b   :  { %v2484_v19 = vrot.slane %v2483_v16, 2 }
 0xb7d   :  { %vm2485_vm8 = vcmp.lt.s32.totalorder %v2483_v16, %v2484_v19 }
 0xb7e   :  { %v2486_v20 = vsel %vm2485_vm8, %v2483_v16, %v2484_v19 }
 0xb7f   :  { %v2487_v21 = vrot.slane %v2486_v20, 1 }
 0xb81   :  { %vm2488_vm9 = vcmp.lt.s32.totalorder %v2486_v20, %v2487_v21 }
 0xb82   :  { %v2489_v22 = vsel %vm2488_vm9, %v2486_v20, %v2487_v21  ;;  %v2576_v20 = vld [vmem:[#allocation9 + $0x4] sm:$0x1]  ;;  %vm2594_vm9 = vcmp.eq.s32.totalorder %v4287_v41, 3 }
 0xb83   :  { %2490 = vst [vmem:[#allocation9 + $0x7] sm:$0x1] %v2489_v22 }
 0xb8a   :  { %v2516_v51 = vld [vmem:[#allocation9 + $0x7] sm:$0x1] }
 0xbeb   :  { %v2497_v42 = vpop.xlane.xlu0 %2496 }
 0xbec   :  { %vm2498_vm11 = vcmp.eq.f32.partialorder %v2494_v18, %v2497_v42  ;;  %2657 = vst.msk [vmem:[#allocation24] sm:$0x1] %vm2656_vm10, %v2497_v42 }
 0xbed   :  { %v2499_v45 = vsel %vm2498_vm11, %v4287_v41, 128  ;;  %2669 = dma.vmem_to_hbm [thread:$0]  %s2665_s22, 16, %s2667_s30, [#allocation12]  }
 0xbee   :  { %v2500_v23 = vsel %vm774_vm1, %v2499_v45, 2147483647 }
 0xbef   :  { %v2502_v24 = vshra.s32 %v2500_v23, 16  ;;  %v2501_v28 = vand.u32 65535, %v2500_v23 }
 0xbf1   :  { %v2504_v27 = vcvt.s32.f32 %v2502_v24  ;;  %v2503_v30 = vcvt.s32.f32 %v2501_v28 }
 0xbf3   :  { %2505 = vmin.xlane.f32.xlu0 %v2504_v27 }
 0xc66   :  { %v2506_v29 = vpop.xlane.xlu0 %2505 }
 0xc67   :  { %vm2507_vm12 = vcmp.eq.f32.partialorder %v2504_v27, %v2506_v29  ;;  %v2512_v32 = vcvt.f32.s32 %v2506_v29 }
 0xc68   :  { %v2508_v31 = vsel %vm2507_vm12, %v2503_v30, inf  ;;  %vm2614_vm12 = vcmp.eq.s32.totalorder %v4287_v41, 2 }
 0xc69   :  { %2509 = vmin.xlane.f32.xlu1 %v2508_v31  ;;  %v2513_v33 = vshll.u32 %v2512_v32, 16 }
 0xcdc   :  { %v2510_v26 = vpop.xlane.xlu1 %2509 }
 0xcdd   :  { %v2511_v12 = vcvt.f32.s32 %v2510_v26 }
 0xcdf   :  { %v2514_v48 = vadd.s32 %v2513_v33, %v2511_v12  ;;  %v2596_v12 = vld [vmem:[#allocation9 + $0x3] sm:$0x1] }
 0xce1   :  { %vm2517_vm13 = vcmp.eq.s32.totalorder %v4287_v41, %v2514_v48  ;;  %v2515_v3 = vsel %vm2084_vm4, %v2514_v48, 0  ;;  %vm2554_vm4 = vcmp.eq.s32.totalorder %v4287_v41, 5 }
 0xce2   :  { %v2518_v52 = vsel %vm2517_vm13, %v2516_v51, 4294967295 }
 0xce3   :  { %v2519_v54 = vsel %vm774_vm1, %v2518_v52, 2147483648 }
 0xce4   :  { %v2521_v55 = vshra.s32 %v2519_v54, 16  ;;  %v2520_v57 = vand.u32 65535, %v2519_v54 }
 0xce6   :  { %v2523_v56 = vcvt.s32.f32 %v2521_v55  ;;  %v2522_v59 = vcvt.s32.f32 %v2520_v57 }
 0xce8   :  { %2524 = vmax.xlane.f32.xlu1 %v2523_v56 }
 0xd5b   :  { %v2525_v58 = vpop.xlane.xlu1 %2524 }
 0xd5c   :  { %vm2526_vm14 = vcmp.eq.f32.partialorder %v2523_v56, %v2525_v58  ;;  %v2531_v61 = vcvt.f32.s32 %v2525_v58 }
 0xd5d   :  { %v2527_v60 = vsel %vm2526_vm14, %v2522_v59, -inf }
 0xd5e   :  { %2528 = vmax.xlane.f32.xlu2 %v2527_v60  ;;  %v2532_v63 = vshll.u32 %v2531_v61, 16 }
 0xdd1   :  { %v2529_v62 = vpop.xlane.xlu2 %2528 }
 0xdd2   :  { %v2530_v0 = vcvt.f32.s32 %v2529_v62 }
 0xdd4   :  { %v2533_v2 = vadd.s32 %v2532_v63, %v2530_v0 }
 0xdd6   :  { %v2535_v4 = vsel %vm2534_vm15, %v2533_v2, %v2515_v3  ;;  %vm2537_vm2 = vcmp.eq.s32.totalorder %v4287_v41, %v2533_v2  ;;  %v2616_v2 = vld [vmem:[#allocation9 + $0x2] sm:$0x1]  ;;  %vm2634_vm15 = vcmp.eq.s32.totalorder %v4287_v41, 1 }
 0xdd7   :  { %v2538_v6 = vsel %vm2537_vm2, %v2536_v5, 4294967295 }
 0xdd8   :  { %v2539_v1 = vsel %vm774_vm1, %v2538_v6, 2147483648 }
 0xdd9   :  { %v2541_v8 = vshra.s32 %v2539_v1, 16  ;;  %v2540_v34 = vand.u32 65535, %v2539_v1 }
 0xddb   :  { %v2543_v9 = vcvt.s32.f32 %v2541_v8  ;;  %v2542_v36 = vcvt.s32.f32 %v2540_v34 }
 0xddd   :  { %2544 = vmax.xlane.f32.xlu2 %v2543_v9 }
 0xe50   :  { %v2545_v35 = vpop.xlane.xlu2 %2544 }
 0xe51   :  { %vm2546_vm3 = vcmp.eq.f32.partialorder %v2543_v9, %v2545_v35  ;;  %v2551_v38 = vcvt.f32.s32 %v2545_v35 }
 0xe52   :  { %v2547_v37 = vsel %vm2546_vm3, %v2542_v36, -inf }
 0xe53   :  { %2548 = vmax.xlane.f32.xlu0 %v2547_v37  ;;  %v2552_v40 = vshll.u32 %v2551_v38, 16 }
 0xec6   :  { %v2549_v39 = vpop.xlane.xlu0 %2548 }
 0xec7   :  { %v2550_v25 = vcvt.f32.s32 %v2549_v39 }
 0xec9   :  { %v2553_v43 = vadd.s32 %v2552_v40, %v2550_v25  ;;  %v2636_v25 = vld [vmem:[#allocation9 + $0x1] sm:$0x1] }
 0xecb   :  { %v2555_v44 = vsel %vm2554_vm4, %v2553_v43, %v2535_v4  ;;  %vm2557_vm5 = vcmp.eq.s32.totalorder %v4287_v41, %v2553_v43 }
 0xecc   :  { %v2558_v50 = vsel %vm2557_vm5, %v2556_v47, 4294967295 }
 0xecd   :  { %v2559_v7 = vsel %vm774_vm1, %v2558_v50, 2147483648 }
 0xece   :  { %v2561_v49 = vshra.s32 %v2559_v7, 16  ;;  %v2560_v46 = vand.u32 65535, %v2559_v7 }
 0xed0   :  { %v2563_v53 = vcvt.s32.f32 %v2561_v49  ;;  %v2562_v11 = vcvt.s32.f32 %v2560_v46 }
 0xed2   :  { %2564 = vmax.xlane.f32.xlu1 %v2563_v53 }
 0xf45   :  { %v2565_v10 = vpop.xlane.xlu1 %2564 }
 0xf46   :  { %vm2566_vm6 = vcmp.eq.f32.partialorder %v2563_v53, %v2565_v10  ;;  %v2571_v18 = vcvt.f32.s32 %v2565_v10 }
 0xf47   :  { %v2567_v17 = vsel %vm2566_vm6, %v2562_v11, -inf }
 0xf48   :  { %2568 = vmax.xlane.f32.xlu2 %v2567_v17  ;;  %v2572_v14 = vshll.u32 %v2571_v18, 16 }
 0xfbb   :  { %v2569_v13 = vpop.xlane.xlu2 %2568 }
 0xfbc   :  { %v2570_v15 = vcvt.f32.s32 %v2569_v13 }
 0xfbe   :  { %v2573_v16 = vadd.s32 %v2572_v14, %v2570_v15 }
 0xfc0   :  { %v2575_v19 = vsel %vm2574_vm0, %v2573_v16, %v2555_v44  ;;  %vm2577_vm7 = vcmp.eq.s32.totalorder %v4287_v41, %v2573_v16 }
 0xfc1   :  { %v2578_v21 = vsel %vm2577_vm7, %v2576_v20, 4294967295 }
 0xfc2   :  { %v2579_v22 = vsel %vm774_vm1, %v2578_v21, 2147483648 }
 0xfc3   :  { %v2581_v42 = vshra.s32 %v2579_v22, 16  ;;  %v2580_v23 = vand.u32 65535, %v2579_v22 }
 0xfc5   :  { %v2583_v45 = vcvt.s32.f32 %v2581_v42  ;;  %v2582_v27 = vcvt.s32.f32 %v2580_v23 }
 0xfc7   :  { %2584 = vmax.xlane.f32.xlu0 %v2583_v45 }
0x103a   :  { %v2585_v24 = vpop.xlane.xlu0 %2584 }
0x103b   :  { %vm2586_vm8 = vcmp.eq.f32.partialorder %v2583_v45, %v2585_v24  ;;  %v2591_v29 = vcvt.f32.s32 %v2585_v24 }
0x103c   :  { %v2587_v28 = vsel %vm2586_vm8, %v2582_v27, -inf }
0x103d   :  { %2588 = vmax.xlane.f32.xlu1 %v2587_v28  ;;  %v2592_v31 = vshll.u32 %v2591_v29, 16 }
0x10b0   :  { %v2589_v30 = vpop.xlane.xlu1 %2588 }
0x10b1   :  { %v2590_v32 = vcvt.f32.s32 %v2589_v30 }
0x10b3   :  { %v2593_v26 = vadd.s32 %v2592_v31, %v2590_v32 }
0x10b5   :  { %v2595_v33 = vsel %vm2594_vm9, %v2593_v26, %v2575_v19  ;;  %vm2597_vm10 = vcmp.eq.s32.totalorder %v4287_v41, %v2593_v26 }
0x10b6   :  { %v2598_v48 = vsel %vm2597_vm10, %v2596_v12, 4294967295 }
0x10b7   :  { %v2599_v51 = vsel %vm774_vm1, %v2598_v48, 2147483648 }
0x10b8   :  { %v2601_v52 = vshra.s32 %v2599_v51, 16  ;;  %v2600_v55 = vand.u32 65535, %v2599_v51 }
0x10ba   :  { %v2603_v54 = vcvt.s32.f32 %v2601_v52  ;;  %v2602_v57 = vcvt.s32.f32 %v2600_v55 }
0x10bc   :  { %2604 = vmax.xlane.f32.xlu2 %v2603_v54 }
0x112f   :  { %v2605_v56 = vpop.xlane.xlu2 %2604 }
0x1130   :  { %vm2606_vm11 = vcmp.eq.f32.partialorder %v2603_v54, %v2605_v56  ;;  %v2611_v59 = vcvt.f32.s32 %v2605_v56 }
0x1131   :  { %v2607_v58 = vsel %vm2606_vm11, %v2602_v57, -inf }
0x1132   :  { %2608 = vmax.xlane.f32.xlu0 %v2607_v58  ;;  %v2612_v61 = vshll.u32 %v2611_v59, 16 }
0x11a5   :  { %v2609_v60 = vpop.xlane.xlu0 %2608 }
0x11a6   :  { %v2610_v62 = vcvt.f32.s32 %v2609_v60 }
0x11a8   :  { %v2613_v63 = vadd.s32 %v2612_v61, %v2610_v62 }
0x11aa   :  { %v2615_v0 = vsel %vm2614_vm12, %v2613_v63, %v2595_v33  ;;  %vm2617_vm13 = vcmp.eq.s32.totalorder %v4287_v41, %v2613_v63 }
0x11ab   :  { %v2618_v3 = vsel %vm2617_vm13, %v2616_v2, 4294967295 }
0x11ac   :  { %v2619_v4 = vsel %vm774_vm1, %v2618_v3, 2147483648 }
0x11ad   :  { %v2621_v5 = vshra.s32 %v2619_v4, 16  ;;  %v2620_v1 = vand.u32 65535, %v2619_v4 }
0x11af   :  { %v2623_v6 = vcvt.s32.f32 %v2621_v5  ;;  %v2622_v9 = vcvt.s32.f32 %v2620_v1 }
0x11b1   :  { %2624 = vmax.xlane.f32.xlu1 %v2623_v6 }
0x1224   :  { %v2625_v8 = vpop.xlane.xlu1 %2624 }
0x1225   :  { %vm2626_vm14 = vcmp.eq.f32.partialorder %v2623_v6, %v2625_v8  ;;  %v2631_v35 = vcvt.f32.s32 %v2625_v8 }
0x1226   :  { %v2627_v34 = vsel %vm2626_vm14, %v2622_v9, -inf }
0x1227   :  { %2628 = vmax.xlane.f32.xlu2 %v2627_v34  ;;  %v2632_v37 = vshll.u32 %v2631_v35, 16 }
0x129a   :  { %v2629_v36 = vpop.xlane.xlu2 %2628 }
0x129b   :  { %v2630_v38 = vcvt.f32.s32 %v2629_v36 }
0x129d   :  { %v2633_v39 = vadd.s32 %v2632_v37, %v2630_v38 }
0x129f   :  { %v2635_v40 = vsel %vm2634_vm15, %v2633_v39, %v2615_v0  ;;  %vm2637_vm2 = vcmp.eq.s32.totalorder %v4287_v41, %v2633_v39 }
0x12a0   :  { %v2638_v43 = vsel %vm2637_vm2, %v2636_v25, 4294967295 }
0x12a1   :  { %v2639_v44 = vsel %vm774_vm1, %v2638_v43, 2147483648  ;;  %vm2654_vm1 = vcmp.eq.s32.totalorder %v4287_v41, 0 }
0x12a2   :  { %v2641_v47 = vshra.s32 %v2639_v44, 16  ;;  %v2640_v7 = vand.u32 65535, %v2639_v44 }
0x12a4   :  { %v2643_v50 = vcvt.s32.f32 %v2641_v47  ;;  %v2642_v53 = vcvt.s32.f32 %v2640_v7 }
0x12a6   :  { %2644 = vmax.xlane.f32.xlu0 %v2643_v50 }
0x1319   :  { %v2645_v49 = vpop.xlane.xlu0 %2644 }
0x131a   :  { %vm2646_vm3 = vcmp.eq.f32.partialorder %v2643_v50, %v2645_v49  ;;  %v2651_v10 = vcvt.f32.s32 %v2645_v49 }
0x131b   :  { %v2647_v46 = vsel %vm2646_vm3, %v2642_v53, -inf }
0x131c   :  { %2648 = vmax.xlane.f32.xlu1 %v2647_v46  ;;  %v2652_v17 = vshll.u32 %v2651_v10, 16 }
0x138f   :  { %v2649_v11 = vpop.xlane.xlu1 %2648 }
0x1390   :  { %v2650_v18 = vcvt.f32.s32 %v2649_v11 }
0x1392   :  { %v2653_v13 = vadd.s32 %v2652_v17, %v2650_v18 }
0x1394   :  { %v2655_v14 = vsel %vm2654_vm1, %v2653_v13, %v2635_v40 }
0x1395   :  { %2658 = vst [vmem:[%s4468_s13] sm:$0x1] %v2655_v14 }
0x1396   :  { %3713 = dma.done.wait [#allocation12], 16  }
0x1397   :  { %3714 = vsyncadd [#allocation12], 4294967280 }
0x1398   :  { %2678 = vsyncpa [#allocation11], 1 }
0x1399   :  { %2679 = vsyncpa [#allocation16], 1 }
0x139a   :  { %2680 = vsyncpa [#allocation19], 1 }
0x139b   :  { %2681 = vsyncpa [#allocation22], 1 }
0x139c   :  { %2682 = vsyncpa [#allocation12], 1 }
0x139d   :  { %2683 = vsyncpa [#allocation13], 1 }
0x139e   :  { %2684 = vsyncmov [#allocation4] }
0x13a1   :  { %s2685_s12 = vpop.sfrf %2684 }
0x13a2   :  { %p2891_p12 = scmp.ne.s32.totalorder %s2685_s12, 0 }
0x13a4   :  { %2689 = shalt.err (%p2891_p12)  }
0x13a5   :  { %2691 = vsyncmov [#allocation4 + $0x1] }
0x13a8   :  { %s2692_s26 = vpop.sfrf %2691 }
0x13a9   :  { %p2892_p13 = scmp.ne.s32.totalorder %s2692_s26, 0 }
0x13ab   :  { %2696 = shalt.err (%p2892_p13)  }
0x13ac   :  { %2698 = vsyncmov [#allocation4 + $0x2] }
0x13af   :  { %s2699_s17 = vpop.sfrf %2698 }
0x13b0   :  { %p2893_p0 = scmp.ne.s32.totalorder %s2699_s17, 0 }
0x13b2   :  { %2703 = shalt.err (%p2893_p0)  }
0x13b3   :  { %2705 = vsyncmov [#allocation4 + $0x3] }
0x13b6   :  { %s2706_s13 = vpop.sfrf %2705 }
0x13b7   :  { %p2894_p1 = scmp.ne.s32.totalorder %s2706_s13, 0 }
0x13b9   :  { %2710 = shalt.err (%p2894_p1)  }
0x13ba   :  { %2712 = vsyncmov [#allocation4 + $0x4] }
0x13bd   :  { %s2713_s15 = vpop.sfrf %2712 }
0x13be   :  { %p2895_p2 = scmp.ne.s32.totalorder %s2713_s15, 0 }
0x13c0   :  { %2717 = shalt.err (%p2895_p2)  }
0x13c1   :  { %2719 = vsyncmov [#allocation4 + $0x5] }
0x13c4   :  { %s2720_s25 = vpop.sfrf %2719 }
0x13c5   :  { %p2896_p3 = scmp.ne.s32.totalorder %s2720_s25, 0 }
0x13c7   :  { %2724 = shalt.err (%p2896_p3)  }
0x13c8   :  { %2726 = vsyncmov [#allocation4 + $0x6] }
0x13cb   :  { %s2727_s4 = vpop.sfrf %2726 }
0x13cc   :  { %p2897_p4 = scmp.ne.s32.totalorder %s2727_s4, 0 }
0x13ce   :  { %2731 = shalt.err (%p2897_p4)  }
0x13cf   :  { %2733 = vsyncmov [#allocation4 + $0x7] }
0x13d2   :  { %s2734_s16 = vpop.sfrf %2733 }
0x13d3   :  { %p2898_p5 = scmp.ne.s32.totalorder %s2734_s16, 0 }
0x13d5   :  { %2738 = shalt.err (%p2898_p5)  }
0x13d6   :  { %2740 = vsyncmov [#allocation4 + $0x8] }
0x13d9   :  { %s2741_s10 = vpop.sfrf %2740 }
0x13da   :  { %p2899_p6 = scmp.ne.s32.totalorder %s2741_s10, 0 }
0x13dc   :  { %2745 = shalt.err (%p2899_p6)  }
0x13dd   :  { %2747 = vsyncmov [#allocation4 + $0x9] }
0x13e0   :  { %s2748_s14 = vpop.sfrf %2747 }
0x13e1   :  { %p2900_p7 = scmp.ne.s32.totalorder %s2748_s14, 0 }
0x13e3   :  { %2752 = shalt.err (%p2900_p7)  }
0x13e4   :  { %2754 = vsyncmov [#allocation4 + $0xa] }
0x13e7   :  { %s2755_s27 = vpop.sfrf %2754 }
0x13e8   :  { %p2901_p8 = scmp.ne.s32.totalorder %s2755_s27, 0 }
0x13ea   :  { %2759 = shalt.err (%p2901_p8)  }
0x13eb   :  { %2761 = vsyncmov [#allocation4 + $0xb] }
0x13ee   :  { %s2762_s18 = vpop.sfrf %2761 }
0x13ef   :  { %p2902_p9 = scmp.ne.s32.totalorder %s2762_s18, 0 }
0x13f1   :  { %2766 = shalt.err (%p2902_p9)  }
0x13f2   :  { %2768 = vsyncmov [#allocation4 + $0xc] }
0x13f5   :  { %s2769_s5 = vpop.sfrf %2768 }
0x13f6   :  { %p2903_p10 = scmp.ne.s32.totalorder %s2769_s5, 0 }
0x13f8   :  { %2773 = shalt.err (%p2903_p10)  }
0x13f9   :  { %2775 = vsyncmov [#allocation4 + $0xd] }
0x13fc   :  { %s2776_s29 = vpop.sfrf %2775 }
0x13fd   :  { %p2904_p11 = scmp.ne.s32.totalorder %s2776_s29, 0 }
0x13ff   :  { %2780 = shalt.err (%p2904_p11)  }
0x1400   :  { %2782 = vsyncmov [#allocation4 + $0xe] }
0x1403   :  { %s2783_s8 = vpop.sfrf %2782 }
0x1404   :  { %p2905_p12 = scmp.ne.s32.totalorder %s2783_s8, 0 }
0x1406   :  { %2787 = shalt.err (%p2905_p12)  }
0x1407   :  { %2789 = vsyncmov [#allocation4 + $0xf] }
0x140a   :  { %s2790_s0 = vpop.sfrf %2789 }
0x140b   :  { %p2906_p13 = scmp.ne.s32.totalorder %s2790_s0, 0 }
0x140d   :  { %2794 = shalt.err (%p2906_p13)  }

</bundles_post_ra>
